<compile_context>
chip_gen: v7x
topology: tpu7x:2x2x1
jax: 0.10.0
libtpu: 0.0.40
codegen_flags: <defaults>
</compile_context>

<pallas_src>
import numpy as np

import jax
import jax.numpy as jnp
from jax.experimental import pallas as pl
from jax.experimental.pallas import tpu as pltpu  # noqa: F401  (TPU backend)

EPS = 1e-5

_IMG = 24 * 24     # flattened 24x24 frame (per-image valid data length)
STRIDE = 640       # per-image lane stride = 5 * 128 (lane-tile aligned)
_PAD0 = 256        # zero tail on the flattened input (needs >= 225)


# ----------------------------- Pallas kernel --------------------------------

def my_net_kernel(xf_ref, w1s_ref, b1_ref, g1_ref, be1_ref,
                  w2s_ref, b2_ref, g2_ref, be2_ref,
                  m1_ref, m2_ref, wcp_ref, bc_ref, o_ref):
    """conv1 -> BN1 -> maxpool -> conv2 -> BN2 -> softmax(dim=0) -> collapsed MLP."""
    N = o_ref.shape[0]
    P = N * STRIDE           # width of the y2 / softmax / MLP stage
    W1 = P + 125             # conv1+BN1 width (pool needs +25 lookahead)
    WM = P + 124             # chained-max intermediate width
    WP = P + 100             # pool width (conv2 needs +100 lookahead)
    W2S = P + 96             # conv2 stacked operand / partial width
    W1S = W1 + 96            # conv1 stacked operand / partial width

    xf = xf_ref[...]         # (3, P + _PAD0), zero tail, finite everywhere.

    # ---- conv1 (3->6, k5, VALID): separable shifts + stacked contraction ----
    xs = jnp.concatenate([xf[:, kw:kw + W1S] for kw in range(5)], axis=0)   # (15, W1S)
    y1 = b1_ref[...] + jnp.dot(w1s_ref[0], xs,
                               preferred_element_type=jnp.float32)[:, :W1]
    for kh in range(1, 5):
        part = jnp.dot(w1s_ref[kh], xs, preferred_element_type=jnp.float32)
        y1 = y1 + part[:, kh * 24: kh * 24 + W1]

    # ---- BatchNorm2d(6): biased training-mode stats over the valid (N,20,20) ----
    mask1 = jnp.concatenate([m1_ref[...]] * N, axis=1)          # (1, P), aligned copies
    inv_c1 = 1.0 / float(N * 20 * 20)
    y1v = y1[:, :P]
    mu1 = jnp.sum(y1v * mask1, axis=1, keepdims=True) * inv_c1
    d1 = (y1v - mu1) * mask1
    var1 = jnp.sum(d1 * d1, axis=1, keepdims=True) * inv_c1
    y1 = (y1 - mu1) * (jax.lax.rsqrt(var1 + EPS) * g1_ref[...]) + be1_ref[...]

    # ---- MaxPool2d(k=2, stride=1): two chained shifted maxima ----
    m = jnp.maximum(y1[:, :WM], y1[:, 1:WM + 1])
    pool = jnp.maximum(m[:, :WP], m[:, 24:WP + 24])

    # ---- conv2 (6->8, k5, VALID): separable shifts + stacked contraction ----
    ps = jnp.concatenate([pool[:, kw:kw + W2S] for kw in range(5)], axis=0)  # (30, W2S)
    y2 = b2_ref[...] + jnp.dot(w2s_ref[0], ps,
                               preferred_element_type=jnp.float32)[:, :P]
    for kh in range(1, 5):
        part = jnp.dot(w2s_ref[kh], ps, preferred_element_type=jnp.float32)
        y2 = y2 + part[:, kh * 24: kh * 24 + P]

    # ---- BatchNorm2d(8) over the valid (N, 15, 15) region ----
    mask2 = jnp.concatenate([m2_ref[...]] * N, axis=1)
    inv_c2 = 1.0 / float(N * 15 * 15)
    mu2 = jnp.sum(y2 * mask2, axis=1, keepdims=True) * inv_c2
    d2 = (y2 - mu2) * mask2
    var2 = jnp.sum(d2 * d2, axis=1, keepdims=True) * inv_c2
    y2 = (y2 - mu2) * (jax.lax.rsqrt(var2 + EPS) * g2_ref[...]) + be2_ref[...]

    # ---- Softmax over the batch axis (dim=0): 640-aligned per-image slices ----
    # mx is the per-lane max over ALL images (incl. garbage lanes), so every
    # exp(...) <= 1 and den >= 1: garbage positions stay bounded in [0, 1].
    mx = y2[:, 0:STRIDE]
    for n in range(1, N):
        mx = jnp.maximum(mx, y2[:, n * STRIDE:(n + 1) * STRIDE])
    exps = [jnp.exp(y2[:, n * STRIDE:(n + 1) * STRIDE] - mx) for n in range(N)]
    den = exps[0]
    for e in exps[1:]:
        den = den + e
    inv_den = pl.reciprocal(den, approx=False)      # EUP is idle: exact is free

    # ---- Flatten + collapsed Linear(1800->120->40->2) as masked VPU reductions ----
    # wcp[j] is the (8, STRIDE) per-image weight for output j, zero outside the
    # valid 15x15 window -> garbage lanes contribute nothing.
    w_out0 = wcp_ref[0]
    w_out1 = wcp_ref[1]
    rows = []
    for n in range(N):
        s_n = exps[n] * inv_den                     # (8, STRIDE) softmax slice
        a0 = jnp.sum(jnp.sum(s_n * w_out0, axis=1, keepdims=True),
                     axis=0, keepdims=True)         # (1, 1)
        a1 = jnp.sum(jnp.sum(s_n * w_out1, axis=1, keepdims=True),
                     axis=0, keepdims=True)
        rows.append(jnp.concatenate([a0, a1], axis=1))   # (1, 2)
    o_ref[...] = jnp.concatenate(rows, axis=0) + bc_ref[...]


# ------------------------------- wrappers ------------------------------------

def _full_spec(shape):
    zeros = (0,) * len(shape)
    return pl.BlockSpec(shape, lambda i: zeros)


def prepare_params(params):
    """One-time param prep: stacked conv weights, masks, collapsed MLP weights."""
    (w1, b1, g1, be1, w2, b2, g2, be2, lw1, lb1, lw2, lb2, lw3, lb3) = params
    hi = jax.lax.Precision.HIGHEST

    # Stacked conv weights for the separable-shift contraction:
    #   wks[kh, cout, kw*Cin + cin] = w[cout, cin, kh, kw]
    w1s = jnp.transpose(w1, (2, 0, 3, 1)).reshape(5, 6, 15)
    w2s = jnp.transpose(w2, (2, 0, 3, 1)).reshape(5, 8, 30)

    # Collapse the three Linear layers (no nonlinearity between them).
    wc = jnp.dot(jnp.dot(lw1.T, lw2.T, precision=hi), lw3.T, precision=hi)   # (1800, 2)
    bc = (jnp.dot(jnp.dot(lb1, lw2.T, precision=hi), lw3.T, precision=hi)
          + jnp.dot(lb2, lw3.T, precision=hi) + lb3).reshape(1, 2)

    # Scatter collapsed weights onto the per-image 24x24 flat grid (STRIDE lanes),
    # zero outside the valid 15x15 window.
    wcp = jnp.zeros((8, 24, 24, 2), jnp.float32)
    wcp = wcp.at[:, :15, :15, :].set(wc.reshape(8, 15, 15, 2))
    wcp = wcp.reshape(8, _IMG, 2)
    wcp = jnp.pad(wcp, ((0, 0), (0, STRIDE - _IMG), (0, 0)))
    wcp = jnp.transpose(wcp, (2, 0, 1))                                      # (2, 8, STRIDE)

    # Per-image BN validity masks on the padded flat grid.
    def img_mask(oh, ow):
        g = np.zeros((24, 24), np.float32)
        g[:oh, :ow] = 1.0
        mflat = np.zeros((1, STRIDE), np.float32)
        mflat[0, :_IMG] = g.reshape(-1)
        return jnp.asarray(mflat)

    return (w1s, b1.reshape(6, 1), g1.reshape(6, 1), be1.reshape(6, 1),
            w2s, b2.reshape(8, 1), g2.reshape(8, 1), be2.reshape(8, 1),
            img_mask(20, 20), img_mask(15, 15), wcp, bc)


def my_net_forward(x_nchw, prepped):
    (w1s, b1c, g1c, be1c, w2s, b2c, g2c, be2c, m1i, m2i, wcp, bcc) = prepped
    N = x_nchw.shape[0]

    # Tiny boundary glue: NCHW -> channel-major, 640-lane per-image stride, zero tail.
    xf = jnp.transpose(x_nchw.astype(jnp.float32), (1, 0, 2, 3)).reshape(3, N, _IMG)
    xf = jnp.pad(xf, ((0, 0), (0, 0), (0, STRIDE - _IMG))).reshape(3, N * STRIDE)
    xf = jnp.pad(xf, ((0, 0), (0, _PAD0)))

    args = (xf, w1s, b1c, g1c, be1c, w2s, b2c, g2c, be2c, m1i, m2i, wcp, bcc)
    return pl.pallas_call(
        my_net_kernel,
        out_shape=jax.ShapeDtypeStruct((N, 2), jnp.float32),
        grid=(1,),
        in_specs=[_full_spec(a.shape) for a in args],
        out_specs=_full_spec((N, 2)),
    )(*args)


# -------------------------- reference (pure JAX) -----------------------------

def reference_forward(x, params):
    (w1, b1, g1, be1, w2, b2, g2, be2,
     lw1, lb1, lw2, lb2, lw3, lb3) = params
    hi = jax.lax.Precision.HIGHEST

    def bn(y, g, b):
        m = y.mean(axis=(0, 2, 3), keepdims=True)
        v = ((y - m) ** 2).mean(axis=(0, 2, 3), keepdims=True)
        return (y - m) / jnp.sqrt(v + EPS) * g[None, :, None, None] + b[None, :, None, None]

    dn = ('NCHW', 'OIHW', 'NCHW')
    y = jax.lax.conv_general_dilated(x, w1, (1, 1), 'VALID', dimension_numbers=dn,
                                     precision=hi) + b1[None, :, None, None]
    y = bn(y, g1, be1)
    y = jax.lax.reduce_window(y, -jnp.inf, jax.lax.max,
                              (1, 1, 2, 2), (1, 1, 1, 1), 'VALID')
    y = jax.lax.conv_general_dilated(y, w2, (1, 1), 'VALID', dimension_numbers=dn,
                                     precision=hi) + b2[None, :, None, None]
    y = bn(y, g2, be2)
    y = jax.nn.softmax(y, axis=0)
    y = y.reshape(y.shape[0], -1)
    y = jnp.dot(y, lw1.T, precision=hi) + lb1
    y = jnp.dot(y, lw2.T, precision=hi) + lb2
    y = jnp.dot(y, lw3.T, precision=hi) + lb3
    return y


# --------------------------- deterministic params ----------------------------

def init_params(key):
    ks = jax.random.split(key, 10)

    def u(k, shape, fan_in):
        bound = 1.0 / float(fan_in) ** 0.5
        return jax.random.uniform(k, shape, jnp.float32, -bound, bound)

    w1 = u(ks[0], (6, 3, 5, 5), 3 * 25)
    b1 = u(ks[1], (6,), 3 * 25)
    w2 = u(ks[2], (8, 6, 5, 5), 6 * 25)
    b2 = u(ks[3], (8,), 6 * 25)
    lw1 = u(ks[4], (120, 1800), 1800)
    lb1 = u(ks[5], (120,), 1800)
    lw2 = u(ks[6], (40, 120), 120)
    lb2 = u(ks[7], (40,), 120)
    lw3 = u(ks[8], (2, 40), 40)
    lb3 = u(ks[9], (2,), 40)
    g1 = jnp.ones((6,), jnp.float32)
    be1 = jnp.zeros((6,), jnp.float32)
    g2 = jnp.ones((8,), jnp.float32)
    be2 = jnp.zeros((8,), jnp.float32)
    return (w1, b1, g1, be1, w2, b2, g2, be2, lw1, lb1, lw2, lb2, lw3, lb3)


if __name__ == "__main__":
    key = jax.random.PRNGKey(0)
    pkey, xkey = jax.random.split(key)
    params = init_params(pkey)
    prepped = prepare_params(params)          # one-time, outside the forward path

    # Input must be 24x24 spatial so that 8*15*15 = 1800 matches Linear(1800, 120).
    x = jax.random.normal(xkey, (4, 3, 24, 24), jnp.float32)

    fwd = jax.jit(my_net_forward)
    out = jax.block_until_ready(fwd(x, prepped))
    ref = jax.block_until_ready(reference_forward(x, params))

    assert out.shape == (4, 2), out.shape
    max_err = float(jnp.max(jnp.abs(out - ref)))
    if max_err > 2e-3:
        raise AssertionError(f"Pallas kernel mismatch vs reference: max abs err = {max_err}")
    print("KERNEL_OK")
</pallas_src>

<mosaic_0001>
module attributes {stable_mosaic.version = 11 : i64} {
  func.func @my_net_kernel(%arg0: i32, %arg1: memref<3x2816xf32, #tpu.memory_space<vmem>>, %arg2: memref<5x6x15xf32, #tpu.memory_space<vmem>>, %arg3: memref<6x1xf32, #tpu.memory_space<vmem>>, %arg4: memref<6x1xf32, #tpu.memory_space<vmem>>, %arg5: memref<6x1xf32, #tpu.memory_space<vmem>>, %arg6: memref<5x8x30xf32, #tpu.memory_space<vmem>>, %arg7: memref<8x1xf32, #tpu.memory_space<vmem>>, %arg8: memref<8x1xf32, #tpu.memory_space<vmem>>, %arg9: memref<8x1xf32, #tpu.memory_space<vmem>>, %arg10: memref<1x640xf32, #tpu.memory_space<vmem>>, %arg11: memref<1x640xf32, #tpu.memory_space<vmem>>, %arg12: memref<2x8x640xf32, #tpu.memory_space<vmem>>, %arg13: memref<1x2xf32, #tpu.memory_space<vmem>>, %arg14: memref<4x2xf32, #tpu.memory_space<vmem>>) attributes {dimension_semantics = [#tpu.dimension_semantics<arbitrary>], iteration_bounds = array<i64: 1>, scalar_prefetch = 0 : i64, scratch_operands = 0 : i64, tpu.core_type = #tpu.core_type<tc>, window_params = [{pipeline_mode = #tpu.pipeline_mode<synchronous>, transform_indices = @transform_0, window_bounds = array<i64: 3, 2816>}, {pipeline_mode = #tpu.pipeline_mode<synchronous>, transform_indices = @transform_1, window_bounds = array<i64: 5, 6, 15>}, {pipeline_mode = #tpu.pipeline_mode<synchronous>, transform_indices = @transform_2, window_bounds = array<i64: 6, 1>}, {pipeline_mode = #tpu.pipeline_mode<synchronous>, transform_indices = @transform_3, window_bounds = array<i64: 6, 1>}, {pipeline_mode = #tpu.pipeline_mode<synchronous>, transform_indices = @transform_4, window_bounds = array<i64: 6, 1>}, {pipeline_mode = #tpu.pipeline_mode<synchronous>, transform_indices = @transform_5, window_bounds = array<i64: 5, 8, 30>}, {pipeline_mode = #tpu.pipeline_mode<synchronous>, transform_indices = @transform_6, window_bounds = array<i64: 8, 1>}, {pipeline_mode = #tpu.pipeline_mode<synchronous>, transform_indices = @transform_7, window_bounds = array<i64: 8, 1>}, {pipeline_mode = #tpu.pipeline_mode<synchronous>, transform_indices = @transform_8, window_bounds = array<i64: 8, 1>}, {pipeline_mode = #tpu.pipeline_mode<synchronous>, transform_indices = @transform_9, window_bounds = array<i64: 1, 640>}, {pipeline_mode = #tpu.pipeline_mode<synchronous>, transform_indices = @transform_10, window_bounds = array<i64: 1, 640>}, {pipeline_mode = #tpu.pipeline_mode<synchronous>, transform_indices = @transform_11, window_bounds = array<i64: 2, 8, 640>}, {pipeline_mode = #tpu.pipeline_mode<synchronous>, transform_indices = @transform_12, window_bounds = array<i64: 1, 2>}, {pipeline_mode = #tpu.pipeline_mode<synchronous>, transform_indices = @transform_13, window_bounds = array<i64: 4, 2>}]} {
    %c0 = arith.constant 0 : index
    %c0_0 = arith.constant 0 : index
    %0 = vector.load %arg1[%c0, %c0_0] : memref<3x2816xf32, #tpu.memory_space<vmem>>, vector<3x2816xf32>
    %1 = vector.extract_strided_slice %0 {offsets = [0, 0], sizes = [3, 2781], strides = [1, 1]} : vector<3x2816xf32> to vector<3x2781xf32>
    %2 = vector.extract_strided_slice %0 {offsets = [0, 1], sizes = [3, 2781], strides = [1, 1]} : vector<3x2816xf32> to vector<3x2781xf32>
    %3 = vector.extract_strided_slice %0 {offsets = [0, 2], sizes = [3, 2781], strides = [1, 1]} : vector<3x2816xf32> to vector<3x2781xf32>
    %4 = vector.extract_strided_slice %0 {offsets = [0, 3], sizes = [3, 2781], strides = [1, 1]} : vector<3x2816xf32> to vector<3x2781xf32>
    %5 = vector.extract_strided_slice %0 {offsets = [0, 4], sizes = [3, 2781], strides = [1, 1]} : vector<3x2816xf32> to vector<3x2781xf32>
    %6 = tpu.concatenate %1, %2, %3, %4, %5 in 0 : vector<3x2781xf32>, vector<3x2781xf32>, vector<3x2781xf32>, vector<3x2781xf32>, vector<3x2781xf32> -> vector<15x2781xf32>
    %c0_1 = arith.constant 0 : index
    %c0_2 = arith.constant 0 : index
    %7 = vector.load %arg3[%c0_1, %c0_2] : memref<6x1xf32, #tpu.memory_space<vmem>>, vector<6x1xf32>
    %c0_3 = arith.constant 0 : index
    %c0_4 = arith.constant 0 : index
    %c0_5 = arith.constant 0 : index
    %8 = vector.load %arg2[%c0_3, %c0_4, %c0_5] : memref<5x6x15xf32, #tpu.memory_space<vmem>>, vector<1x6x15xf32>
    %9 = vector.shape_cast %8 : vector<1x6x15xf32> to vector<6x15xf32>
    %cst = arith.constant dense<0.000000e+00> : vector<6x2781xf32>
    %10 = tpu.matmul %9, %6, %cst {dimension_numbers = #tpu.dot_dimension_numbers<[1], [0], [0], [1], [0, 0, 1, 1], [], []>} : vector<6x15xf32>, vector<15x2781xf32>, vector<6x2781xf32> -> vector<6x2781xf32>
    %11 = vector.extract_strided_slice %10 {offsets = [0, 0], sizes = [6, 2685], strides = [1, 1]} : vector<6x2781xf32> to vector<6x2685xf32>
    %12 = vector.broadcast %7 : vector<6x1xf32> to vector<6x2685xf32>
    %13 = arith.addf %12, %11 : vector<6x2685xf32>
    %c1 = arith.constant 1 : index
    %c0_6 = arith.constant 0 : index
    %c0_7 = arith.constant 0 : index
    %14 = vector.load %arg2[%c1, %c0_6, %c0_7] : memref<5x6x15xf32, #tpu.memory_space<vmem>>, vector<1x6x15xf32>
    %15 = vector.shape_cast %14 : vector<1x6x15xf32> to vector<6x15xf32>
    %cst_8 = arith.constant dense<0.000000e+00> : vector<6x2781xf32>
    %16 = tpu.matmul %15, %6, %cst_8 {dimension_numbers = #tpu.dot_dimension_numbers<[1], [0], [0], [1], [0, 0, 1, 1], [], []>} : vector<6x15xf32>, vector<15x2781xf32>, vector<6x2781xf32> -> vector<6x2781xf32>
    %17 = vector.extract_strided_slice %16 {offsets = [0, 24], sizes = [6, 2685], strides = [1, 1]} : vector<6x2781xf32> to vector<6x2685xf32>
    %18 = arith.addf %13, %17 : vector<6x2685xf32>
    %c2 = arith.constant 2 : index
    %c0_9 = arith.constant 0 : index
    %c0_10 = arith.constant 0 : index
    %19 = vector.load %arg2[%c2, %c0_9, %c0_10] : memref<5x6x15xf32, #tpu.memory_space<vmem>>, vector<1x6x15xf32>
    %20 = vector.shape_cast %19 : vector<1x6x15xf32> to vector<6x15xf32>
    %cst_11 = arith.constant dense<0.000000e+00> : vector<6x2781xf32>
    %21 = tpu.matmul %20, %6, %cst_11 {dimension_numbers = #tpu.dot_dimension_numbers<[1], [0], [0], [1], [0, 0, 1, 1], [], []>} : vector<6x15xf32>, vector<15x2781xf32>, vector<6x2781xf32> -> vector<6x2781xf32>
    %22 = vector.extract_strided_slice %21 {offsets = [0, 48], sizes = [6, 2685], strides = [1, 1]} : vector<6x2781xf32> to vector<6x2685xf32>
    %23 = arith.addf %18, %22 : vector<6x2685xf32>
    %c3 = arith.constant 3 : index
    %c0_12 = arith.constant 0 : index
    %c0_13 = arith.constant 0 : index
    %24 = vector.load %arg2[%c3, %c0_12, %c0_13] : memref<5x6x15xf32, #tpu.memory_space<vmem>>, vector<1x6x15xf32>
    %25 = vector.shape_cast %24 : vector<1x6x15xf32> to vector<6x15xf32>
    %cst_14 = arith.constant dense<0.000000e+00> : vector<6x2781xf32>
    %26 = tpu.matmul %25, %6, %cst_14 {dimension_numbers = #tpu.dot_dimension_numbers<[1], [0], [0], [1], [0, 0, 1, 1], [], []>} : vector<6x15xf32>, vector<15x2781xf32>, vector<6x2781xf32> -> vector<6x2781xf32>
    %27 = vector.extract_strided_slice %26 {offsets = [0, 72], sizes = [6, 2685], strides = [1, 1]} : vector<6x2781xf32> to vector<6x2685xf32>
    %28 = arith.addf %23, %27 : vector<6x2685xf32>
    %c4 = arith.constant 4 : index
    %c0_15 = arith.constant 0 : index
    %c0_16 = arith.constant 0 : index
    %29 = vector.load %arg2[%c4, %c0_15, %c0_16] : memref<5x6x15xf32, #tpu.memory_space<vmem>>, vector<1x6x15xf32>
    %30 = vector.shape_cast %29 : vector<1x6x15xf32> to vector<6x15xf32>
    %cst_17 = arith.constant dense<0.000000e+00> : vector<6x2781xf32>
    %31 = tpu.matmul %30, %6, %cst_17 {dimension_numbers = #tpu.dot_dimension_numbers<[1], [0], [0], [1], [0, 0, 1, 1], [], []>} : vector<6x15xf32>, vector<15x2781xf32>, vector<6x2781xf32> -> vector<6x2781xf32>
    %32 = vector.extract_strided_slice %31 {offsets = [0, 96], sizes = [6, 2685], strides = [1, 1]} : vector<6x2781xf32> to vector<6x2685xf32>
    %33 = arith.addf %28, %32 : vector<6x2685xf32>
    %c0_18 = arith.constant 0 : index
    %c0_19 = arith.constant 0 : index
    %34 = vector.load %arg10[%c0_18, %c0_19] : memref<1x640xf32, #tpu.memory_space<vmem>>, vector<1x640xf32>
    %35 = tpu.concatenate %34, %34, %34, %34 in 1 : vector<1x640xf32>, vector<1x640xf32>, vector<1x640xf32>, vector<1x640xf32> -> vector<1x2560xf32>
    %36 = vector.extract_strided_slice %33 {offsets = [0, 0], sizes = [6, 2560], strides = [1, 1]} : vector<6x2685xf32> to vector<6x2560xf32>
    %37 = vector.broadcast %35 : vector<1x2560xf32> to vector<6x2560xf32>
    %38 = arith.mulf %36, %37 : vector<6x2560xf32>
    %cst_20 = arith.constant dense<0.000000e+00> : vector<6xf32>
    %39 = vector.multi_reduction <add>, %38, %cst_20 [1] : vector<6x2560xf32> to vector<6xf32>
    %40 = vector.shape_cast %39 : vector<6xf32> to vector<6x1xf32>
    %cst_21 = arith.constant 6.250000e-04 : f32
    %41 = vector.broadcast %cst_21 : f32 to vector<6x1xf32>
    %42 = arith.mulf %40, %41 : vector<6x1xf32>
    %43 = vector.broadcast %42 : vector<6x1xf32> to vector<6x2560xf32>
    %44 = arith.subf %36, %43 : vector<6x2560xf32>
    %45 = vector.broadcast %35 : vector<1x2560xf32> to vector<6x2560xf32>
    %46 = arith.mulf %44, %45 : vector<6x2560xf32>
    %47 = arith.mulf %46, %46 : vector<6x2560xf32>
    %cst_22 = arith.constant dense<0.000000e+00> : vector<6xf32>
    %48 = vector.multi_reduction <add>, %47, %cst_22 [1] : vector<6x2560xf32> to vector<6xf32>
    %49 = vector.shape_cast %48 : vector<6xf32> to vector<6x1xf32>
    %cst_23 = arith.constant 6.250000e-04 : f32
    %50 = vector.broadcast %cst_23 : f32 to vector<6x1xf32>
    %51 = arith.mulf %49, %50 : vector<6x1xf32>
    %52 = vector.broadcast %42 : vector<6x1xf32> to vector<6x2685xf32>
    %53 = arith.subf %33, %52 : vector<6x2685xf32>
    %cst_24 = arith.constant 9.99999974E-6 : f32
    %54 = vector.broadcast %cst_24 : f32 to vector<6x1xf32>
    %55 = arith.addf %51, %54 : vector<6x1xf32>
    %56 = math.rsqrt %55 : vector<6x1xf32>
    %c0_25 = arith.constant 0 : index
    %c0_26 = arith.constant 0 : index
    %57 = vector.load %arg4[%c0_25, %c0_26] : memref<6x1xf32, #tpu.memory_space<vmem>>, vector<6x1xf32>
    %58 = arith.mulf %56, %57 : vector<6x1xf32>
    %59 = vector.broadcast %58 : vector<6x1xf32> to vector<6x2685xf32>
    %60 = arith.mulf %53, %59 : vector<6x2685xf32>
    %c0_27 = arith.constant 0 : index
    %c0_28 = arith.constant 0 : index
    %61 = vector.load %arg5[%c0_27, %c0_28] : memref<6x1xf32, #tpu.memory_space<vmem>>, vector<6x1xf32>
    %62 = vector.broadcast %61 : vector<6x1xf32> to vector<6x2685xf32>
    %63 = arith.addf %60, %62 : vector<6x2685xf32>
    %64 = vector.extract_strided_slice %63 {offsets = [0, 0], sizes = [6, 2684], strides = [1, 1]} : vector<6x2685xf32> to vector<6x2684xf32>
    %65 = vector.extract_strided_slice %63 {offsets = [0, 1], sizes = [6, 2684], strides = [1, 1]} : vector<6x2685xf32> to vector<6x2684xf32>
    %66 = arith.maximumf %64, %65 : vector<6x2684xf32>
    %67 = vector.extract_strided_slice %66 {offsets = [0, 0], sizes = [6, 2660], strides = [1, 1]} : vector<6x2684xf32> to vector<6x2660xf32>
    %68 = vector.extract_strided_slice %66 {offsets = [0, 24], sizes = [6, 2660], strides = [1, 1]} : vector<6x2684xf32> to vector<6x2660xf32>
    %69 = arith.maximumf %67, %68 : vector<6x2660xf32>
    %70 = vector.extract_strided_slice %69 {offsets = [0, 0], sizes = [6, 2656], strides = [1, 1]} : vector<6x2660xf32> to vector<6x2656xf32>
    %71 = vector.extract_strided_slice %69 {offsets = [0, 1], sizes = [6, 2656], strides = [1, 1]} : vector<6x2660xf32> to vector<6x2656xf32>
    %72 = vector.extract_strided_slice %69 {offsets = [0, 2], sizes = [6, 2656], strides = [1, 1]} : vector<6x2660xf32> to vector<6x2656xf32>
    %73 = vector.extract_strided_slice %69 {offsets = [0, 3], sizes = [6, 2656], strides = [1, 1]} : vector<6x2660xf32> to vector<6x2656xf32>
    %74 = vector.extract_strided_slice %69 {offsets = [0, 4], sizes = [6, 2656], strides = [1, 1]} : vector<6x2660xf32> to vector<6x2656xf32>
    %75 = tpu.concatenate %70, %71, %72, %73, %74 in 0 : vector<6x2656xf32>, vector<6x2656xf32>, vector<6x2656xf32>, vector<6x2656xf32>, vector<6x2656xf32> -> vector<30x2656xf32>
    %c0_29 = arith.constant 0 : index
    %c0_30 = arith.constant 0 : index
    %76 = vector.load %arg7[%c0_29, %c0_30] : memref<8x1xf32, #tpu.memory_space<vmem>>, vector<8x1xf32>
    %c0_31 = arith.constant 0 : index
    %c0_32 = arith.constant 0 : index
    %c0_33 = arith.constant 0 : index
    %77 = vector.load %arg6[%c0_31, %c0_32, %c0_33] : memref<5x8x30xf32, #tpu.memory_space<vmem>>, vector<1x8x30xf32>
    %78 = vector.shape_cast %77 : vector<1x8x30xf32> to vector<8x30xf32>
    %cst_34 = arith.constant dense<0.000000e+00> : vector<8x2656xf32>
    %79 = tpu.matmul %78, %75, %cst_34 {dimension_numbers = #tpu.dot_dimension_numbers<[1], [0], [0], [1], [0, 0, 1, 1], [], []>} : vector<8x30xf32>, vector<30x2656xf32>, vector<8x2656xf32> -> vector<8x2656xf32>
    %80 = vector.extract_strided_slice %79 {offsets = [0, 0], sizes = [8, 2560], strides = [1, 1]} : vector<8x2656xf32> to vector<8x2560xf32>
    %81 = vector.broadcast %76 : vector<8x1xf32> to vector<8x2560xf32>
    %82 = arith.addf %81, %80 : vector<8x2560xf32>
    %c1_35 = arith.constant 1 : index
    %c0_36 = arith.constant 0 : index
    %c0_37 = arith.constant 0 : index
    %83 = vector.load %arg6[%c1_35, %c0_36, %c0_37] : memref<5x8x30xf32, #tpu.memory_space<vmem>>, vector<1x8x30xf32>
    %84 = vector.shape_cast %83 : vector<1x8x30xf32> to vector<8x30xf32>
    %cst_38 = arith.constant dense<0.000000e+00> : vector<8x2656xf32>
    %85 = tpu.matmul %84, %75, %cst_38 {dimension_numbers = #tpu.dot_dimension_numbers<[1], [0], [0], [1], [0, 0, 1, 1], [], []>} : vector<8x30xf32>, vector<30x2656xf32>, vector<8x2656xf32> -> vector<8x2656xf32>
    %86 = vector.extract_strided_slice %85 {offsets = [0, 24], sizes = [8, 2560], strides = [1, 1]} : vector<8x2656xf32> to vector<8x2560xf32>
    %87 = arith.addf %82, %86 : vector<8x2560xf32>
    %c2_39 = arith.constant 2 : index
    %c0_40 = arith.constant 0 : index
    %c0_41 = arith.constant 0 : index
    %88 = vector.load %arg6[%c2_39, %c0_40, %c0_41] : memref<5x8x30xf32, #tpu.memory_space<vmem>>, vector<1x8x30xf32>
    %89 = vector.shape_cast %88 : vector<1x8x30xf32> to vector<8x30xf32>
    %cst_42 = arith.constant dense<0.000000e+00> : vector<8x2656xf32>
    %90 = tpu.matmul %89, %75, %cst_42 {dimension_numbers = #tpu.dot_dimension_numbers<[1], [0], [0], [1], [0, 0, 1, 1], [], []>} : vector<8x30xf32>, vector<30x2656xf32>, vector<8x2656xf32> -> vector<8x2656xf32>
    %91 = vector.extract_strided_slice %90 {offsets = [0, 48], sizes = [8, 2560], strides = [1, 1]} : vector<8x2656xf32> to vector<8x2560xf32>
    %92 = arith.addf %87, %91 : vector<8x2560xf32>
    %c3_43 = arith.constant 3 : index
    %c0_44 = arith.constant 0 : index
    %c0_45 = arith.constant 0 : index
    %93 = vector.load %arg6[%c3_43, %c0_44, %c0_45] : memref<5x8x30xf32, #tpu.memory_space<vmem>>, vector<1x8x30xf32>
    %94 = vector.shape_cast %93 : vector<1x8x30xf32> to vector<8x30xf32>
    %cst_46 = arith.constant dense<0.000000e+00> : vector<8x2656xf32>
    %95 = tpu.matmul %94, %75, %cst_46 {dimension_numbers = #tpu.dot_dimension_numbers<[1], [0], [0], [1], [0, 0, 1, 1], [], []>} : vector<8x30xf32>, vector<30x2656xf32>, vector<8x2656xf32> -> vector<8x2656xf32>
    %96 = vector.extract_strided_slice %95 {offsets = [0, 72], sizes = [8, 2560], strides = [1, 1]} : vector<8x2656xf32> to vector<8x2560xf32>
    %97 = arith.addf %92, %96 : vector<8x2560xf32>
    %c4_47 = arith.constant 4 : index
    %c0_48 = arith.constant 0 : index
    %c0_49 = arith.constant 0 : index
    %98 = vector.load %arg6[%c4_47, %c0_48, %c0_49] : memref<5x8x30xf32, #tpu.memory_space<vmem>>, vector<1x8x30xf32>
    %99 = vector.shape_cast %98 : vector<1x8x30xf32> to vector<8x30xf32>
    %cst_50 = arith.constant dense<0.000000e+00> : vector<8x2656xf32>
    %100 = tpu.matmul %99, %75, %cst_50 {dimension_numbers = #tpu.dot_dimension_numbers<[1], [0], [0], [1], [0, 0, 1, 1], [], []>} : vector<8x30xf32>, vector<30x2656xf32>, vector<8x2656xf32> -> vector<8x2656xf32>
    %101 = vector.extract_strided_slice %100 {offsets = [0, 96], sizes = [8, 2560], strides = [1, 1]} : vector<8x2656xf32> to vector<8x2560xf32>
    %102 = arith.addf %97, %101 : vector<8x2560xf32>
    %c0_51 = arith.constant 0 : index
    %c0_52 = arith.constant 0 : index
    %103 = vector.load %arg11[%c0_51, %c0_52] : memref<1x640xf32, #tpu.memory_space<vmem>>, vector<1x640xf32>
    %104 = tpu.concatenate %103, %103, %103, %103 in 1 : vector<1x640xf32>, vector<1x640xf32>, vector<1x640xf32>, vector<1x640xf32> -> vector<1x2560xf32>
    %105 = vector.broadcast %104 : vector<1x2560xf32> to vector<8x2560xf32>
    %106 = arith.mulf %102, %105 : vector<8x2560xf32>
    %cst_53 = arith.constant dense<0.000000e+00> : vector<8xf32>
    %107 = vector.multi_reduction <add>, %106, %cst_53 [1] : vector<8x2560xf32> to vector<8xf32>
    %108 = vector.shape_cast %107 : vector<8xf32> to vector<8x1xf32>
    %cst_54 = arith.constant 0.00111111114 : f32
    %109 = vector.broadcast %cst_54 : f32 to vector<8x1xf32>
    %110 = arith.mulf %108, %109 : vector<8x1xf32>
    %111 = vector.broadcast %110 : vector<8x1xf32> to vector<8x2560xf32>
    %112 = arith.subf %102, %111 : vector<8x2560xf32>
    %113 = vector.broadcast %104 : vector<1x2560xf32> to vector<8x2560xf32>
    %114 = arith.mulf %112, %113 : vector<8x2560xf32>
    %115 = arith.mulf %114, %114 : vector<8x2560xf32>
    %cst_55 = arith.constant dense<0.000000e+00> : vector<8xf32>
    %116 = vector.multi_reduction <add>, %115, %cst_55 [1] : vector<8x2560xf32> to vector<8xf32>
    %117 = vector.shape_cast %116 : vector<8xf32> to vector<8x1xf32>
    %cst_56 = arith.constant 0.00111111114 : f32
    %118 = vector.broadcast %cst_56 : f32 to vector<8x1xf32>
    %119 = arith.mulf %117, %118 : vector<8x1xf32>
    %120 = vector.broadcast %110 : vector<8x1xf32> to vector<8x2560xf32>
    %121 = arith.subf %102, %120 : vector<8x2560xf32>
    %cst_57 = arith.constant 9.99999974E-6 : f32
    %122 = vector.broadcast %cst_57 : f32 to vector<8x1xf32>
    %123 = arith.addf %119, %122 : vector<8x1xf32>
    %124 = math.rsqrt %123 : vector<8x1xf32>
    %c0_58 = arith.constant 0 : index
    %c0_59 = arith.constant 0 : index
    %125 = vector.load %arg8[%c0_58, %c0_59] : memref<8x1xf32, #tpu.memory_space<vmem>>, vector<8x1xf32>
    %126 = arith.mulf %124, %125 : vector<8x1xf32>
    %127 = vector.broadcast %126 : vector<8x1xf32> to vector<8x2560xf32>
    %128 = arith.mulf %121, %127 : vector<8x2560xf32>
    %c0_60 = arith.constant 0 : index
    %c0_61 = arith.constant 0 : index
    %129 = vector.load %arg9[%c0_60, %c0_61] : memref<8x1xf32, #tpu.memory_space<vmem>>, vector<8x1xf32>
    %130 = vector.broadcast %129 : vector<8x1xf32> to vector<8x2560xf32>
    %131 = arith.addf %128, %130 : vector<8x2560xf32>
    %132 = vector.extract_strided_slice %131 {offsets = [0, 0], sizes = [8, 640], strides = [1, 1]} : vector<8x2560xf32> to vector<8x640xf32>
    %133 = vector.extract_strided_slice %131 {offsets = [0, 640], sizes = [8, 640], strides = [1, 1]} : vector<8x2560xf32> to vector<8x640xf32>
    %134 = arith.maximumf %132, %133 : vector<8x640xf32>
    %135 = vector.extract_strided_slice %131 {offsets = [0, 1280], sizes = [8, 640], strides = [1, 1]} : vector<8x2560xf32> to vector<8x640xf32>
    %136 = arith.maximumf %134, %135 : vector<8x640xf32>
    %137 = vector.extract_strided_slice %131 {offsets = [0, 1920], sizes = [8, 640], strides = [1, 1]} : vector<8x2560xf32> to vector<8x640xf32>
    %138 = arith.maximumf %136, %137 : vector<8x640xf32>
    %139 = vector.extract_strided_slice %131 {offsets = [0, 0], sizes = [8, 640], strides = [1, 1]} : vector<8x2560xf32> to vector<8x640xf32>
    %140 = arith.subf %139, %138 : vector<8x640xf32>
    %141 = math.exp %140 : vector<8x640xf32>
    %142 = vector.extract_strided_slice %131 {offsets = [0, 640], sizes = [8, 640], strides = [1, 1]} : vector<8x2560xf32> to vector<8x640xf32>
    %143 = arith.subf %142, %138 : vector<8x640xf32>
    %144 = math.exp %143 : vector<8x640xf32>
    %145 = vector.extract_strided_slice %131 {offsets = [0, 1280], sizes = [8, 640], strides = [1, 1]} : vector<8x2560xf32> to vector<8x640xf32>
    %146 = arith.subf %145, %138 : vector<8x640xf32>
    %147 = math.exp %146 : vector<8x640xf32>
    %148 = vector.extract_strided_slice %131 {offsets = [0, 1920], sizes = [8, 640], strides = [1, 1]} : vector<8x2560xf32> to vector<8x640xf32>
    %149 = arith.subf %148, %138 : vector<8x640xf32>
    %150 = math.exp %149 : vector<8x640xf32>
    %151 = arith.addf %141, %144 : vector<8x640xf32>
    %152 = arith.addf %151, %147 : vector<8x640xf32>
    %153 = arith.addf %152, %150 : vector<8x640xf32>
    %154 = tpu.reciprocal %153 : vector<8x640xf32> -> vector<8x640xf32>
    %c0_62 = arith.constant 0 : index
    %c0_63 = arith.constant 0 : index
    %c0_64 = arith.constant 0 : index
    %155 = vector.load %arg12[%c0_62, %c0_63, %c0_64] : memref<2x8x640xf32, #tpu.memory_space<vmem>>, vector<1x8x640xf32>
    %156 = vector.shape_cast %155 : vector<1x8x640xf32> to vector<8x640xf32>
    %c1_65 = arith.constant 1 : index
    %c0_66 = arith.constant 0 : index
    %c0_67 = arith.constant 0 : index
    %157 = vector.load %arg12[%c1_65, %c0_66, %c0_67] : memref<2x8x640xf32, #tpu.memory_space<vmem>>, vector<1x8x640xf32>
    %158 = vector.shape_cast %157 : vector<1x8x640xf32> to vector<8x640xf32>
    %159 = arith.mulf %141, %154 : vector<8x640xf32>
    %160 = arith.mulf %159, %156 : vector<8x640xf32>
    %cst_68 = arith.constant dense<0.000000e+00> : vector<8xf32>
    %161 = vector.multi_reduction <add>, %160, %cst_68 [1] : vector<8x640xf32> to vector<8xf32>
    %162 = vector.shape_cast %161 : vector<8xf32> to vector<8x1xf32>
    %cst_69 = arith.constant dense<0.000000e+00> : vector<1xf32>
    %163 = vector.multi_reduction <add>, %162, %cst_69 [0] : vector<8x1xf32> to vector<1xf32>
    %164 = vector.shape_cast %163 : vector<1xf32> to vector<1x1xf32>
    %165 = arith.mulf %159, %158 : vector<8x640xf32>
    %cst_70 = arith.constant dense<0.000000e+00> : vector<8xf32>
    %166 = vector.multi_reduction <add>, %165, %cst_70 [1] : vector<8x640xf32> to vector<8xf32>
    %167 = vector.shape_cast %166 : vector<8xf32> to vector<8x1xf32>
    %cst_71 = arith.constant dense<0.000000e+00> : vector<1xf32>
    %168 = vector.multi_reduction <add>, %167, %cst_71 [0] : vector<8x1xf32> to vector<1xf32>
    %169 = vector.shape_cast %168 : vector<1xf32> to vector<1x1xf32>
    %170 = tpu.concatenate %164, %169 in 1 : vector<1x1xf32>, vector<1x1xf32> -> vector<1x2xf32>
    %171 = arith.mulf %144, %154 : vector<8x640xf32>
    %172 = arith.mulf %171, %156 : vector<8x640xf32>
    %cst_72 = arith.constant dense<0.000000e+00> : vector<8xf32>
    %173 = vector.multi_reduction <add>, %172, %cst_72 [1] : vector<8x640xf32> to vector<8xf32>
    %174 = vector.shape_cast %173 : vector<8xf32> to vector<8x1xf32>
    %cst_73 = arith.constant dense<0.000000e+00> : vector<1xf32>
    %175 = vector.multi_reduction <add>, %174, %cst_73 [0] : vector<8x1xf32> to vector<1xf32>
    %176 = vector.shape_cast %175 : vector<1xf32> to vector<1x1xf32>
    %177 = arith.mulf %171, %158 : vector<8x640xf32>
    %cst_74 = arith.constant dense<0.000000e+00> : vector<8xf32>
    %178 = vector.multi_reduction <add>, %177, %cst_74 [1] : vector<8x640xf32> to vector<8xf32>
    %179 = vector.shape_cast %178 : vector<8xf32> to vector<8x1xf32>
    %cst_75 = arith.constant dense<0.000000e+00> : vector<1xf32>
    %180 = vector.multi_reduction <add>, %179, %cst_75 [0] : vector<8x1xf32> to vector<1xf32>
    %181 = vector.shape_cast %180 : vector<1xf32> to vector<1x1xf32>
    %182 = tpu.concatenate %176, %181 in 1 : vector<1x1xf32>, vector<1x1xf32> -> vector<1x2xf32>
    %183 = arith.mulf %147, %154 : vector<8x640xf32>
    %184 = arith.mulf %183, %156 : vector<8x640xf32>
    %cst_76 = arith.constant dense<0.000000e+00> : vector<8xf32>
    %185 = vector.multi_reduction <add>, %184, %cst_76 [1] : vector<8x640xf32> to vector<8xf32>
    %186 = vector.shape_cast %185 : vector<8xf32> to vector<8x1xf32>
    %cst_77 = arith.constant dense<0.000000e+00> : vector<1xf32>
    %187 = vector.multi_reduction <add>, %186, %cst_77 [0] : vector<8x1xf32> to vector<1xf32>
    %188 = vector.shape_cast %187 : vector<1xf32> to vector<1x1xf32>
    %189 = arith.mulf %183, %158 : vector<8x640xf32>
    %cst_78 = arith.constant dense<0.000000e+00> : vector<8xf32>
    %190 = vector.multi_reduction <add>, %189, %cst_78 [1] : vector<8x640xf32> to vector<8xf32>
    %191 = vector.shape_cast %190 : vector<8xf32> to vector<8x1xf32>
    %cst_79 = arith.constant dense<0.000000e+00> : vector<1xf32>
    %192 = vector.multi_reduction <add>, %191, %cst_79 [0] : vector<8x1xf32> to vector<1xf32>
    %193 = vector.shape_cast %192 : vector<1xf32> to vector<1x1xf32>
    %194 = tpu.concatenate %188, %193 in 1 : vector<1x1xf32>, vector<1x1xf32> -> vector<1x2xf32>
    %195 = arith.mulf %150, %154 : vector<8x640xf32>
    %196 = arith.mulf %195, %156 : vector<8x640xf32>
    %cst_80 = arith.constant dense<0.000000e+00> : vector<8xf32>
    %197 = vector.multi_reduction <add>, %196, %cst_80 [1] : vector<8x640xf32> to vector<8xf32>
    %198 = vector.shape_cast %197 : vector<8xf32> to vector<8x1xf32>
    %cst_81 = arith.constant dense<0.000000e+00> : vector<1xf32>
    %199 = vector.multi_reduction <add>, %198, %cst_81 [0] : vector<8x1xf32> to vector<1xf32>
    %200 = vector.shape_cast %199 : vector<1xf32> to vector<1x1xf32>
    %201 = arith.mulf %195, %158 : vector<8x640xf32>
    %cst_82 = arith.constant dense<0.000000e+00> : vector<8xf32>
    %202 = vector.multi_reduction <add>, %201, %cst_82 [1] : vector<8x640xf32> to vector<8xf32>
    %203 = vector.shape_cast %202 : vector<8xf32> to vector<8x1xf32>
    %cst_83 = arith.constant dense<0.000000e+00> : vector<1xf32>
    %204 = vector.multi_reduction <add>, %203, %cst_83 [0] : vector<8x1xf32> to vector<1xf32>
    %205 = vector.shape_cast %204 : vector<1xf32> to vector<1x1xf32>
    %206 = tpu.concatenate %200, %205 in 1 : vector<1x1xf32>, vector<1x1xf32> -> vector<1x2xf32>
    %207 = tpu.concatenate %170, %182, %194, %206 in 0 : vector<1x2xf32>, vector<1x2xf32>, vector<1x2xf32>, vector<1x2xf32> -> vector<4x2xf32>
    %c0_84 = arith.constant 0 : index
    %c0_85 = arith.constant 0 : index
    %208 = vector.load %arg13[%c0_84, %c0_85] : memref<1x2xf32, #tpu.memory_space<vmem>>, vector<1x2xf32>
    %209 = vector.broadcast %208 : vector<1x2xf32> to vector<4x2xf32>
    %210 = arith.addf %207, %209 : vector<4x2xf32>
    %c0_86 = arith.constant 0 : index
    %c0_87 = arith.constant 0 : index
    %211 = vector.load %arg14[%c0_86, %c0_87] : memref<4x2xf32, #tpu.memory_space<vmem>>, vector<4x2xf32>
    tpu.vector_store %arg14[%c0_86, %c0_87], %210 {strides = array<i32>} : memref<4x2xf32, #tpu.memory_space<vmem>>, vector<4x2xf32>,
    return
  }
  func.func @transform_0(%arg0: i32) -> (i32, i32) {
    %c0_i32 = arith.constant 0 : i32
    %c0_i32_0 = arith.constant 0 : i32
    %c0_i32_1 = arith.constant 0 : i32
    return %c0_i32, %c0_i32_0 : i32, i32
  }
  func.func @transform_1(%arg0: i32) -> (i32, i32, i32) {
    %c0_i32 = arith.constant 0 : i32
    %c0_i32_0 = arith.constant 0 : i32
    %c0_i32_1 = arith.constant 0 : i32
    %c0_i32_2 = arith.constant 0 : i32
    return %c0_i32, %c0_i32_0, %c0_i32_1 : i32, i32, i32
  }
  func.func @transform_2(%arg0: i32) -> (i32, i32) {
    %c0_i32 = arith.constant 0 : i32
    %c0_i32_0 = arith.constant 0 : i32
    %c0_i32_1 = arith.constant 0 : i32
    return %c0_i32, %c0_i32_0 : i32, i32
  }
  func.func @transform_3(%arg0: i32) -> (i32, i32) {
    %c0_i32 = arith.constant 0 : i32
    %c0_i32_0 = arith.constant 0 : i32
    %c0_i32_1 = arith.constant 0 : i32
    return %c0_i32, %c0_i32_0 : i32, i32
  }
  func.func @transform_4(%arg0: i32) -> (i32, i32) {
    %c0_i32 = arith.constant 0 : i32
    %c0_i32_0 = arith.constant 0 : i32
    %c0_i32_1 = arith.constant 0 : i32
    return %c0_i32, %c0_i32_0 : i32, i32
  }
  func.func @transform_5(%arg0: i32) -> (i32, i32, i32) {
    %c0_i32 = arith.constant 0 : i32
    %c0_i32_0 = arith.constant 0 : i32
    %c0_i32_1 = arith.constant 0 : i32
    %c0_i32_2 = arith.constant 0 : i32
    return %c0_i32, %c0_i32_0, %c0_i32_1 : i32, i32, i32
  }
  func.func @transform_6(%arg0: i32) -> (i32, i32) {
    %c0_i32 = arith.constant 0 : i32
    %c0_i32_0 = arith.constant 0 : i32
    %c0_i32_1 = arith.constant 0 : i32
    return %c0_i32, %c0_i32_0 : i32, i32
  }
  func.func @transform_7(%arg0: i32) -> (i32, i32) {
    %c0_i32 = arith.constant 0 : i32
    %c0_i32_0 = arith.constant 0 : i32
    %c0_i32_1 = arith.constant 0 : i32
    return %c0_i32, %c0_i32_0 : i32, i32
  }
  func.func @transform_8(%arg0: i32) -> (i32, i32) {
    %c0_i32 = arith.constant 0 : i32
    %c0_i32_0 = arith.constant 0 : i32
    %c0_i32_1 = arith.constant 0 : i32
    return %c0_i32, %c0_i32_0 : i32, i32
  }
  func.func @transform_9(%arg0: i32) -> (i32, i32) {
    %c0_i32 = arith.constant 0 : i32
    %c0_i32_0 = arith.constant 0 : i32
    %c0_i32_1 = arith.constant 0 : i32
    return %c0_i32, %c0_i32_0 : i32, i32
  }
  func.func @transform_10(%arg0: i32) -> (i32, i32) {
    %c0_i32 = arith.constant 0 : i32
    %c0_i32_0 = arith.constant 0 : i32
    %c0_i32_1 = arith.constant 0 : i32
    return %c0_i32, %c0_i32_0 : i32, i32
  }
  func.func @transform_11(%arg0: i32) -> (i32, i32, i32) {
    %c0_i32 = arith.constant 0 : i32
    %c0_i32_0 = arith.constant 0 : i32
    %c0_i32_1 = arith.constant 0 : i32
    %c0_i32_2 = arith.constant 0 : i32
    return %c0_i32, %c0_i32_0, %c0_i32_1 : i32, i32, i32
  }
  func.func @transform_12(%arg0: i32) -> (i32, i32) {
    %c0_i32 = arith.constant 0 : i32
    %c0_i32_0 = arith.constant 0 : i32
    %c0_i32_1 = arith.constant 0 : i32
    return %c0_i32, %c0_i32_0 : i32, i32
  }
  func.func @transform_13(%arg0: i32) -> (i32, i32) {
    %c0_i32 = arith.constant 0 : i32
    %c0_i32_0 = arith.constant 0 : i32
    %c0_i32_1 = arith.constant 0 : i32
    return %c0_i32, %c0_i32_0 : i32, i32
  }
}

</mosaic_0001>

<bundles_post_ra>
// kernel: my_net_forward.1
= control target key start
LH: loop header
LB: loop body
LE: loop exit
PB: predicated region body
PF: predicated region fallthrough
CT: control target
= control target key end

     0   :  { %s12924_s14 = smov 125   ;;  %s12925_s15 = smov 127   ;;  %vm154_vm0 = vcmask 1039360   ;;  %vm374_vm1 = vcmask 1022976   ;;  %vm517_vm2 = vcmask 1042432   ;;  %vm264_vm3 = vcmask 1031168   ;;  %s17466_s0 = inlined_call_operand.vmem [shape: f32[3,2816], index: 0, kind: input, shape index: {}]   ;;  %s17467_s1 = inlined_call_operand.vmem [shape: f32[5,6,15], index: 1, kind: input, shape index: {}]   ;;  %s17468_s2 = inlined_call_operand.vmem [shape: f32[6,1], index: 2, kind: input, shape index: {}]   ;;  %s17469_s9 = inlined_call_operand.vmem [shape: f32[1,640], index: 9, kind: input, shape index: {}]   ;;  %s17470_s4 = inlined_call_operand.vmem [shape: f32[6,1], index: 4, kind: input, shape index: {}]   ;;  %s17471_s3 = inlined_call_operand.vmem [shape: f32[6,1], index: 3, kind: input, shape index: {}]   ;;  %s17472_s6 = inlined_call_operand.vmem [shape: f32[8,1], index: 6, kind: input, shape index: {}]   ;;  %s17473_s5 = inlined_call_operand.vmem [shape: f32[5,8,30], index: 5, kind: input, shape index: {}]   ;;  %s17474_s10 = inlined_call_operand.vmem [shape: f32[1,640], index: 10, kind: input, shape index: {}]   ;;  %s17475_s8 = inlined_call_operand.vmem [shape: f32[8,1], index: 8, kind: input, shape index: {}]   ;;  %s17476_s7 = inlined_call_operand.vmem [shape: f32[8,1], index: 7, kind: input, shape index: {}]   ;;  %s17477_s11 = inlined_call_operand.vmem [shape: f32[2,8,640], index: 11, kind: input, shape index: {}]   ;;  %s17478_s12 = inlined_call_operand.vmem [shape: f32[1,2], index: 12, kind: input, shape index: {}]   ;;  %s17479_s13 = inlined_call_operand.vmem [shape: f32[4,2], index: 13, kind: output, shape index: {}]  }
   0x1   :  { %v13010_v0 = vld [vmem:[%s17466_s0] sm:$0x77]  ;;  %v13015_v1 = vld [vmem:[%s17466_s0 + $0x8] sm:$0x77]  ;;  %v13030_v6 = vld [vmem:[%s17466_s0 + $0x10] sm:$0x77] }
   0x2   :  { %v13019_v2 = vcombine.high %v13010_v0, %v13010_v0  ;;  %v310_v3 = vrot.slane %v13015_v1, 7  ;;  %v90_v4 = vrot.slane %v13015_v1, 5  ;;  %v13025_v5 = vcombine.high %v13015_v1, %v13015_v1  ;;  %s12926_s16 = smov 126   ;;  %v13063_v33 = vld [vmem:[%s17466_s0 + $0x18] sm:$0x77]  ;;  %s12927_s21 = smov 124  }
   0x3   :  { %v88_v7 = vrot.slane %v13010_v0, 5  ;;  %v200_v8 = vrot.slane %v13015_v1, 2  ;;  %v13036_v9 = vcombine.high %v13030_v6, %v13030_v6  ;;  %v198_v16 = vrot.slane %v13010_v0, 2  ;;  %v13079_v39 = vld [vmem:[%s17466_s0 + $0x20] sm:$0x77]  ;;  %s12932_s17 = smov 80  }
   0x4   :  { %v309_v10 = vrot.slane %v13019_v2, 7  ;;  %v89_v11 = vrot.slane %v13019_v2, 5  ;;  %v91_v12 = vrot.slane %v13025_v5, 5  ;;  %v199_v13 = vrot.slane %v13019_v2, 2  ;;  %v13108_v59 = vld [vmem:[%s17466_s0 + $0x28] sm:$0x77] }
   0x5   :  { %v201_v17 = vrot.slane %v13025_v5, 2  ;;  %v92_v20 = vrot.slane %v13030_v6, 5  ;;  %v93_v21 = vrot.slane %v13036_v9, 5  ;;  %v308_v23 = vrot.slane %v13010_v0, 7  ;;  %s12933_s18 = smov 56   ;;  %s12934_s19 = smov 32  }
   0x6   :  { %v12346_v14 = vpack.i.bf16 %v310_v3, %v309_v10  ;;  %v12336_v15 = vpack.i.bf16 %v90_v4, %v89_v11  ;;  %v12351_v18 = vpack.i.bf16 %v91_v12, %v88_v7  ;;  %v12341_v19 = vpack.i.bf16 %v200_v8, %v199_v13  ;;  %v13123_v4 = vld [vmem:[%s17466_s0 + $0x30] sm:$0x77] }
   0x7   :  { %v12361_v22 = vpack.i.bf16 %v201_v17, %v198_v16  ;;  %v12356_v24 = vpack.i.bf16 %v93_v21, %v92_v20  ;;  %v311_v25 = vrot.slane %v13025_v5, 7  ;;  %v202_v26 = vrot.slane %v13030_v6, 2 }
   0x8   :  { %12347 = vrot.lane.b32.xlu1 %v12346_v14, %s12924_s14  ;;  %12337 = vrot.lane.b32.xlu0 %v12336_v15, %s12925_s15  ;;  %v203_v27 = vrot.slane %v13036_v9, 2  ;;  %v419_v28 = vcombine.low %v13015_v1, %v13015_v1  ;;  %v312_v31 = vrot.slane %v13030_v6, 7  ;;  %v313_v32 = vrot.slane %v13036_v9, 7 }
   0x9   :  { %v12371_v29 = vpack.i.bf16 %v311_v25, %v308_v23  ;;  %v420_v34 = vcombine.low %v13030_v6, %v13030_v6  ;;  %v418_v35 = vcombine.low %v13010_v0, %v13010_v0  ;;  %v13074_v38 = vcombine.high %v13063_v33, %v13063_v33 }
   0xa   :  { %v12366_v30 = vpack.i.bf16 %v203_v27, %v202_v26  ;;  %v12381_v36 = vpack.i.bf16 %v419_v28, %v13010_v0  ;;  %v12376_v37 = vpack.i.bf16 %v313_v32, %v312_v31  ;;  %v204_v42 = vrot.slane %v13063_v33, 2  ;;  %v13154_v28 = vld [vmem:[%s17466_s0 + $0x38] sm:$0x77] }
   0xb   :  { %v12391_v40 = vpack.i.bf16 %v13030_v6, %v420_v34  ;;  %v12386_v41 = vpack.i.bf16 %v13015_v1, %v418_v35  ;;  %v205_v43 = vrot.slane %v13074_v38, 2  ;;  %v94_v44 = vrot.slane %v13063_v33, 5  ;;  %v13169_v35 = vld [vmem:[%s17466_s0 + $0x40] sm:$0x77] }
   0xc   :  { %12352 = vrot.lane.b32.xlu1 %v12351_v18, %s12925_s15  ;;  %12342 = vrot.lane.b32.xlu0 %v12341_v19, %s12926_s16  ;;  %v95_v45 = vrot.slane %v13074_v38, 5  ;;  %v13091_v46 = vcombine.high %v13079_v39, %v13079_v39  ;;  %v96_v47 = vrot.slane %v13079_v39, 5  ;;  %v314_v48 = vrot.slane %v13063_v33, 7 }
   0xd   :  { %v12401_v49 = vpack.i.bf16 %v205_v43, %v204_v42  ;;  %v315_v52 = vrot.slane %v13074_v38, 7  ;;  %v316_v53 = vrot.slane %v13079_v39, 7  ;;  %v206_v54 = vrot.slane %v13079_v39, 2 }
   0xe   :  { %v12396_v50 = vpack.i.bf16 %v95_v45, %v94_v44  ;;  %v97_v51 = vrot.slane %v13091_v46, 5  ;;  %v317_v57 = vrot.slane %v13091_v46, 7  ;;  %v207_v58 = vrot.slane %v13091_v46, 2 }
   0xf   :  { %v12406_v56 = vpack.i.bf16 %v315_v52, %v314_v48  ;;  %v422_v60 = vcombine.low %v13079_v39, %v13079_v39  ;;  %v421_v61 = vcombine.low %v13063_v33, %v13063_v33  ;;  %v13118_v3 = vcombine.high %v13108_v59, %v13108_v59 }
  0x10   :  { %12362 = vrot.lane.b32.xlu1 %v12361_v22, %s12926_s16  ;;  %12357 = vrot.lane.b32.xlu0 %v12356_v24, %s12925_s15  ;;  %v12411_v55 = vpack.i.bf16 %v97_v51, %v96_v47  ;;  %v12421_v62 = vpack.i.bf16 %v317_v57, %v316_v53  ;;  %v12416_v63 = vpack.i.bf16 %v207_v58, %v206_v54  ;;  %v208_v10 = vrot.slane %v13108_v59, 2  ;;  %v13198_v58 = vld [vmem:[%s17466_s0 + $0x48] sm:$0x77] }
  0x11   :  { %v12431_v7 = vpack.i.bf16 %v13079_v39, %v422_v60  ;;  %v12426_v8 = vpack.i.bf16 %v13063_v33, %v421_v61  ;;  %v17480_v11 = vmov 0.0   ;;  %v209_v12 = vrot.slane %v13118_v3, 2 }
  0x12   :  { %746 = vmatprep.mubr.f32.mxu0 %v17480_v11  ;;  %817 = vmatprep.mubr.f32.mxu1 %v17480_v11  ;;  %v98_v13 = vrot.slane %v13108_v59, 5  ;;  %v99_v14 = vrot.slane %v13118_v3, 5  ;;  %v13137_v15 = vcombine.high %v13123_v4, %v13123_v4  ;;  %v100_v16 = vrot.slane %v13123_v4, 5 }
  0x13   :  { %v318_v17 = vrot.slane %v13108_v59, 7  ;;  %v12441_v18 = vpack.i.bf16 %v209_v12, %v208_v10  ;;  %v319_v21 = vrot.slane %v13118_v3, 7  ;;  %v320_v22 = vrot.slane %v13123_v4, 7 }
  0x14   :  { %12372 = vrot.lane.b32.xlu1 %v12371_v29, %s12924_s14  ;;  %12367 = vrot.lane.b32.xlu0 %v12366_v30, %s12926_s16  ;;  %v12436_v19 = vpack.i.bf16 %v99_v14, %v98_v13  ;;  %v101_v20 = vrot.slane %v13137_v15, 5  ;;  %v210_v23 = vrot.slane %v13123_v4, 2  ;;  %v321_v26 = vrot.slane %v13137_v15, 7 }
  0x15   :  { %v12446_v25 = vpack.i.bf16 %v319_v21, %v318_v17  ;;  %v211_v27 = vrot.slane %v13137_v15, 2  ;;  %v424_v29 = vcombine.low %v13123_v4, %v13123_v4  ;;  %v423_v30 = vcombine.low %v13108_v59, %v13108_v59 }
  0x16   :  { %v12451_v24 = vpack.i.bf16 %v101_v20, %v100_v16  ;;  %v12461_v31 = vpack.i.bf16 %v321_v26, %v320_v22  ;;  %v13164_v34 = vcombine.high %v13154_v28, %v13154_v28  ;;  %v102_v42 = vrot.slane %v13154_v28, 5 }
  0x17   :  { %v12456_v32 = vpack.i.bf16 %v211_v27, %v210_v23  ;;  %v13181_v44 = vcombine.high %v13169_v35, %v13169_v35  ;;  %v104_v45 = vrot.slane %v13169_v35, 5  ;;  %v322_v47 = vrot.slane %v13154_v28, 7 }
  0x18   :  { %12382 = vrot.lane.b32.xlu1 %v12381_v36, %s12927_s21  ;;  %12377 = vrot.lane.b32.xlu0 %v12376_v37, %s12924_s14  ;;  %v12471_v36 = vpack.i.bf16 %v13123_v4, %v424_v29  ;;  %v12466_v37 = vpack.i.bf16 %v13108_v59, %v423_v30  ;;  %v103_v43 = vrot.slane %v13164_v34, 5  ;;  %v323_v51 = vrot.slane %v13164_v34, 7 }
  0x19   :  { %v324_v52 = vrot.slane %v13169_v35, 7  ;;  %v214_v53 = vrot.slane %v13169_v35, 2  ;;  %v215_v57 = vrot.slane %v13181_v44, 2  ;;  %v426_v60 = vcombine.low %v13169_v35, %v13169_v35 }
  0x1a   :  { %v425_v61 = vcombine.low %v13154_v28, %v13154_v28  ;;  %v216_v13 = vrot.slane %v13198_v58, 2  ;;  %v106_v16 = vrot.slane %v13198_v58, 5  ;;  %v326_v20 = vrot.slane %v13198_v58, 7 }
  0x1b   :  { %v12511_v10 = vpack.i.bf16 %v13169_v35, %v426_v60  ;;  %vm540_vm4 = vcmask 1045504   ;;  %vm563_vm5 = vcmask 1040384   ;;  %vm473_vm6 = vcmask 1014784  }
  0x1c   :  { %12392 = vrot.lane.b32.xlu1 %v12391_v40, %s12927_s21  ;;  %12387 = vrot.lane.b32.xlu0 %v12386_v41, %s12927_s21  ;;  %v212_v40 = vrot.slane %v13154_v28, 2  ;;  %v213_v41 = vrot.slane %v13164_v34, 2  ;;  %v12506_v12 = vpack.i.bf16 %v13154_v28, %v425_v61  ;;  %vm586_vm7 = vcmask 1043456  }
  0x1d   :  { %vm615_vm8 = vcmask 1046528   ;;  %vm12929_vm9 = vmmov 1   ;;  %vm611_vm11 = vcmask 121856   ;;  %vm2340_vm12 = vcmask 850944  }
  0x1e   :  { %v12481_v48 = vpack.i.bf16 %v213_v41, %v212_v40  ;;  %vm13289_vm10 = vmpackc.low %vm615_vm8, %vm12929_vm9  ;;  %vm3256_vm13 = vcmask 654336   ;;  %vm4172_vm14 = vcmask 457728   ;;  %vm5088_vm15 = vcmask 261120  }
  0x1f   :  { %vm6108_vm8 = vcmask 1041408  }
  0x20   :  { %12402 = vrot.lane.b32.xlu1 %v12401_v49, %s12926_s16  ;;  %12397 = vrot.lane.b32.xlu0 %v12396_v50, %s12925_s15  ;;  %v12476_v49 = vpack.i.bf16 %v103_v43, %v102_v42  ;;  %v105_v50 = vrot.slane %v13181_v44, 5 }
  0x22   :  { %v12491_v54 = vpack.i.bf16 %v105_v50, %v104_v45 }
  0x24   :  { %12412 = vrot.lane.b32.xlu1 %v12411_v55, %s12925_s15  ;;  %12407 = vrot.lane.b32.xlu0 %v12406_v56, %s12924_s14  ;;  %v12486_v55 = vpack.i.bf16 %v323_v51, %v322_v47  ;;  %v325_v56 = vrot.slane %v13181_v44, 7 }
  0x28   :  { %12422 = vrot.lane.b32.xlu1 %v12421_v62, %s12924_s14  ;;  %12417 = vrot.lane.b32.xlu0 %v12416_v63, %s12926_s16  ;;  %v12501_v62 = vpack.i.bf16 %v325_v56, %v324_v52  ;;  %v12496_v63 = vpack.i.bf16 %v215_v57, %v214_v53 }
  0x2c   :  { %12432 = vrot.lane.b32.xlu1 %v12431_v7, %s12927_s21  ;;  %12427 = vrot.lane.b32.xlu0 %v12426_v8, %s12927_s21  ;;  %v13208_v7 = vcombine.high %v13198_v58, %v13198_v58  ;;  %v13213_v8 = vld [vmem:[%s17466_s0 + $0x50] sm:$0x77] }
  0x2d   :  { %v218_v27 = vrot.slane %v13213_v8, 2  ;;  %v328_v30 = vrot.slane %v13213_v8, 7 }
  0x2e   :  { %v217_v14 = vrot.slane %v13208_v7, 2  ;;  %v107_v17 = vrot.slane %v13208_v7, 5 }
  0x30   :  { %12442 = vrot.lane.b32.xlu1 %v12441_v18, %s12926_s16  ;;  %12437 = vrot.lane.b32.xlu0 %v12436_v19, %s12925_s15  ;;  %v13225_v18 = vcombine.high %v13213_v8, %v13213_v8  ;;  %v108_v19 = vrot.slane %v13213_v8, 5  ;;  %v12521_v21 = vpack.i.bf16 %v217_v14, %v216_v13  ;;  %v12516_v22 = vpack.i.bf16 %v107_v17, %v106_v16 }
  0x32   :  { %v109_v23 = vrot.slane %v13225_v18, 5  ;;  %v219_v29 = vrot.slane %v13225_v18, 2  ;;  %v329_v40 = vrot.slane %v13225_v18, 7 }
  0x34   :  { %12452 = vrot.lane.b32.xlu1 %v12451_v24, %s12925_s15  ;;  %12447 = vrot.lane.b32.xlu0 %v12446_v25, %s12924_s14  ;;  %v327_v24 = vrot.slane %v13208_v7, 7  ;;  %v12531_v25 = vpack.i.bf16 %v109_v23, %v108_v19 }
  0x36   :  { %v12526_v26 = vpack.i.bf16 %v327_v24, %v326_v20 }
  0x38   :  { %12462 = vrot.lane.b32.xlu1 %v12461_v31, %s12924_s14  ;;  %12457 = vrot.lane.b32.xlu0 %v12456_v32, %s12926_s16  ;;  %v12536_v31 = vpack.i.bf16 %v219_v29, %v218_v27  ;;  %v427_v32 = vcombine.low %v13198_v58, %v13198_v58 }
  0x3c   :  { %12472 = vrot.lane.b32.xlu1 %v12471_v36, %s12927_s21  ;;  %12467 = vrot.lane.b32.xlu0 %v12466_v37, %s12927_s21  ;;  %v428_v36 = vcombine.low %v13213_v8, %v13213_v8  ;;  %v12541_v37 = vpack.i.bf16 %v13198_v58, %v427_v32 }
  0x40   :  { %12482 = vrot.lane.b32.xlu1 %v12481_v48, %s12926_s16  ;;  %12477 = vrot.lane.b32.xlu0 %v12476_v49, %s12925_s15 }
  0x44   :  { %12492 = vrot.lane.b32.xlu1 %v12491_v54, %s12925_s15  ;;  %12487 = vrot.lane.b32.xlu0 %v12486_v55, %s12924_s14 }
  0x48   :  { %12502 = vrot.lane.b32.xlu1 %v12501_v62, %s12924_s14  ;;  %12497 = vrot.lane.b32.xlu0 %v12496_v63, %s12926_s16 }
  0x4c   :  { %12512 = vrot.lane.b32.xlu1 %v12511_v10, %s12927_s21  ;;  %12507 = vrot.lane.b32.xlu0 %v12506_v12, %s12927_s21 }
  0x50   :  { %12522 = vrot.lane.b32.xlu1 %v12521_v21, %s12926_s16  ;;  %12517 = vrot.lane.b32.xlu0 %v12516_v22, %s12925_s15 }
  0x54   :  { %12532 = vrot.lane.b32.xlu1 %v12531_v25, %s12925_s15  ;;  %12527 = vrot.lane.b32.xlu0 %v12526_v26, %s12924_s14 }
  0x58   :  { %370 = vrot.lane.b32.xlu1 %v328_v30, %s12924_s14  ;;  %12537 = vrot.lane.b32.xlu0 %v12536_v31, %s12926_s16 }
  0x5c   :  { %469 = vrot.lane.b32.xlu1 %v428_v36, %s12927_s21  ;;  %12542 = vrot.lane.b32.xlu0 %v12541_v37, %s12927_s21 }
  0x60   :  { %471 = vrot.lane.b32.xlu1 %v13213_v8, %s12927_s21  ;;  %372 = vrot.lane.b32.xlu0 %v329_v40, %s12924_s14 }
  0x7a   :  { %v12348_v41 = vpop.permute.xlu1 %12347  ;;  %v12338_v42 = vpop.permute.xlu0 %12337 }
  0x7b   :  { %v12340_v49 = vunpack.i.h.bf16 %v12338_v42  ;;  %v12339_v50 = vunpack.i.l.bf16 %v12338_v42  ;;  %v12350_v51 = vunpack.i.h.bf16 %v12348_v41  ;;  %v12349_v52 = vunpack.i.l.bf16 %v12348_v41 }
  0x7d   :  { %v156_v61 = vsel %vm154_vm0, %v12339_v50, %v12340_v49  ;;  %v376_v62 = vsel %vm374_vm1, %v12349_v52, %v12350_v51 }
  0x7e   :  { %v12353_v43 = vpop.permute.xlu1 %12352  ;;  %v12343_v45 = vpop.permute.xlu0 %12342  ;;  %v519_v17 = vsel %vm517_vm2, %v13019_v2, %v156_v61 }
  0x7f   :  { %v12355_v53 = vunpack.i.h.bf16 %v12353_v43  ;;  %v12354_v54 = vunpack.i.l.bf16 %v12353_v43  ;;  %v12345_v55 = vunpack.i.h.bf16 %v12343_v45  ;;  %v12344_v56 = vunpack.i.l.bf16 %v12343_v45 }
  0x81   :  { %v155_v63 = vsel %vm154_vm0, %v12354_v54, %v12339_v50  ;;  %v157_v10 = vsel %vm154_vm0, %v12340_v49, %v12355_v53  ;;  %v266_v12 = vsel %vm264_vm3, %v12344_v56, %v12345_v55 }
  0x82   :  { %v12363_v47 = vpop.permute.xlu1 %12362  ;;  %v13253_v48 = vpop.permute.xlu0 %12357  ;;  %v518_v27 = vsel %vm517_vm2, %v13010_v0, %v155_v63  ;;  %v520_v29 = vsel %vm517_vm2, %v13015_v1, %v157_v10  ;;  %v542_v30 = vsel %vm540_vm4, %v519_v17, %v266_v12  ;;  %v565_v2 = vsel %vm563_vm5, %v266_v12, %v376_v62 }
  0x83   :  { %v12365_v13 = vunpack.i.h.bf16 %v12363_v47  ;;  %v12359_v14 = vunpack.i.l.bf16 %v13253_v48  ;;  %v12364_v19 = vunpack.i.l.bf16 %v12363_v47 }
  0x85   :  { %v267_v31 = vsel %vm264_vm3, %v12345_v55, %v12365_v13  ;;  %v158_v32 = vsel %vm154_vm0, %v12355_v53, %v12359_v14  ;;  %v265_v40 = vsel %vm264_vm3, %v12364_v19, %v12344_v56 }
  0x86   :  { %v12373_v57 = vpop.permute.xlu1 %12372  ;;  %v13255_v60 = vpop.permute.xlu0 %12367  ;;  %v521_v53 = vsel %vm517_vm2, %v13025_v5, %v158_v32  ;;  %v541_v17 = vsel %vm540_vm4, %v518_v27, %v265_v40 }
  0x87   :  { %v12374_v16 = vunpack.i.l.bf16 %v12373_v57  ;;  %v12375_v20 = vunpack.i.h.bf16 %v12373_v57  ;;  %v12369_v23 = vunpack.i.l.bf16 %v13255_v60 }
  0x89   :  { %v375_v36 = vsel %vm374_vm1, %v12374_v16, %v12349_v52  ;;  %v377_v0 = vsel %vm374_vm1, %v12350_v51, %v12375_v20  ;;  %v268_v47 = vsel %vm264_vm3, %v12365_v13, %v12369_v23  ;;  %v543_v52 = vsel %vm540_vm4, %v520_v29, %v267_v31 }
  0x8a   :  { %v12383_v21 = vpop.permute.xlu1 %12382  ;;  %v13265_v22 = vpop.permute.xlu0 %12377  ;;  %v564_v54 = vsel %vm563_vm5, %v265_v40, %v375_v36  ;;  %v566_v56 = vsel %vm563_vm5, %v267_v31, %v377_v0  ;;  %v544_v63 = vsel %vm540_vm4, %v521_v53, %v268_v47  ;;  %v12370_v31 = vunpack.i.h.bf16 %v13255_v60 }
  0x8b   :  { %v12385_v24 = vunpack.i.h.bf16 %v12383_v21  ;;  %v12384_v25 = vunpack.i.l.bf16 %v12383_v21  ;;  %v12379_v26 = vunpack.i.l.bf16 %v13265_v22  ;;  %v12380_v29 = vunpack.i.h.bf16 %v13265_v22  ;;  %v13337_v22 = vld [vmem:[%s17467_s1] sm:$0x3f] }
  0x8d   :  { %v475_v37 = vsel %vm473_vm6, %v12384_v25, %v12385_v24  ;;  %v378_v41 = vsel %vm374_vm1, %v12375_v20, %v12379_v26 }
  0x8e   :  { %v588_v1 = vsel %vm586_vm7, %v565_v2, %v475_v37  ;;  %v13285_v42 = vpop.permute.xlu1 %12392  ;;  %v12388_v43 = vpop.permute.xlu0 %12387  ;;  %v567_v57 = vsel %vm563_vm5, %v268_v47, %v378_v41  ;;  %v12360_v2 = vunpack.i.h.bf16 %v13253_v48  ;;  %v379_v37 = vsel %vm374_vm1, %v12379_v26, %v12380_v29 }
  0x8f   :  { %v13296_v49 = vpack.c.bf16 %v588_v1, %v542_v30  ;;  %v12394_v50 = vunpack.i.l.bf16 %v13285_v42  ;;  %v12390_v51 = vunpack.i.h.bf16 %v12388_v43  ;;  %v12389_v55 = vunpack.i.l.bf16 %v12388_v43 }
  0x90   :  { %v12395_v36 = vunpack.i.h.bf16 %v13285_v42  ;;  %v159_v26 = vsel %vm154_vm0, %v12359_v14, %v12360_v2  ;;  %v269_v42 = vsel %vm264_vm3, %v12369_v23, %v12370_v31 }
  0x91   :  { %v476_v61 = vsel %vm473_vm6, %v12385_v24, %v12390_v51  ;;  %v477_v62 = vsel %vm473_vm6, %v12390_v51, %v12394_v50  ;;  %11467 = vmatprep.subr.msk.bf16.mxu0 %vm13289_vm10, %v13296_v49  ;;  %v474_v10 = vsel %vm473_vm6, %v12389_v55, %v12384_v25  ;;  %v568_v55 = vsel %vm563_vm5, %v269_v42, %v379_v37 }
  0x92   :  { %v589_v5 = vsel %vm586_vm7, %v566_v56, %v476_v61  ;;  %v590_v12 = vsel %vm586_vm7, %v567_v57, %v477_v62  ;;  %v12403_v13 = vpop.permute.xlu1 %12402  ;;  %v12398_v16 = vpop.permute.xlu0 %12397  ;;  %v587_v19 = vsel %vm586_vm7, %v564_v54, %v474_v10  ;;  %v478_v56 = vsel %vm473_vm6, %v12394_v50, %v12395_v36  ;;  %v609_v61 = vld [vmem:[%s17468_s2] sm:$0x3f] }
  0x93   :  { %v13316_v20 = vpack.c.bf16 %v590_v12, %v544_v63  ;;  %v13318_v21 = vpack.c.bf16 %v589_v5, %v543_v52  ;;  %v13320_v24 = vpack.c.bf16 %v587_v19, %v541_v17  ;;  %v12399_v25 = vunpack.i.l.bf16 %v12398_v16 }
  0x94   :  { %v12400_v32 = vunpack.i.h.bf16 %v12398_v16  ;;  %v12405_v40 = vunpack.i.h.bf16 %v12403_v13  ;;  %v12404_v0 = vunpack.i.l.bf16 %v12403_v13  ;;  %v12930_v57 = vmov 0  }
  0x95   :  { %11473 = vmatprep.subr.msk.bf16.mxu1 %vm13289_vm10, %v13316_v20  ;;  %11470 = vmatpush1.bf16.msk.msra.mxu0 %vm13289_vm10, %v13320_v24  ;;  %v160_v1 = vsel %vm154_vm0, %v12360_v2, %v12399_v25  ;;  %v522_v12 = vsel %vm517_vm2, %v13030_v6, %v159_v26  ;;  %v591_v13 = vsel %vm586_vm7, %v568_v55, %v478_v56 }
  0x96   :  { %v13329_v27 = vpop.permute.xlu1 %12412  ;;  %v12408_v30 = vpop.permute.xlu0 %12407  ;;  %11476 = vmatpush1.bf16.msk.msra.mxu1 %vm13289_vm10, %v13318_v21  ;;  %v161_v53 = vsel %vm154_vm0, %v12399_v25, %v12400_v32  ;;  %v270_v14 = vsel %vm264_vm3, %v12370_v31, %v12404_v0  ;;  %v271_v60 = vsel %vm264_vm3, %v12404_v0, %v12405_v40  ;;  %v523_v23 = vsel %vm517_vm2, %v13036_v9, %v160_v1 }
  0x97   :  { %v12414_v41 = vunpack.i.l.bf16 %v13329_v27  ;;  %v12410_v43 = vunpack.i.h.bf16 %v12408_v30  ;;  %v12409_v47 = vunpack.i.l.bf16 %v12408_v30  ;;  %12546 = vset.pattern.permute.xlu0 %v12930_v57  ;;  %12547 = vset.pattern.permute.xlu1 %v12930_v57  ;;  %v524_v62 = vsel %vm517_vm2, %v13063_v33, %v161_v53 }
  0x98   :  { %11066 = vmatmul.mubr.msk.f32.vlgmr.msra.gmra.mrb[0].mxu0 %vm611_vm11, %v13337_v22  ;;  %1464 = vperm.xlu0 %12546, %v609_v61   ;;  %v546_v25 = vsel %vm540_vm4, %v523_v23, %v270_v14  ;;  %v547_v31 = vsel %vm540_vm4, %v524_v62, %v271_v60  ;;  %v545_v55 = vsel %vm540_vm4, %v522_v12, %v269_v42  ;;  %v12415_v61 = vunpack.i.h.bf16 %v13329_v27 }
  0x99   :  { %11069 = vmatmul.mubr.msk.f32.vlgmr.msra.gmra.mrb[0].mxu1 %vm611_vm11, %v13337_v22  ;;  %888 = vmatprep.mubr.f32.mxu0 %v17480_v11  ;;  %v162_v50 = vsel %vm154_vm0, %v12400_v32, %v12414_v41  ;;  %v380_v63 = vsel %vm374_vm1, %v12380_v29, %v12409_v47  ;;  %v381_v10 = vsel %vm374_vm1, %v12409_v47, %v12410_v43 }
  0x9a   :  { %v13347_v51 = vpop.permute.xlu1 %12422  ;;  %v13349_v52 = vpop.permute.xlu0 %12417  ;;  %959 = vmatprep.mubr.f32.mxu1 %v17480_v11  ;;  %v525_v30 = vsel %vm517_vm2, %v13074_v38, %v162_v50  ;;  %v569_v6 = vsel %vm563_vm5, %v270_v14, %v380_v63  ;;  %v570_v2 = vsel %vm563_vm5, %v271_v60, %v381_v10 }
  0x9b   :  { %v12424_v54 = vunpack.i.l.bf16 %v13347_v51  ;;  %v12419_v48 = vunpack.i.l.bf16 %v13349_v52  ;;  %v12425_v50 = vunpack.i.h.bf16 %v13347_v51  ;;  %v12420_v63 = vunpack.i.h.bf16 %v13349_v52 }
  0x9d   :  { %v382_v33 = vsel %vm374_vm1, %v12410_v43, %v12424_v54  ;;  %v272_v16 = vsel %vm264_vm3, %v12405_v40, %v12419_v48 }
  0x9e   :  { %v13380_v5 = vpop.permute.xlu1 %12432  ;;  %v12428_v9 = vpop.permute.xlu0 %12427  ;;  %v571_v32 = vsel %vm563_vm5, %v272_v16, %v382_v33  ;;  %v548_v47 = vsel %vm540_vm4, %v525_v30, %v272_v16 }
  0x9f   :  { %v12434_v17 = vunpack.i.l.bf16 %v13380_v5  ;;  %v12430_v19 = vunpack.i.h.bf16 %v12428_v9  ;;  %v12429_v29 = vunpack.i.l.bf16 %v12428_v9  ;;  %v12435_v10 = vunpack.i.h.bf16 %v13380_v5 }
  0xa1   :  { %v481_v37 = vsel %vm473_vm6, %v12430_v19, %v12434_v17  ;;  %v479_v40 = vsel %vm473_vm6, %v12395_v36, %v12429_v29  ;;  %v480_v0 = vsel %vm473_vm6, %v12429_v29, %v12430_v19  ;;  %v13413_v36 = vpack.c.bf16 %v591_v13, %v545_v55 }
  0xa2   :  { %v12443_v1 = vpop.permute.xlu1 %12442  ;;  %v12438_v43 = vpop.permute.xlu0 %12437  ;;  %v592_v38 = vsel %vm586_vm7, %v569_v6, %v479_v40  ;;  %v593_v26 = vsel %vm586_vm7, %v570_v2, %v480_v0  ;;  %v594_v53 = vsel %vm586_vm7, %v571_v32, %v481_v37  ;;  %v163_v29 = vsel %vm154_vm0, %v12414_v41, %v12415_v61 }
  0xa3   :  { %v13407_v56 = vpack.c.bf16 %v592_v38, %v546_v25  ;;  %v13409_v14 = vpack.c.bf16 %v594_v53, %v548_v47  ;;  %v13411_v60 = vpack.c.bf16 %v593_v26, %v547_v31  ;;  %v12439_v23 = vunpack.i.l.bf16 %v12438_v43 }
  0xa4   :  { %v12440_v62 = vunpack.i.h.bf16 %v12438_v43  ;;  %v12444_v9 = vunpack.i.l.bf16 %v12443_v1  ;;  %v12445_v12 = vunpack.i.h.bf16 %v12443_v1  ;;  %v383_v6 = vsel %vm374_vm1, %v12424_v54, %v12425_v50 }
  0xa5   :  { %11479 = vmatprep.subr.msk.bf16.mxu0 %vm13289_vm10, %v13407_v56  ;;  %11485 = vmatprep.subr.msk.bf16.mxu1 %vm13289_vm10, %v13409_v14  ;;  %v164_v13 = vsel %vm154_vm0, %v12415_v61, %v12439_v23  ;;  %v273_v2 = vsel %vm264_vm3, %v12419_v48, %v12420_v63  ;;  %v482_v27 = vsel %vm473_vm6, %v12434_v17, %v12435_v10 }
  0xa6   :  { %v13421_v57 = vpop.permute.xlu1 %12452  ;;  %v12448_v42 = vpop.permute.xlu0 %12447  ;;  %11482 = vmatpush1.bf16.msk.msra.mxu0 %vm13289_vm10, %v13413_v36  ;;  %11488 = vmatpush1.bf16.msk.msra.mxu1 %vm13289_vm10, %v13411_v60  ;;  %v165_v25 = vsel %vm154_vm0, %v12439_v23, %v12440_v62  ;;  %v274_v41 = vsel %vm264_vm3, %v12420_v63, %v12444_v9  ;;  %v527_v32 = vsel %vm517_vm2, %v13091_v46, %v164_v13 }
  0xa7   :  { %v12454_v33 = vunpack.i.l.bf16 %v13421_v57  ;;  %v12450_v5 = vunpack.i.h.bf16 %v12448_v42  ;;  %v12449_v30 = vunpack.i.l.bf16 %v12448_v42  ;;  %v526_v52 = vsel %vm517_vm2, %v13079_v39, %v163_v29 }
  0xa8   :  { %v275_v54 = vsel %vm264_vm3, %v12444_v9, %v12445_v12  ;;  %v528_v48 = vsel %vm517_vm2, %v13108_v59, %v165_v25  ;;  %v572_v0 = vsel %vm563_vm5, %v273_v2, %v383_v6  ;;  %v550_v38 = vsel %vm540_vm4, %v527_v32, %v274_v41 }
  0xa9   :  { %11072 = vmatmul.mubr.msk.f32.vlgmr.msra.gmra.mrb[2].mxu0 %vm611_vm11, %v13337_v22  ;;  %11075 = vmatmul.mubr.msk.f32.vlgmr.msra.gmra.mrb[2].mxu1 %vm611_vm11, %v13337_v22  ;;  %v166_v37 = vsel %vm154_vm0, %v12440_v62, %v12454_v33  ;;  %v384_v46 = vsel %vm374_vm1, %v12425_v50, %v12449_v30  ;;  %v385_v1 = vsel %vm374_vm1, %v12449_v30, %v12450_v5 }
  0xaa   :  { %v13435_v16 = vpop.permute.xlu1 %12462  ;;  %v13437_v19 = vpop.permute.xlu0 %12457  ;;  %1030 = vmatprep.mubr.f32.mxu0 %v17480_v11  ;;  %1101 = vmatprep.mubr.f32.mxu1 %v17480_v11  ;;  %v595_v43 = vsel %vm586_vm7, %v572_v0, %v482_v27  ;;  %v529_v26 = vsel %vm517_vm2, %v13118_v3, %v166_v37  ;;  %v551_v23 = vsel %vm540_vm4, %v528_v48, %v275_v54 }
  0xab   :  { %v12464_v31 = vunpack.i.l.bf16 %v13435_v16  ;;  %v12459_v51 = vunpack.i.l.bf16 %v13437_v19  ;;  %v573_v42 = vsel %vm563_vm5, %v274_v41, %v384_v46  ;;  %v574_v61 = vsel %vm563_vm5, %v275_v54, %v385_v1 }
  0xac   :  { %v12465_v62 = vunpack.i.h.bf16 %v13435_v16  ;;  %v12460_v50 = vunpack.i.h.bf16 %v13437_v19  ;;  %v549_v19 = vsel %vm540_vm4, %v526_v52, %v273_v2 }
  0xad   :  { %v386_v47 = vsel %vm374_vm1, %v12450_v5, %v12464_v31  ;;  %v276_v59 = vsel %vm264_vm3, %v12445_v12, %v12459_v51  ;;  %v13501_v32 = vpack.c.bf16 %v595_v43, %v549_v19 }
  0xae   :  { %v13469_v17 = vpop.permute.xlu1 %12472  ;;  %v12468_v40 = vpop.permute.xlu0 %12467  ;;  %v575_v12 = vsel %vm563_vm5, %v276_v59, %v386_v47  ;;  %v552_v25 = vsel %vm540_vm4, %v529_v26, %v276_v59  ;;  %v277_v2 = vsel %vm264_vm3, %v12459_v51, %v12460_v50 }
  0xaf   :  { %v12474_v39 = vunpack.i.l.bf16 %v13469_v17  ;;  %v12470_v53 = vunpack.i.h.bf16 %v12468_v40  ;;  %v12469_v55 = vunpack.i.l.bf16 %v12468_v40  ;;  %v12475_v54 = vunpack.i.h.bf16 %v13469_v17 }
  0xb0   :  { %v387_v40 = vsel %vm374_vm1, %v12464_v31, %v12465_v62 }
  0xb1   :  { %v485_v13 = vsel %vm473_vm6, %v12470_v53, %v12474_v39  ;;  %v483_v3 = vsel %vm473_vm6, %v12435_v10, %v12469_v55  ;;  %v484_v29 = vsel %vm473_vm6, %v12469_v55, %v12470_v53  ;;  %v12455_v10 = vunpack.i.h.bf16 %v13421_v57 }
  0xb2   :  { %v12483_v63 = vpop.permute.xlu1 %12482  ;;  %v12478_v9 = vpop.permute.xlu0 %12477  ;;  %v596_v5 = vsel %vm586_vm7, %v573_v42, %v483_v3  ;;  %v597_v30 = vsel %vm586_vm7, %v574_v61, %v484_v29  ;;  %v598_v16 = vsel %vm586_vm7, %v575_v12, %v485_v13  ;;  %v486_v51 = vsel %vm473_vm6, %v12474_v39, %v12475_v54 }
  0xb3   :  { %v13495_v6 = vpack.c.bf16 %v596_v5, %v550_v38  ;;  %v13497_v27 = vpack.c.bf16 %v598_v16, %v552_v25  ;;  %v13499_v41 = vpack.c.bf16 %v597_v30, %v551_v23  ;;  %v12480_v0 = vunpack.i.h.bf16 %v12478_v9 }
  0xb4   :  { %v12479_v46 = vunpack.i.l.bf16 %v12478_v9  ;;  %v12485_v31 = vunpack.i.h.bf16 %v12483_v63  ;;  %v12484_v43 = vunpack.i.l.bf16 %v12483_v63  ;;  %v167_v47 = vsel %vm154_vm0, %v12454_v33, %v12455_v10 }
  0xb5   :  { %11491 = vmatprep.subr.msk.bf16.mxu0 %vm13289_vm10, %v13495_v6  ;;  %11497 = vmatprep.subr.msk.bf16.mxu1 %vm13289_vm10, %v13497_v27  ;;  %v576_v26 = vsel %vm563_vm5, %v277_v2, %v387_v40  ;;  %v530_v61 = vsel %vm517_vm2, %v13123_v4, %v167_v47 }
  0xb6   :  { %v13505_v48 = vpop.permute.xlu1 %12492  ;;  %v12488_v37 = vpop.permute.xlu0 %12487  ;;  %11494 = vmatpush1.bf16.msk.msra.mxu0 %vm13289_vm10, %v13501_v32  ;;  %11500 = vmatpush1.bf16.msk.msra.mxu1 %vm13289_vm10, %v13499_v41  ;;  %v168_v53 = vsel %vm154_vm0, %v12455_v10, %v12479_v46  ;;  %v169_v55 = vsel %vm154_vm0, %v12479_v46, %v12480_v0  ;;  %v599_v63 = vsel %vm586_vm7, %v576_v26, %v486_v51 }
  0xb7   :  { %v12494_v52 = vunpack.i.l.bf16 %v13505_v48  ;;  %v12490_v17 = vunpack.i.h.bf16 %v12488_v37  ;;  %v12489_v1 = vunpack.i.l.bf16 %v12488_v37  ;;  %v278_v9 = vsel %vm264_vm3, %v12460_v50, %v12484_v43 }
  0xb8   :  { %v279_v12 = vsel %vm264_vm3, %v12484_v43, %v12485_v31  ;;  %v532_v13 = vsel %vm517_vm2, %v13154_v28, %v169_v55  ;;  %v12495_v3 = vunpack.i.h.bf16 %v13505_v48 }
  0xb9   :  { %11078 = vmatmul.mubr.msk.f32.vlgmr.msra.gmra.mrb[4].mxu0 %vm611_vm11, %v13337_v22  ;;  %11081 = vmatmul.mubr.msk.f32.vlgmr.msra.gmra.mrb[4].mxu1 %vm611_vm11, %v13337_v22  ;;  %v170_v57 = vsel %vm154_vm0, %v12480_v0, %v12494_v52  ;;  %v388_v33 = vsel %vm374_vm1, %v12465_v62, %v12489_v1  ;;  %v389_v39 = vsel %vm374_vm1, %v12489_v1, %v12490_v17 }
  0xba   :  { %v13526_v59 = vpop.permute.xlu1 %12502  ;;  %v13528_v38 = vpop.permute.xlu0 %12497  ;;  %1172 = vmatprep.mubr.f32.mxu0 %v17480_v11  ;;  %1243 = vmatprep.mubr.f32.mxu1 %v17480_v11  ;;  %v531_v62 = vsel %vm517_vm2, %v13137_v15, %v168_v53  ;;  %v533_v4 = vsel %vm517_vm2, %v13164_v34, %v170_v57  ;;  %v577_v50 = vsel %vm563_vm5, %v278_v9, %v388_v33 }
  0xbb   :  { %v12504_v23 = vunpack.i.l.bf16 %v13526_v59  ;;  %v12499_v42 = vunpack.i.l.bf16 %v13528_v38  ;;  %v578_v30 = vsel %vm563_vm5, %v279_v12, %v389_v39  ;;  %v12505_v15 = vunpack.i.h.bf16 %v13526_v59 }
  0xbc   :  { %v12500_v37 = vunpack.i.h.bf16 %v13528_v38  ;;  %v554_v0 = vsel %vm540_vm4, %v531_v62, %v278_v9  ;;  %v555_v34 = vsel %vm540_vm4, %v532_v13, %v279_v12  ;;  %v553_v53 = vsel %vm540_vm4, %v530_v61, %v277_v2 }
  0xbd   :  { %v280_v29 = vsel %vm264_vm3, %v12485_v31, %v12499_v42  ;;  %v390_v16 = vsel %vm374_vm1, %v12490_v17, %v12504_v23  ;;  %v171_v12 = vsel %vm154_vm0, %v12494_v52, %v12495_v3  ;;  %v391_v62 = vsel %vm374_vm1, %v12504_v23, %v12505_v15 }
  0xbe   :  { %v13557_v25 = vpop.permute.xlu1 %12512  ;;  %v12508_v5 = vpop.permute.xlu0 %12507  ;;  %v556_v40 = vsel %vm540_vm4, %v533_v4, %v280_v29  ;;  %v579_v46 = vsel %vm563_vm5, %v280_v29, %v390_v16  ;;  %v281_v13 = vsel %vm264_vm3, %v12499_v42, %v12500_v37 }
  0xbf   :  { %v12514_v28 = vunpack.i.l.bf16 %v13557_v25  ;;  %v12510_v19 = vunpack.i.h.bf16 %v12508_v5  ;;  %v12509_v10 = vunpack.i.l.bf16 %v12508_v5  ;;  %v12515_v51 = vunpack.i.h.bf16 %v13557_v25 }
  0xc0   :  { %v534_v5 = vsel %vm517_vm2, %v13169_v35, %v171_v12  ;;  %v580_v4 = vsel %vm563_vm5, %v281_v13, %v391_v62 }
  0xc1   :  { %v489_v1 = vsel %vm473_vm6, %v12510_v19, %v12514_v28  ;;  %v487_v17 = vsel %vm473_vm6, %v12475_v54, %v12509_v10  ;;  %v488_v31 = vsel %vm473_vm6, %v12509_v10, %v12510_v19  ;;  %v13585_v54 = vpack.c.bf16 %v599_v63, %v553_v53 }
  0xc2   :  { %v12523_v43 = vpop.permute.xlu1 %12522  ;;  %v12518_v47 = vpop.permute.xlu0 %12517  ;;  %v600_v59 = vsel %vm586_vm7, %v577_v50, %v487_v17  ;;  %v601_v38 = vsel %vm586_vm7, %v578_v30, %v488_v31  ;;  %v602_v26 = vsel %vm586_vm7, %v579_v46, %v489_v1  ;;  %v490_v48 = vsel %vm473_vm6, %v12514_v28, %v12515_v51 }
  0xc3   :  { %v13579_v55 = vpack.c.bf16 %v600_v59, %v554_v0  ;;  %v13581_v57 = vpack.c.bf16 %v602_v26, %v556_v40  ;;  %v13583_v33 = vpack.c.bf16 %v601_v38, %v555_v34  ;;  %v12520_v39 = vunpack.i.h.bf16 %v12518_v47 }
  0xc4   :  { %v12519_v9 = vunpack.i.l.bf16 %v12518_v47  ;;  %v12525_v63 = vunpack.i.h.bf16 %v12523_v43  ;;  %v12524_v52 = vunpack.i.l.bf16 %v12523_v43  ;;  %v603_v16 = vsel %vm586_vm7, %v580_v4, %v490_v48 }
  0xc5   :  { %11503 = vmatprep.subr.msk.bf16.mxu0 %vm13289_vm10, %v13579_v55  ;;  %11509 = vmatprep.subr.msk.bf16.mxu1 %vm13289_vm10, %v13581_v57  ;;  %v557_v34 = vsel %vm540_vm4, %v534_v5, %v281_v13 }
  0xc6   :  { %v12533_v2 = vpop.permute.xlu1 %12532  ;;  %v12528_v61 = vpop.permute.xlu0 %12527  ;;  %11506 = vmatpush1.bf16.msk.msra.mxu0 %vm13289_vm10, %v13585_v54  ;;  %v172_v23 = vsel %vm154_vm0, %v12495_v3, %v12519_v9  ;;  %v173_v42 = vsel %vm154_vm0, %v12519_v9, %v12520_v39  ;;  %11512 = vmatpush1.bf16.msk.msra.mxu1 %vm13289_vm10, %v13583_v33  ;;  %v282_v3 = vsel %vm264_vm3, %v12500_v37, %v12524_v52 }
  0xc7   :  { %v12534_v29 = vunpack.i.l.bf16 %v12533_v2  ;;  %v12530_v50 = vunpack.i.h.bf16 %v12528_v61  ;;  %v12529_v30 = vunpack.i.l.bf16 %v12528_v61  ;;  %v12535_v28 = vunpack.i.h.bf16 %v12533_v2 }
  0xc8   :  { %v283_v40 = vsel %vm264_vm3, %v12524_v52, %v12525_v63  ;;  %v535_v0 = vsel %vm517_vm2, %v13181_v44, %v172_v23  ;;  %v536_v35 = vsel %vm517_vm2, %v13198_v58, %v173_v42  ;;  %v13627_v37 = vpack.c.bf16 %v603_v16, %v557_v34  ;;  %v11097_v34 = vld [vmem:[%s17467_s1 + $0x8] sm:$0x3f] }
  0xc9   :  { %11084 = vmatmul.mubr.msk.f32.vlgmr.msra.gmra.mrb[6].mxu0 %vm611_vm11, %v13337_v22  ;;  %11087 = vmatmul.mubr.msk.f32.vlgmr.msra.gmra.mrb[6].mxu1 %vm611_vm11, %v13337_v22  ;;  %v174_v46 = vsel %vm154_vm0, %v12520_v39, %v12534_v29  ;;  %v392_v1 = vsel %vm374_vm1, %v12505_v15, %v12529_v30  ;;  %v393_v44 = vsel %vm374_vm1, %v12529_v30, %v12530_v50 }
  0xca   :  { %v371_v19 = vpop.permute.xlu1 %370  ;;  %v12538_v10 = vpop.permute.xlu0 %12537  ;;  %1314 = vmatprep.mubr.f32.mxu0 %v17480_v11  ;;  %1385 = vmatprep.mubr.f32.mxu1 %v17480_v11  ;;  %v539_v58 = vsel %vm517_vm2, %v13225_v18, %v12535_v28  ;;  %v175_v31 = vsel %vm154_vm0, %v12534_v29, %v12535_v28  ;;  %v558_v59 = vsel %vm540_vm4, %v535_v0, %v282_v3 }
  0xcb   :  { %v12539_v17 = vunpack.i.l.bf16 %v12538_v10  ;;  %v559_v38 = vsel %vm540_vm4, %v536_v35, %v283_v40  ;;  %v537_v26 = vsel %vm517_vm2, %v13208_v7, %v174_v46  ;;  %v581_v9 = vsel %vm563_vm5, %v282_v3, %v392_v1  ;;  %v11165_v46 = vld [vmem:[%s17467_s1 + $0x18] sm:$0x3f] }
  0xcc   :  { %v582_v12 = vsel %vm563_vm5, %v283_v40, %v393_v44  ;;  %v394_v18 = vsel %vm374_vm1, %v12530_v50, %v371_v19  ;;  %v12540_v62 = vunpack.i.h.bf16 %v12538_v10 }
  0xcd   :  { %v284_v53 = vsel %vm264_vm3, %v12525_v63, %v12539_v17 }
  0xce   :  { %v470_v43 = vpop.permute.xlu1 %469  ;;  %v12543_v47 = vpop.permute.xlu0 %12542  ;;  %v583_v13 = vsel %vm563_vm5, %v284_v53, %v394_v18  ;;  %v560_v48 = vsel %vm540_vm4, %v537_v26, %v284_v53  ;;  %v285_v30 = vsel %vm264_vm3, %v12539_v17, %v12540_v62  ;;  %v562_v10 = vsel %vm540_vm4, %v539_v58, %v12540_v62 }
  0xcf   :  { %v12545_v15 = vunpack.i.h.bf16 %v12543_v47  ;;  %v12544_v39 = vunpack.i.l.bf16 %v12543_v47 }
  0xd1   :  { %v493_v2 = vsel %vm473_vm6, %v12545_v15, %v470_v43  ;;  %v491_v61 = vsel %vm473_vm6, %v12515_v51, %v12544_v39  ;;  %v492_v7 = vsel %vm473_vm6, %v12544_v39, %v12545_v15  ;;  %v538_v51 = vsel %vm517_vm2, %v13213_v8, %v175_v31 }
  0xd2   :  { %v604_v63 = vsel %vm586_vm7, %v581_v9, %v491_v61  ;;  %v605_v52 = vsel %vm586_vm7, %v582_v12, %v492_v7  ;;  %v606_v23 = vsel %vm586_vm7, %v583_v13, %v493_v2  ;;  %v472_v42 = vpop.permute.xlu1 %471  ;;  %v373_v29 = vpop.permute.xlu0 %372 }
  0xd3   :  { %v13652_v5 = vpack.c.bf16 %v604_v63, %v558_v59  ;;  %v13654_v4 = vpack.c.bf16 %v606_v23, %v560_v48  ;;  %v13656_v50 = vpack.c.bf16 %v605_v52, %v559_v38  ;;  %v494_v25 = vsel %vm473_vm6, %v470_v43, %v472_v42 }
  0xd4   :  { %v395_v16 = vsel %vm374_vm1, %v371_v19, %v373_v29  ;;  %v585_v28 = vsel %vm563_vm5, %v12540_v62, %v373_v29  ;;  %v561_v19 = vsel %vm540_vm4, %v538_v51, %v285_v30 }
  0xd5   :  { %v584_v3 = vsel %vm563_vm5, %v285_v30, %v395_v16  ;;  %v608_v40 = vsel %vm586_vm7, %v585_v28, %v472_v42  ;;  %11515 = vmatprep.subr.msk.bf16.mxu0 %vm13289_vm10, %v13652_v5  ;;  %11521 = vmatprep.subr.msk.bf16.mxu1 %vm13289_vm10, %v13654_v4 }
  0xd6   :  { %v607_v8 = vsel %vm586_vm7, %v584_v3, %v494_v25  ;;  %v13674_v0 = vpack.c.bf16 %v608_v40, %v562_v10  ;;  %11518 = vmatpush1.bf16.msk.msra.mxu0 %vm13289_vm10, %v13627_v37  ;;  %11524 = vmatpush1.bf16.msk.msra.mxu1 %vm13289_vm10, %v13656_v50 }
  0xd7   :  { %11533 = vmatprep.subr.msk.bf16.mxu1 %vm13289_vm10, %v13296_v49  ;;  %v13686_v35 = vpack.c.bf16 %v607_v8, %v561_v19 }
  0xd8   :  { %11527 = vmatprep.subr.msk.bf16.mxu0 %vm13289_vm10, %v13674_v0 }
  0xd9   :  { %11090 = vmatmul.mubr.msk.f32.vlgmr.msra.gmra.mrb[8].mxu0 %vm611_vm11, %v13337_v22  ;;  %11093 = vmatmul.mubr.msk.f32.vlgmr.msra.gmra.mrb[8].mxu1 %vm611_vm11, %v13337_v22 }
  0xda   :  { %11530 = vmatpush1.bf16.msk.msra.mxu0 %vm13289_vm10, %v13686_v35  ;;  %11536 = vmatpush1.bf16.msk.msra.mxu1 %vm13289_vm10, %v13320_v24 }
  0xdb   :  { %11539 = vmatprep.subr.msk.bf16.mxu0 %vm13289_vm10, %v13316_v20  ;;  %11545 = vmatprep.subr.msk.bf16.mxu1 %vm13289_vm10, %v13407_v56 }
  0xdc   :  { %1456 = vmatprep.mubr.f32.mxu0 %v17480_v11  ;;  %1557 = vmatprep.mubr.f32.mxu1 %v17480_v11 }
  0xdd   :  { %11096 = vmatmul.mubr.msk.f32.vlgmr.msra.gmra.mrb[10].mxu0 %vm611_vm11, %v13337_v22  ;;  %11100 = vmatmul.mubr.msk.f32.vlgmr.msra.gmra.mrb[10].mxu1 %vm611_vm11, %v11097_v34  ;;  %v11131_v22 = vld [vmem:[%s17467_s1 + $0x10] sm:$0x3f] }
  0xde   :  { %11542 = vmatpush1.bf16.msk.msra.mxu0 %vm13289_vm10, %v13318_v21  ;;  %11548 = vmatpush1.bf16.msk.msra.mxu1 %vm13289_vm10, %v13413_v36 }
  0xdf   :  { %11551 = vmatprep.subr.msk.bf16.mxu0 %vm13289_vm10, %v13409_v14  ;;  %11557 = vmatprep.subr.msk.bf16.mxu1 %vm13289_vm10, %v13495_v6 }
  0xe0   :  { %1628 = vmatprep.mubr.f32.mxu0 %v17480_v11  ;;  %1699 = vmatprep.mubr.f32.mxu1 %v17480_v11 }
  0xe1   :  { %11103 = vmatmul.mubr.msk.f32.vlgmr.msra.gmra.mrb[12].mxu0 %vm611_vm11, %v11097_v34  ;;  %11106 = vmatmul.mubr.msk.f32.vlgmr.msra.gmra.mrb[12].mxu1 %vm611_vm11, %v11097_v34 }
  0xe2   :  { %11554 = vmatpush1.bf16.msk.msra.mxu0 %vm13289_vm10, %v13411_v60  ;;  %11560 = vmatpush1.bf16.msk.msra.mxu1 %vm13289_vm10, %v13501_v32 }
  0xe3   :  { %11563 = vmatprep.subr.msk.bf16.mxu0 %vm13289_vm10, %v13497_v27  ;;  %11569 = vmatprep.subr.msk.bf16.mxu1 %vm13289_vm10, %v13579_v55 }
  0xe4   :  { %1770 = vmatprep.mubr.f32.mxu0 %v17480_v11  ;;  %1841 = vmatprep.mubr.f32.mxu1 %v17480_v11 }
  0xe5   :  { %11109 = vmatmul.mubr.msk.f32.vlgmr.msra.gmra.mrb[14].mxu0 %vm611_vm11, %v11097_v34  ;;  %11112 = vmatmul.mubr.msk.f32.vlgmr.msra.gmra.mrb[14].mxu1 %vm611_vm11, %v11097_v34 }
  0xe6   :  { %11566 = vmatpush1.bf16.msk.msra.mxu0 %vm13289_vm10, %v13499_v41  ;;  %11572 = vmatpush1.bf16.msk.msra.mxu1 %vm13289_vm10, %v13585_v54 }
  0xe7   :  { %11575 = vmatprep.subr.msk.bf16.mxu0 %vm13289_vm10, %v13581_v57  ;;  %11581 = vmatprep.subr.msk.bf16.mxu1 %vm13289_vm10, %v13652_v5 }
  0xe8   :  { %1912 = vmatprep.mubr.f32.mxu0 %v17480_v11  ;;  %1983 = vmatprep.mubr.f32.mxu1 %v17480_v11 }
  0xe9   :  { %11115 = vmatmul.mubr.msk.f32.vlgmr.msra.gmra.mrb[16].mxu0 %vm611_vm11, %v11097_v34  ;;  %11118 = vmatmul.mubr.msk.f32.vlgmr.msra.gmra.mrb[16].mxu1 %vm611_vm11, %v11097_v34 }
  0xea   :  { %11578 = vmatpush1.bf16.msk.msra.mxu0 %vm13289_vm10, %v13583_v33  ;;  %11584 = vmatpush1.bf16.msk.msra.mxu1 %vm13289_vm10, %v13627_v37 }
  0xeb   :  { %11587 = vmatprep.subr.msk.bf16.mxu0 %vm13289_vm10, %v13654_v4  ;;  %11593 = vmatprep.subr.msk.bf16.mxu1 %vm13289_vm10, %v13674_v0 }
  0xec   :  { %2054 = vmatprep.mubr.f32.mxu0 %v17480_v11  ;;  %2125 = vmatprep.mubr.f32.mxu1 %v17480_v11 }
  0xed   :  { %11121 = vmatmul.mubr.msk.f32.vlgmr.msra.gmra.mrb[18].mxu0 %vm611_vm11, %v11097_v34  ;;  %11124 = vmatmul.mubr.msk.f32.vlgmr.msra.gmra.mrb[18].mxu1 %vm611_vm11, %v11097_v34 }
  0xee   :  { %11590 = vmatpush1.bf16.msk.msra.mxu0 %vm13289_vm10, %v13656_v50  ;;  %11596 = vmatpush1.bf16.msk.msra.mxu1 %vm13289_vm10, %v13686_v35 }
  0xef   :  { %11599 = vmatprep.subr.msk.bf16.mxu0 %vm13289_vm10, %v13296_v49  ;;  %11605 = vmatprep.subr.msk.bf16.mxu1 %vm13289_vm10, %v13316_v20 }
  0xf0   :  { %2196 = vmatprep.mubr.f32.mxu0 %v17480_v11  ;;  %2267 = vmatprep.mubr.f32.mxu1 %v17480_v11 }
  0xf1   :  { %11127 = vmatmul.mubr.msk.f32.vlgmr.msra.gmra.mrb[20].mxu0 %vm611_vm11, %v11097_v34  ;;  %11130 = vmatmul.mubr.msk.f32.vlgmr.msra.gmra.mrb[20].mxu1 %vm611_vm11, %v11097_v34 }
  0xf2   :  { %11602 = vmatpush1.bf16.msk.msra.mxu0 %vm13289_vm10, %v13320_v24  ;;  %11608 = vmatpush1.bf16.msk.msra.mxu1 %vm13289_vm10, %v13318_v21 }
  0xf3   :  { %11611 = vmatprep.subr.msk.bf16.mxu0 %vm13289_vm10, %v13407_v56  ;;  %11617 = vmatprep.subr.msk.bf16.mxu1 %vm13289_vm10, %v13409_v14 }
  0xf4   :  { %2473 = vmatprep.mubr.f32.mxu0 %v17480_v11  ;;  %2544 = vmatprep.mubr.f32.mxu1 %v17480_v11 }
  0xf5   :  { %11134 = vmatmul.mubr.msk.f32.vlgmr.msra.gmra.mrb[22].mxu0 %vm611_vm11, %v11131_v22  ;;  %11137 = vmatmul.mubr.msk.f32.vlgmr.msra.gmra.mrb[22].mxu1 %vm611_vm11, %v11131_v22 }
  0xf6   :  { %11614 = vmatpush1.bf16.msk.msra.mxu0 %vm13289_vm10, %v13413_v36  ;;  %11620 = vmatpush1.bf16.msk.msra.mxu1 %vm13289_vm10, %v13411_v60 }
  0xf7   :  { %11623 = vmatprep.subr.msk.bf16.mxu0 %vm13289_vm10, %v13495_v6  ;;  %11629 = vmatprep.subr.msk.bf16.mxu1 %vm13289_vm10, %v13497_v27 }
  0xf8   :  { %2615 = vmatprep.mubr.f32.mxu0 %v17480_v11  ;;  %2686 = vmatprep.mubr.f32.mxu1 %v17480_v11 }
  0xf9   :  { %11140 = vmatmul.mubr.msk.f32.vlgmr.msra.gmra.mrb[24].mxu0 %vm611_vm11, %v11131_v22  ;;  %11143 = vmatmul.mubr.msk.f32.vlgmr.msra.gmra.mrb[24].mxu1 %vm611_vm11, %v11131_v22 }
  0xfa   :  { %11626 = vmatpush1.bf16.msk.msra.mxu0 %vm13289_vm10, %v13501_v32  ;;  %11632 = vmatpush1.bf16.msk.msra.mxu1 %vm13289_vm10, %v13499_v41 }
  0xfb   :  { %11635 = vmatprep.subr.msk.bf16.mxu0 %vm13289_vm10, %v13579_v55  ;;  %11641 = vmatprep.subr.msk.bf16.mxu1 %vm13289_vm10, %v13581_v57 }
  0xfc   :  { %2757 = vmatprep.mubr.f32.mxu0 %v17480_v11  ;;  %2828 = vmatprep.mubr.f32.mxu1 %v17480_v11 }
  0xfd   :  { %11146 = vmatmul.mubr.msk.f32.vlgmr.msra.gmra.mrb[26].mxu0 %vm611_vm11, %v11131_v22  ;;  %11149 = vmatmul.mubr.msk.f32.vlgmr.msra.gmra.mrb[26].mxu1 %vm611_vm11, %v11131_v22 }
  0xfe   :  { %11638 = vmatpush1.bf16.msk.msra.mxu0 %vm13289_vm10, %v13585_v54  ;;  %11644 = vmatpush1.bf16.msk.msra.mxu1 %vm13289_vm10, %v13583_v33 }
  0xff   :  { %11647 = vmatprep.subr.msk.bf16.mxu0 %vm13289_vm10, %v13652_v5  ;;  %11653 = vmatprep.subr.msk.bf16.mxu1 %vm13289_vm10, %v13654_v4 }
 0x100   :  { %2899 = vmatprep.mubr.f32.mxu0 %v17480_v11  ;;  %2970 = vmatprep.mubr.f32.mxu1 %v17480_v11 }
 0x101   :  { %11152 = vmatmul.mubr.msk.f32.vlgmr.msra.gmra.mrb[28].mxu0 %vm611_vm11, %v11131_v22  ;;  %11155 = vmatmul.mubr.msk.f32.vlgmr.msra.gmra.mrb[28].mxu1 %vm611_vm11, %v11131_v22 }
 0x102   :  { %11650 = vmatpush1.bf16.msk.msra.mxu0 %vm13289_vm10, %v13627_v37  ;;  %11656 = vmatpush1.bf16.msk.msra.mxu1 %vm13289_vm10, %v13656_v50 }
 0x103   :  { %11659 = vmatprep.subr.msk.bf16.mxu0 %vm13289_vm10, %v13674_v0  ;;  %11665 = vmatprep.subr.msk.bf16.mxu1 %vm13289_vm10, %v13296_v49 }
 0x104   :  { %3041 = vmatprep.mubr.f32.mxu0 %v17480_v11  ;;  %3112 = vmatprep.mubr.f32.mxu1 %v17480_v11 }
 0x105   :  { %11158 = vmatmul.mubr.msk.f32.vlgmr.msra.gmra.mrb[30].mxu0 %vm611_vm11, %v11131_v22  ;;  %11161 = vmatmul.mubr.msk.f32.vlgmr.msra.gmra.mrb[30].mxu1 %vm611_vm11, %v11131_v22 }
 0x106   :  { %11662 = vmatpush1.bf16.msk.msra.mxu0 %vm13289_vm10, %v13686_v35  ;;  %11668 = vmatpush1.bf16.msk.msra.mxu1 %vm13289_vm10, %v13320_v24 }
 0x107   :  { %11671 = vmatprep.subr.msk.bf16.mxu0 %vm13289_vm10, %v13316_v20  ;;  %11677 = vmatprep.subr.msk.bf16.mxu1 %vm13289_vm10, %v13407_v56 }
 0x108   :  { %3183 = vmatprep.mubr.f32.mxu0 %v17480_v11  ;;  %3389 = vmatprep.mubr.f32.mxu1 %v17480_v11 }
 0x109   :  { %11164 = vmatmul.mubr.msk.f32.vlgmr.msra.gmra.mrb[32].mxu0 %vm611_vm11, %v11131_v22  ;;  %11168 = vmatmul.mubr.msk.f32.vlgmr.msra.gmra.mrb[32].mxu1 %vm611_vm11, %v11165_v46 }
 0x10a   :  { %11674 = vmatpush1.bf16.msk.msra.mxu0 %vm13289_vm10, %v13318_v21  ;;  %11680 = vmatpush1.bf16.msk.msra.mxu1 %vm13289_vm10, %v13413_v36 }
 0x10b   :  { %11683 = vmatprep.subr.msk.bf16.mxu0 %vm13289_vm10, %v13409_v14  ;;  %11689 = vmatprep.subr.msk.bf16.mxu1 %vm13289_vm10, %v13495_v6 }
 0x10c   :  { %3460 = vmatprep.mubr.f32.mxu0 %v17480_v11  ;;  %3531 = vmatprep.mubr.f32.mxu1 %v17480_v11 }
 0x10d   :  { %11171 = vmatmul.mubr.msk.f32.vlgmr.msra.gmra.mrb[34].mxu0 %vm611_vm11, %v11165_v46  ;;  %11174 = vmatmul.mubr.msk.f32.vlgmr.msra.gmra.mrb[34].mxu1 %vm611_vm11, %v11165_v46 }
 0x10e   :  { %11686 = vmatpush1.bf16.msk.msra.mxu0 %vm13289_vm10, %v13411_v60  ;;  %11692 = vmatpush1.bf16.msk.msra.mxu1 %vm13289_vm10, %v13501_v32 }
 0x10f   :  { %11695 = vmatprep.subr.msk.bf16.mxu0 %vm13289_vm10, %v13497_v27  ;;  %11701 = vmatprep.subr.msk.bf16.mxu1 %vm13289_vm10, %v13579_v55 }
 0x110   :  { %3602 = vmatprep.mubr.f32.mxu0 %v17480_v11  ;;  %3673 = vmatprep.mubr.f32.mxu1 %v17480_v11 }
 0x111   :  { %11177 = vmatmul.mubr.msk.f32.vlgmr.msra.gmra.mrb[36].mxu0 %vm611_vm11, %v11165_v46  ;;  %11180 = vmatmul.mubr.msk.f32.vlgmr.msra.gmra.mrb[36].mxu1 %vm611_vm11, %v11165_v46 }
 0x112   :  { %11698 = vmatpush1.bf16.msk.msra.mxu0 %vm13289_vm10, %v13499_v41  ;;  %11704 = vmatpush1.bf16.msk.msra.mxu1 %vm13289_vm10, %v13585_v54 }
 0x113   :  { %11707 = vmatprep.subr.msk.bf16.mxu0 %vm13289_vm10, %v13581_v57  ;;  %11713 = vmatprep.subr.msk.bf16.mxu1 %vm13289_vm10, %v13652_v5 }
 0x114   :  { %3744 = vmatprep.mubr.f32.mxu0 %v17480_v11  ;;  %3815 = vmatprep.mubr.f32.mxu1 %v17480_v11 }
 0x115   :  { %11183 = vmatmul.mubr.msk.f32.vlgmr.msra.gmra.mrb[38].mxu0 %vm611_vm11, %v11165_v46  ;;  %11186 = vmatmul.mubr.msk.f32.vlgmr.msra.gmra.mrb[38].mxu1 %vm611_vm11, %v11165_v46 }
 0x116   :  { %11710 = vmatpush1.bf16.msk.msra.mxu0 %vm13289_vm10, %v13583_v33  ;;  %11716 = vmatpush1.bf16.msk.msra.mxu1 %vm13289_vm10, %v13627_v37 }
 0x117   :  { %11719 = vmatprep.subr.msk.bf16.mxu0 %vm13289_vm10, %v13654_v4  ;;  %11725 = vmatprep.subr.msk.bf16.mxu1 %vm13289_vm10, %v13674_v0 }
 0x118   :  { %3886 = vmatprep.mubr.f32.mxu0 %v17480_v11  ;;  %3957 = vmatprep.mubr.f32.mxu1 %v17480_v11 }
 0x119   :  { %11189 = vmatmul.mubr.msk.f32.vlgmr.msra.gmra.mrb[40].mxu0 %vm611_vm11, %v11165_v46  ;;  %11192 = vmatmul.mubr.msk.f32.vlgmr.msra.gmra.mrb[40].mxu1 %vm611_vm11, %v11165_v46 }
 0x11a   :  { %11722 = vmatpush1.bf16.msk.msra.mxu0 %vm13289_vm10, %v13656_v50  ;;  %11728 = vmatpush1.bf16.msk.msra.mxu1 %vm13289_vm10, %v13686_v35 }
 0x11b   :  { %11731 = vmatprep.subr.msk.bf16.mxu0 %vm13289_vm10, %v13296_v49  ;;  %11737 = vmatprep.subr.msk.bf16.mxu1 %vm13289_vm10, %v13316_v20  ;;  %v11199_v49 = vld [vmem:[%s17467_s1 + $0x20] sm:$0x3f]  ;;  %s12931_s1 = smov 104  }
 0x11c   :  { %4028 = vmatprep.mubr.f32.mxu0 %v17480_v11  ;;  %4099 = vmatprep.mubr.f32.mxu1 %v17480_v11 }
 0x11d   :  { %11195 = vmatmul.mubr.msk.f32.vlgmr.msra.gmra.mrb[42].mxu0 %vm611_vm11, %v11165_v46  ;;  %11198 = vmatmul.mubr.msk.f32.vlgmr.msra.gmra.mrb[42].mxu1 %vm611_vm11, %v11165_v46 }
 0x11e   :  { %11734 = vmatpush1.bf16.msk.msra.mxu0 %vm13289_vm10, %v13320_v24  ;;  %11740 = vmatpush1.bf16.msk.msra.mxu1 %vm13289_vm10, %v13318_v21 }
 0x11f   :  { %11743 = vmatprep.subr.msk.bf16.mxu0 %vm13289_vm10, %v13407_v56  ;;  %11749 = vmatprep.subr.msk.bf16.mxu1 %vm13289_vm10, %v13409_v14 }
 0x120   :  { %4305 = vmatprep.mubr.f32.mxu0 %v17480_v11  ;;  %4376 = vmatprep.mubr.f32.mxu1 %v17480_v11 }
 0x121   :  { %11202 = vmatmul.mubr.msk.f32.vlgmr.msra.gmra.mrb[44].mxu0 %vm611_vm11, %v11199_v49  ;;  %11205 = vmatmul.mubr.msk.f32.vlgmr.msra.gmra.mrb[44].mxu1 %vm611_vm11, %v11199_v49 }
 0x122   :  { %11746 = vmatpush1.bf16.msk.msra.mxu0 %vm13289_vm10, %v13413_v36  ;;  %11752 = vmatpush1.bf16.msk.msra.mxu1 %vm13289_vm10, %v13411_v60 }
 0x123   :  { %11755 = vmatprep.subr.msk.bf16.mxu0 %vm13289_vm10, %v13495_v6  ;;  %11761 = vmatprep.subr.msk.bf16.mxu1 %vm13289_vm10, %v13497_v27 }
 0x124   :  { %4447 = vmatprep.mubr.f32.mxu0 %v17480_v11  ;;  %4518 = vmatprep.mubr.f32.mxu1 %v17480_v11 }
 0x125   :  { %11208 = vmatmul.mubr.msk.f32.vlgmr.msra.gmra.mrb[46].mxu0 %vm611_vm11, %v11199_v49  ;;  %11211 = vmatmul.mubr.msk.f32.vlgmr.msra.gmra.mrb[46].mxu1 %vm611_vm11, %v11199_v49 }
 0x126   :  { %11758 = vmatpush1.bf16.msk.msra.mxu0 %vm13289_vm10, %v13501_v32  ;;  %11764 = vmatpush1.bf16.msk.msra.mxu1 %vm13289_vm10, %v13499_v41 }
 0x127   :  { %11767 = vmatprep.subr.msk.bf16.mxu0 %vm13289_vm10, %v13579_v55  ;;  %11773 = vmatprep.subr.msk.bf16.mxu1 %vm13289_vm10, %v13581_v57 }
 0x128   :  { %4589 = vmatprep.mubr.f32.mxu0 %v17480_v11  ;;  %4660 = vmatprep.mubr.f32.mxu1 %v17480_v11 }
 0x129   :  { %11214 = vmatmul.mubr.msk.f32.vlgmr.msra.gmra.mrb[48].mxu0 %vm611_vm11, %v11199_v49  ;;  %11217 = vmatmul.mubr.msk.f32.vlgmr.msra.gmra.mrb[48].mxu1 %vm611_vm11, %v11199_v49 }
 0x12a   :  { %11770 = vmatpush1.bf16.msk.msra.mxu0 %vm13289_vm10, %v13585_v54  ;;  %11776 = vmatpush1.bf16.msk.msra.mxu1 %vm13289_vm10, %v13583_v33 }
 0x12b   :  { %11779 = vmatprep.subr.msk.bf16.mxu0 %vm13289_vm10, %v13652_v5  ;;  %11785 = vmatprep.subr.msk.bf16.mxu1 %vm13289_vm10, %v13654_v4 }
 0x12c   :  { %4731 = vmatprep.mubr.f32.mxu0 %v17480_v11  ;;  %4802 = vmatprep.mubr.f32.mxu1 %v17480_v11 }
 0x12d   :  { %11220 = vmatmul.mubr.msk.f32.vlgmr.msra.gmra.mrb[50].mxu0 %vm611_vm11, %v11199_v49  ;;  %11223 = vmatmul.mubr.msk.f32.vlgmr.msra.gmra.mrb[50].mxu1 %vm611_vm11, %v11199_v49 }
 0x12e   :  { %11782 = vmatpush1.bf16.msk.msra.mxu0 %vm13289_vm10, %v13627_v37  ;;  %11788 = vmatpush1.bf16.msk.msra.mxu1 %vm13289_vm10, %v13656_v50 }
 0x12f   :  { %11791 = vmatprep.subr.msk.bf16.mxu0 %vm13289_vm10, %v13674_v0  ;;  %4873 = vmatprep.mubr.f32.mxu0 %v17480_v11 }
 0x130   :  { %4944 = vmatprep.mubr.f32.mxu1 %v17480_v11 }
 0x131   :  { %11226 = vmatmul.mubr.msk.f32.vlgmr.msra.gmra.mrb[52].mxu0 %vm611_vm11, %v11199_v49  ;;  %11229 = vmatmul.mubr.msk.f32.vlgmr.msra.gmra.mrb[52].mxu1 %vm611_vm11, %v11199_v49 }
 0x132   :  { %11794 = vmatpush1.bf16.msk.msra.mxu0 %vm13289_vm10, %v13686_v35  ;;  %5015 = vmatprep.mubr.f32.mxu0 %v17480_v11  ;;  %vm15571_vm10 = vmpackc.low %vm540_vm4, %vm12929_vm9  ;;  %vm6132_vm9 = vcmask 244736  }
 0x133   :  { %6240 = vmatprep.mubr.f32.mxu1 %v17480_v11 }
 0x135   :  { %11232 = vmatmul.mubr.msk.f32.vlgmr.msra.gmra.mrb[54].mxu0 %vm611_vm11, %v11199_v49 }
 0x136   :  { %6311 = vmatprep.mubr.f32.mxu0 %v17480_v11 }
 0x16b   :  { %v14064_v20 = vpop.f32.mrb[0].mxu0 }
 0x16c   :  { %v14066_v21 = vpop.f32.mrb[1].mxu0  ;;  %v14068_v24 = vpop.f32.mrb[0].mxu1 }
 0x16d   :  { %v14070_v56 = vpop.f32.mrb[1].mxu1 }
 0x17c   :  { %v14072_v14 = vpop.f32.mrb[2].mxu0  ;;  %v14076_v60 = vpop.f32.mrb[2].mxu1 }
 0x17d   :  { %v14074_v45 = vpop.f32.mrb[3].mxu0  ;;  %v14078_v36 = vpop.f32.mrb[3].mxu1 }
 0x18c   :  { %v14080_v6 = vpop.f32.mrb[4].mxu0  ;;  %v14082_v27 = vpop.f32.mrb[4].mxu1 }
 0x18d   :  { %v14084_v41 = vpop.f32.mrb[5].mxu0  ;;  %v14086_v32 = vpop.f32.mrb[5].mxu1 }
 0x19c   :  { %v14088_v55 = vpop.f32.mrb[6].mxu0  ;;  %v14092_v33 = vpop.f32.mrb[6].mxu1 }
 0x19d   :  { %17526 = vst [vmem:[#allocation2_spill] sm:$0xff] %v14088_v55  ;;  %v14090_v57 = vpop.f32.mrb[7].mxu0  ;;  %17528 = vst [vmem:[#allocation4_spill] sm:$0xff] %v14092_v33  ;;  %v14094_v54 = vpop.f32.mrb[7].mxu1 }
 0x19e   :  { %17527 = vst [vmem:[#allocation3_spill] sm:$0xff] %v14090_v57  ;;  %17529 = vst [vmem:[#allocation5_spill] sm:$0xff] %v14094_v54 }
 0x1ac   :  { %v14096_v37 = vpop.f32.mrb[8].mxu0  ;;  %v14098_v1 = vpop.f32.mrb[8].mxu1 }
 0x1ad   :  { %17530 = vst [vmem:[#allocation6_spill] sm:$0xff] %v14096_v37  ;;  %17531 = vst [vmem:[#allocation7_spill] sm:$0xff] %v14098_v1  ;;  %v14100_v44 = vpop.f32.mrb[9].mxu0  ;;  %v14102_v17 = vpop.f32.mrb[9].mxu1  ;;  %v5154_v37 = vlaneseq }
 0x1ae   :  { %17532 = vst [vmem:[#allocation8_spill] sm:$0xff] %v14100_v44  ;;  %17533 = vst [vmem:[#allocation9_spill] sm:$0xff] %v14102_v17 }
 0x1b0   :  { %v14104_v58 = vpop.f32.mrb[10].mxu0  ;;  %v1559_v31 = vpop.f32.mrb[10].mxu1 }
 0x1b1   :  { %17534 = vst [vmem:[#allocation10_spill] sm:$0xff] %v14104_v58  ;;  %2296 = vrot.lane.b32.xlu1 %v1559_v31, %s12931_s1  ;;  %v1460_v43 = vpop.f32.mrb[11].mxu0  ;;  %v1561_v47 = vpop.f32.mrb[11].mxu1 }
 0x1b4   :  { %v1630_v59 = vpop.f32.mrb[12].mxu0  ;;  %v1701_v38 = vpop.f32.mrb[12].mxu1 }
 0x1b5   :  { %2298 = vrot.lane.b32.xlu1 %v1561_v47, %s12931_s1  ;;  %2300 = vrot.lane.b32.xlu0 %v1630_v59, %s12931_s1  ;;  %v1632_v26 = vpop.f32.mrb[13].mxu0  ;;  %v1703_v53 = vpop.f32.mrb[13].mxu1 }
 0x1b8   :  { %v1772_v15 = vpop.f32.mrb[14].mxu0  ;;  %v1843_v39 = vpop.f32.mrb[14].mxu1 }
 0x1b9   :  { %2304 = vrot.lane.b32.xlu1 %v1701_v38, %s12931_s1  ;;  %2306 = vrot.lane.b32.xlu0 %v1703_v53, %s12931_s1  ;;  %v1774_v9 = vpop.f32.mrb[15].mxu0  ;;  %v1845_v12 = vpop.f32.mrb[15].mxu1 }
 0x1bc   :  { %v1914_v18 = vpop.f32.mrb[16].mxu0  ;;  %v1985_v62 = vpop.f32.mrb[16].mxu1 }
 0x1bd   :  { %2302 = vrot.lane.b32.xlu1 %v1632_v26, %s12931_s1  ;;  %2308 = vrot.lane.b32.xlu0 %v1772_v15, %s12931_s1  ;;  %v1916_v13 = vpop.f32.mrb[17].mxu0  ;;  %v1987_v2 = vpop.f32.mrb[17].mxu1 }
 0x1c0   :  { %v2056_v61 = vpop.f32.mrb[18].mxu0  ;;  %v2127_v7 = vpop.f32.mrb[18].mxu1 }
 0x1c1   :  { %2312 = vrot.lane.b32.xlu0 %v1843_v39, %s12931_s1  ;;  %v2058_v48 = vpop.f32.mrb[19].mxu0  ;;  %v2129_v63 = vpop.f32.mrb[19].mxu1 }
 0x1c4   :  { %v14114_v52 = vpop.f32.mrb[20].mxu0  ;;  %v14116_v23 = vpop.f32.mrb[20].mxu1 }
 0x1c5   :  { %2310 = vrot.lane.b32.xlu0 %v1774_v9, %s12931_s1  ;;  %v14119_v42 = vpop.f32.mrb[21].mxu0  ;;  %v14121_v29 = vpop.f32.mrb[21].mxu1 }
 0x1c6   :  { %17535 = vst [vmem:[#allocation11_spill] sm:$0xff] %v14121_v29 }
 0x1c8   :  { %v2475_v5 = vpop.f32.mrb[22].mxu0  ;;  %v2546_v4 = vpop.f32.mrb[22].mxu1 }
 0x1c9   :  { %2314 = vrot.lane.b32.xlu0 %v1845_v12, %s12931_s1  ;;  %v2477_v50 = vpop.f32.mrb[23].mxu0  ;;  %v14124_v25 = vpop.f32.mrb[23].mxu1 }
 0x1ca   :  { %3214 = vrot.lane.b32.xlu1 %v2477_v50, %s12932_s17 }
 0x1cc   :  { %v2617_v51 = vpop.f32.mrb[24].mxu0  ;;  %v2688_v30 = vpop.f32.mrb[24].mxu1 }
 0x1cd   :  { %2316 = vrot.lane.b32.xlu0 %v1914_v18, %s12931_s1  ;;  %v2619_v16 = vpop.f32.mrb[25].mxu0  ;;  %v2690_v28 = vpop.f32.mrb[25].mxu1 }
 0x1ce   :  { %3220 = vrot.lane.b32.xlu1 %v2617_v51, %s12932_s17 }
 0x1d0   :  { %v2759_v10 = vpop.f32.mrb[26].mxu0  ;;  %v2830_v3 = vpop.f32.mrb[26].mxu1 }
 0x1d1   :  { %2320 = vrot.lane.b32.xlu0 %v1985_v62, %s12931_s1  ;;  %v2761_v40 = vpop.f32.mrb[27].mxu0  ;;  %v2832_v8 = vpop.f32.mrb[27].mxu1 }
 0x1d2   :  { %3224 = vrot.lane.b32.xlu1 %v2688_v30, %s12932_s17 }
 0x1d4   :  { %v2901_v0 = vpop.f32.mrb[28].mxu0  ;;  %v2972_v19 = vpop.f32.mrb[28].mxu1 }
 0x1d5   :  { %2318 = vrot.lane.b32.xlu0 %v1916_v13, %s12931_s1  ;;  %v2903_v35 = vpop.f32.mrb[29].mxu0  ;;  %v2974_v34 = vpop.f32.mrb[29].mxu1 }
 0x1d6   :  { %3222 = vrot.lane.b32.xlu1 %v2619_v16, %s12932_s17 }
 0x1d8   :  { %v3043_v22 = vpop.f32.mrb[30].mxu0  ;;  %v14133_v46 = vpop.f32.mrb[30].mxu1 }
 0x1d9   :  { %2322 = vrot.lane.b32.xlu0 %v1987_v2, %s12931_s1  ;;  %v14136_v49 = vpop.f32.mrb[31].mxu0  ;;  %v14138_v31 = vpop.f32.mrb[31].mxu1 }
 0x1da   :  { %3226 = vrot.lane.b32.xlu1 %v2690_v28, %s12932_s17 }
 0x1dc   :  { %v14141_v43 = vpop.f32.mrb[32].mxu0  ;;  %v3391_v47 = vpop.f32.mrb[32].mxu1 }
 0x1dd   :  { %2324 = vrot.lane.b32.xlu0 %v2056_v61, %s12931_s1  ;;  %v14144_v59 = vpop.f32.mrb[33].mxu0  ;;  %v3393_v38 = vpop.f32.mrb[33].mxu1 }
 0x1de   :  { %17536 = vst [vmem:[#allocation12_spill] sm:$0xff] %v14144_v59  ;;  %3228 = vrot.lane.b32.xlu1 %v2759_v10, %s12932_s17 }
 0x1e0   :  { %v3462_v26 = vpop.f32.mrb[34].mxu0  ;;  %v3533_v53 = vpop.f32.mrb[34].mxu1 }
 0x1e1   :  { %2328 = vrot.lane.b32.xlu0 %v2127_v7, %s12931_s1  ;;  %v3464_v15 = vpop.f32.mrb[35].mxu0  ;;  %v3535_v39 = vpop.f32.mrb[35].mxu1 }
 0x1e2   :  { %3232 = vrot.lane.b32.xlu1 %v2830_v3, %s12932_s17 }
 0x1e4   :  { %v3604_v9 = vpop.f32.mrb[36].mxu0  ;;  %v3675_v12 = vpop.f32.mrb[36].mxu1 }
 0x1e5   :  { %2326 = vrot.lane.b32.xlu0 %v2058_v48, %s12931_s1  ;;  %v3606_v18 = vpop.f32.mrb[37].mxu0  ;;  %v3677_v62 = vpop.f32.mrb[37].mxu1 }
 0x1e6   :  { %3230 = vrot.lane.b32.xlu1 %v2761_v40, %s12932_s17 }
 0x1e8   :  { %v3746_v13 = vpop.f32.mrb[38].mxu0  ;;  %v3817_v2 = vpop.f32.mrb[38].mxu1 }
 0x1e9   :  { %2330 = vrot.lane.b32.xlu0 %v2129_v63, %s12931_s1  ;;  %v3748_v61 = vpop.f32.mrb[39].mxu0  ;;  %v3819_v50 = vpop.f32.mrb[39].mxu1 }
 0x1ea   :  { %3234 = vrot.lane.b32.xlu1 %v2832_v8, %s12932_s17 }
 0x1ec   :  { %v14153_v7 = vpop.f32.mrb[40].mxu0  ;;  %v14155_v51 = vpop.f32.mrb[40].mxu1 }
 0x1ed   :  { %3212 = vrot.lane.b32.xlu0 %v2475_v5, %s12932_s17  ;;  %v14158_v30 = vpop.f32.mrb[41].mxu0  ;;  %v14160_v48 = vpop.f32.mrb[41].mxu1 }
 0x1ee   :  { %3236 = vrot.lane.b32.xlu1 %v2901_v0, %s12932_s17 }
 0x1f0   :  { %v14163_v16 = vpop.f32.mrb[42].mxu0  ;;  %v14165_v28 = vpop.f32.mrb[42].mxu1 }
 0x1f1   :  { %3216 = vrot.lane.b32.xlu0 %v2546_v4, %s12932_s17  ;;  %v4032_v63 = vpop.f32.mrb[43].mxu0  ;;  %v14168_v10 = vpop.f32.mrb[43].mxu1 }
 0x1f2   :  { %17537 = vst [vmem:[#allocation13_spill] sm:$0xff] %v14168_v10  ;;  %3240 = vrot.lane.b32.xlu1 %v2972_v19, %s12932_s17 }
 0x1f4   :  { %v4307_v3 = vpop.f32.mrb[44].mxu0  ;;  %v4378_v40 = vpop.f32.mrb[44].mxu1 }
 0x1f5   :  { %3218 = vrot.lane.b32.xlu0 %v14124_v25, %s12932_s17  ;;  %v4309_v5 = vpop.f32.mrb[45].mxu0  ;;  %v4380_v8 = vpop.f32.mrb[45].mxu1 }
 0x1f6   :  { %3238 = vrot.lane.b32.xlu1 %v2903_v35, %s12932_s17 }
 0x1f8   :  { %v4449_v0 = vpop.f32.mrb[46].mxu0  ;;  %v4520_v11 = vpop.f32.mrb[46].mxu1 }
 0x1f9   :  { %4130 = vrot.lane.b32.xlu0 %v3393_v38, %s12933_s18  ;;  %v4451_v4 = vpop.f32.mrb[47].mxu0  ;;  %v4522_v58 = vpop.f32.mrb[47].mxu1 }
 0x1fa   :  { %3242 = vrot.lane.b32.xlu1 %v2974_v34, %s12932_s17 }
 0x1fc   :  { %v4591_v10 = vpop.f32.mrb[48].mxu0  ;;  %v4662_v19 = vpop.f32.mrb[48].mxu1 }
 0x1fd   :  { %4136 = vrot.lane.b32.xlu0 %v3533_v53, %s12933_s18  ;;  %v4593_v29 = vpop.f32.mrb[49].mxu0  ;;  %v4664_v59 = vpop.f32.mrb[49].mxu1 }
 0x1fe   :  { %3244 = vrot.lane.b32.xlu1 %v3043_v22, %s12932_s17 }
 0x200   :  { %v4733_v25 = vpop.f32.mrb[50].mxu0  ;;  %v14178_v17 = vpop.f32.mrb[50].mxu1 }
 0x201   :  { %4134 = vrot.lane.b32.xlu0 %v3464_v15, %s12933_s18  ;;  %v14181_v35 = vpop.f32.mrb[51].mxu0  ;;  %v14183_v38 = vpop.f32.mrb[51].mxu1 }
 0x202   :  { %4128 = vrot.lane.b32.xlu1 %v3391_v47, %s12933_s18  ;;  %v14217_v47 = vpop.permute.xlu0 %1464 }
 0x203   :  { %17539 = vst [vmem:[#allocation15_spill] sm:$0xff] %v14217_v47  ;;  %v1467_v33 = vadd.f32 %v14217_v47, %v14064_v20  ;;  %v1472_v57 = vadd.f32 %v14217_v47, %v14074_v45  ;;  %v14408_v45 = vadd.f32 %v14217_v47, %v14080_v6  ;;  %v14425_v6 = vadd.f32 %v14217_v47, %v14086_v32 }
 0x204   :  { %v14186_v34 = vpop.f32.mrb[52].mxu1  ;;  %v14188_v1 = vpop.f32.mrb[52].mxu0 }
 0x205   :  { %4138 = vrot.lane.b32.xlu0 %v3535_v39, %s12933_s18  ;;  %v14191_v53 = vpop.f32.mrb[53].mxu1  ;;  %v14193_v22 = vpop.f32.mrb[53].mxu0  ;;  %17563 = vst [vmem:[#allocation36_spill] sm:$0xff] %v14425_v6 }
 0x206   :  { %4132 = vrot.lane.b32.xlu1 %v3462_v26, %s12933_s18 }
 0x208   :  { %v14196_v44 = vpop.f32.mrb[54].mxu0 }
 0x209   :  { %4140 = vrot.lane.b32.xlu0 %v3604_v9, %s12933_s18  ;;  %v14199_v15 = vpop.f32.mrb[55].mxu0 }
 0x20a   :  { %17538 = vst [vmem:[#allocation14_spill] sm:$0xff] %v14199_v15  ;;  %5044 = vrot.lane.b32.xlu1 %v4307_v3, %s12934_s19 }
 0x20d   :  { %4144 = vrot.lane.b32.xlu0 %v3675_v12, %s12933_s18 }
 0x20e   :  { %5048 = vrot.lane.b32.xlu1 %v4378_v40, %s12934_s19 }
 0x211   :  { %4142 = vrot.lane.b32.xlu0 %v3606_v18, %s12933_s18 }
 0x212   :  { %3246 = vrot.lane.b32.xlu1 %v14136_v49, %s12932_s17 }
 0x215   :  { %4146 = vrot.lane.b32.xlu0 %v3677_v62, %s12933_s18 }
 0x216   :  { %3248 = vrot.lane.b32.xlu1 %v14133_v46, %s12932_s17 }
 0x219   :  { %4148 = vrot.lane.b32.xlu0 %v3746_v13, %s12933_s18 }
 0x21a   :  { %3250 = vrot.lane.b32.xlu1 %v14138_v31, %s12932_s17 }
 0x21d   :  { %4152 = vrot.lane.b32.xlu0 %v3817_v2, %s12933_s18 }
 0x21e   :  { %4166 = vrot.lane.b32.xlu1 %v4032_v63, %s12933_s18 }
 0x221   :  { %4150 = vrot.lane.b32.xlu0 %v3748_v61, %s12933_s18 }
 0x222   :  { %5050 = vrot.lane.b32.xlu1 %v4380_v8, %s12934_s19 }
 0x223   :  { %v14220_v49 = vpop.permute.xlu1 %2296 }
 0x225   :  { %4154 = vrot.lane.b32.xlu0 %v3819_v50, %s12933_s18 }
 0x226   :  { %5052 = vrot.lane.b32.xlu1 %v4449_v0, %s12934_s19 }
 0x227   :  { %v14223_v46 = vpop.permute.xlu0 %2300  ;;  %v14230_v26 = vpop.permute.xlu1 %2298 }
 0x229   :  { %4156 = vrot.lane.b32.xlu0 %v14153_v7, %s12933_s18 }
 0x22a   :  { %5056 = vrot.lane.b32.xlu1 %v4520_v11, %s12934_s19 }
 0x22b   :  { %v14228_v31 = vpop.permute.xlu0 %2306  ;;  %v14238_v9 = vpop.permute.xlu1 %2304 }
 0x22c   :  { %v2345_v32 = vsel %vm2340_vm12, %v14238_v9, %v14228_v31 }
 0x22d   :  { %4158 = vrot.lane.b32.xlu0 %v14158_v30, %s12933_s18 }
 0x22e   :  { %5054 = vrot.lane.b32.xlu1 %v4451_v4, %s12934_s19 }
 0x22f   :  { %v14235_v39 = vpop.permute.xlu0 %2308  ;;  %v14248_v18 = vpop.permute.xlu1 %2302 }
 0x231   :  { %5046 = vrot.lane.b32.xlu0 %v4309_v5, %s12934_s19 }
 0x232   :  { %5058 = vrot.lane.b32.xlu1 %v4522_v58, %s12934_s19 }
 0x233   :  { %v14241_v12 = vpop.permute.xlu0 %2312 }
 0x235   :  { %2332 = vrot.lane.b32.xlu0 %v14114_v52, %s12931_s1 }
 0x236   :  { %5060 = vrot.lane.b32.xlu1 %v4591_v10, %s12934_s19 }
 0x237   :  { %v14246_v11 = vpop.permute.xlu0 %2310 }
 0x239   :  { %4160 = vrot.lane.b32.xlu0 %v14155_v51, %s12933_s18 }
 0x23a   :  { %5064 = vrot.lane.b32.xlu1 %v4662_v19, %s12934_s19 }
 0x23b   :  { %v14253_v62 = vpop.permute.xlu0 %2314 }
 0x23c   :  { %v14255_v13 = vpop.permute.xlu1 %3214 }
 0x23d   :  { %2334 = vrot.lane.b32.xlu0 %v14119_v42, %s12931_s1 }
 0x23e   :  { %5062 = vrot.lane.b32.xlu1 %v4593_v29, %s12934_s19 }
 0x23f   :  { %v14260_v58 = vpop.permute.xlu0 %2316 }
 0x240   :  { %v14262_v52 = vpop.permute.xlu1 %3220 }
 0x241   :  { %4162 = vrot.lane.b32.xlu0 %v14160_v48, %s12933_s18 }
 0x242   :  { %5066 = vrot.lane.b32.xlu1 %v4664_v59, %s12934_s19 }
 0x243   :  { %v14267_v2 = vpop.permute.xlu0 %2320 }
 0x244   :  { %v14269_v61 = vpop.permute.xlu1 %3224 }
 0x245   :  { %2336 = vrot.lane.b32.xlu0 %v14116_v23, %s12931_s1 }
 0x246   :  { %5068 = vrot.lane.b32.xlu1 %v4733_v25, %s12934_s19 }
 0x247   :  { %v14274_v42 = vpop.permute.xlu0 %2318 }
 0x248   :  { %v14276_v29 = vpop.permute.xlu1 %3222 }
 0x249   :  { %4164 = vrot.lane.b32.xlu0 %v14163_v16, %s12933_s18 }
 0x24a   :  { %5072 = vrot.lane.b32.xlu1 %v14178_v17, %s12934_s19 }
 0x24b   :  { %v14282_v59 = vpop.permute.xlu0 %2322 }
 0x24c   :  { %17540 = vst [vmem:[#allocation16_spill] sm:$0xff] %v14282_v59  ;;  %v14284_v50 = vpop.permute.xlu1 %3226 }
 0x24d   :  { %3252 = vrot.lane.b32.xlu0 %v14141_v43, %s12932_s17 }
 0x24e   :  { %5070 = vrot.lane.b32.xlu1 %v14181_v35, %s12934_s19 }
 0x24f   :  { %v14290_v23 = vpop.permute.xlu0 %2324 }
 0x250   :  { %17541 = vst [vmem:[#allocation17_spill] sm:$0xff] %v14290_v23  ;;  %v14292_v7 = vpop.permute.xlu1 %3228  ;;  %v1468_v23 = vadd.f32 %v14217_v47, %v14066_v21 }
 0x251   :  { %5080 = vrot.lane.b32.xlu0 %v14186_v34, %s12934_s19 }
 0x252   :  { %5074 = vrot.lane.b32.xlu1 %v14183_v38, %s12934_s19 }
 0x253   :  { %v14298_v17 = vpop.permute.xlu0 %2328 }
 0x254   :  { %17542 = vst [vmem:[#allocation18_spill] sm:$0xff] %v14298_v17  ;;  %v14300_v51 = vpop.permute.xlu1 %3232 }
 0x255   :  { %5082 = vrot.lane.b32.xlu0 %v14191_v53, %s12934_s19 }
 0x256   :  { %5076 = vrot.lane.b32.xlu1 %v14188_v1, %s12934_s19 }
 0x257   :  { %v14306_v43 = vpop.permute.xlu0 %2326 }
 0x258   :  { %17543 = vst [vmem:[#allocation19_spill] sm:$0xff] %v14306_v43  ;;  %v14308_v30 = vpop.permute.xlu1 %3230  ;;  %v14368_v43 = vshrl.u32 %v5154_v37, 7  ;;  %v1469_v37 = vadd.f32 %v14217_v47, %v14068_v24  ;;  %v1473_v24 = vadd.f32 %v14217_v47, %v14076_v60 }
 0x25a   :  { %5078 = vrot.lane.b32.xlu1 %v14193_v22, %s12934_s19  ;;  %17555 = vst [vmem:[#allocation31_spill] sm:$0xff] %v14368_v43  ;;  %v17560_v20 = vsub.s32 2, %v14368_v43  ;;  %v17562_v60 = vsub.s32 4, %v14368_v43 }
 0x25b   :  { %v14312_v48 = vpop.permute.xlu0 %2330 }
 0x25c   :  { %17544 = vst [vmem:[#allocation20_spill] sm:$0xff] %v14312_v48  ;;  %v14314_v16 = vpop.permute.xlu1 %3234 }
 0x25d   :  { %17545 = vst [vmem:[#allocation21_spill] sm:$0xff] %v14314_v16 }
 0x25e   :  { %4168 = vrot.lane.b32.xlu1 %v14165_v28, %s12933_s18 }
 0x25f   :  { %v14318_v63 = vpop.permute.xlu0 %3212 }
 0x260   :  { %v14320_v10 = vpop.permute.xlu1 %3236 }
 0x261   :  { %17546 = vst [vmem:[#allocation22_spill] sm:$0xff] %v14320_v10 }
 0x262   :  { %5084 = vrot.lane.b32.xlu1 %v14196_v44, %s12934_s19 }
 0x263   :  { %v14324_v1 = vpop.permute.xlu0 %3216 }
 0x264   :  { %v14326_v3 = vpop.permute.xlu1 %3240 }
 0x265   :  { %17547 = vst [vmem:[#allocation23_spill] sm:$0xff] %v14326_v3 }
 0x267   :  { %v14328_v40 = vpop.permute.xlu0 %3218 }
 0x268   :  { %v14330_v5 = vpop.permute.xlu1 %3238 }
 0x269   :  { %17548 = vst [vmem:[#allocation24_spill] sm:$0xff] %v14330_v5 }
 0x26b   :  { %v14332_v8 = vpop.permute.xlu0 %4130 }
 0x26c   :  { %v14334_v0 = vpop.permute.xlu1 %3242 }
 0x26d   :  { %17549 = vst [vmem:[#allocation25_spill] sm:$0xff] %v14334_v0 }
 0x26f   :  { %v14336_v28 = vpop.permute.xlu0 %4136 }
 0x270   :  { %v14338_v4 = vpop.permute.xlu1 %3244 }
 0x271   :  { %17550 = vst [vmem:[#allocation26_spill] sm:$0xff] %v14338_v4 }
 0x273   :  { %v14340_v19 = vpop.permute.xlu0 %4134 }
 0x274   :  { %v14342_v25 = vpop.permute.xlu1 %4128 }
 0x277   :  { %v14344_v44 = vpop.permute.xlu0 %4138 }
 0x278   :  { %v14346_v35 = vpop.permute.xlu1 %4132 }
 0x27b   :  { %v14348_v38 = vpop.permute.xlu0 %4140 }
 0x27c   :  { %v14350_v34 = vpop.permute.xlu1 %5044 }
 0x27f   :  { %v14352_v53 = vpop.permute.xlu0 %4144 }
 0x280   :  { %v14354_v22 = vpop.permute.xlu1 %5048 }
 0x283   :  { %v14356_v15 = vpop.permute.xlu0 %4142 }
 0x284   :  { %v14358_v48 = vpop.permute.xlu1 %3246 }
 0x285   :  { %17551 = vst [vmem:[#allocation27_spill] sm:$0xff] %v14358_v48  ;;  %v5152_v48 = vld [vmem:[%s17469_s9] sm:$0x1f] }
 0x287   :  { %v14360_v4 = vpop.permute.xlu0 %4146 }
 0x288   :  { %v14362_v0 = vpop.permute.xlu1 %3248 }
 0x289   :  { %17552 = vst [vmem:[#allocation28_spill] sm:$0xff] %v14362_v0  ;;  %v14395_v0 = vsub.s32 0, %v14368_v43 }
 0x28b   :  { %v14364_v54 = vpop.permute.xlu0 %4148  ;;  %17559 = vst [vmem:[#allocation35_spill] sm:$0xff] %v14395_v0  ;;  %v5157_v21 = vrot.slane %v5152_v48, %v14395_v0 }
 0x28c   :  { %17553 = vst [vmem:[#allocation29_spill] sm:$0xff] %v14364_v54  ;;  %v14366_v17 = vpop.permute.xlu1 %3250 }
 0x28d   :  { %17554 = vst [vmem:[#allocation30_spill] sm:$0xff] %v14366_v17  ;;  %v1470_v17 = vadd.f32 %v14217_v47, %v14070_v56  ;;  %v1474_v56 = vadd.f32 %v14217_v47, %v14078_v36  ;;  %v14417_v36 = vadd.f32 %v14217_v47, %v14084_v41  ;;  %v17565_v41 = vsub.s32 1, %v14368_v43 }
 0x28f   :  { %v14370_v3 = vpop.permute.xlu0 %4152  ;;  %v5161_v54 = vrot.slane %v5152_v48, %v17565_v41 }
 0x290   :  { %17556 = vst [vmem:[#allocation32_spill] sm:$0xff] %v14370_v3  ;;  %v14372_v5 = vpop.permute.xlu1 %4166  ;;  %v17561_v3 = vsub.s32 3, %v14368_v43 }
 0x291   :  { %17557 = vst [vmem:[#allocation33_spill] sm:$0xff] %v14372_v5  ;;  %v1471_v5 = vadd.f32 %v14217_v47, %v14072_v14  ;;  %v5165_v14 = vrot.slane %v5152_v48, %v17560_v20  ;;  %v14421_v20 = vadd.f32 %v14217_v47, %v14082_v27  ;;  %v2342_v27 = vsel %vm2340_vm12, %v14230_v26, %v14223_v46 }
 0x292   :  { %v5169_v10 = vrot.slane %v5152_v48, %v17561_v3  ;;  %v2341_v3 = vsel %vm2340_vm12, %v14220_v49, %v14230_v26  ;;  %v2343_v47 = vsel %vm2340_vm12, %v14223_v46, %v14248_v18  ;;  %v14453_v26 = vrot.slane %v5157_v21, %v14395_v0 }
 0x293   :  { %v14392_v55 = vpop.permute.xlu0 %4150  ;;  %v14444_v49 = vrot.slane %v5165_v14, %v14395_v0  ;;  %v2346_v46 = vsel %vm2340_vm12, %v14228_v31, %v14235_v39  ;;  %v2347_v14 = vsel %vm2340_vm12, %v14235_v39, %v14246_v11  ;;  %v2385_v21 = vadd.f32 %v2343_v47, %v1469_v37 }
 0x294   :  { %17558 = vst [vmem:[#allocation34_spill] sm:$0xff] %v14392_v55  ;;  %v14404_v59 = vpop.permute.xlu1 %5050  ;;  %v5173_v55 = vrot.slane %v5152_v48, %v17562_v60  ;;  %v2344_v48 = vsel %vm2340_vm12, %v14248_v18, %v14238_v9  ;;  %v14450_v41 = vrot.slane %v5169_v10, %v14395_v0  ;;  %v2348_v9 = vsel %vm2340_vm12, %v14246_v11, %v14241_v12 }
 0x295   :  { %v2384_v18 = vadd.f32 %v2342_v27, %v1468_v23  ;;  %v2387_v10 = vadd.f32 %v2345_v32, %v1471_v5  ;;  %v3261_v31 = vsel %vm3256_vm13, %v14262_v52, %v14276_v29  ;;  %v3262_v39 = vsel %vm3256_vm13, %v14276_v29, %v14269_v61 }
 0x296   :  { %v14456_v43 = vrot.slane %v5173_v55, %v14395_v0  ;;  %v14470_v55 = vrot.slane %v5161_v54, %v14395_v0  ;;  %v3259_v11 = vsel %vm3256_vm13, %v14324_v1, %v14328_v40  ;;  %v2388_v47 = vadd.f32 %v2346_v46, %v1472_v57 }
 0x297   :  { %v14430_v60 = vpop.permute.xlu0 %4154  ;;  %v2389_v5 = vadd.f32 %v2347_v14, %v1473_v24  ;;  %v2390_v37 = vadd.f32 %v2348_v9, %v1474_v56  ;;  %v3260_v54 = vsel %vm3256_vm13, %v14328_v40, %v14262_v52  ;;  %v3257_v29 = vsel %vm3256_vm13, %v14318_v63, %v14255_v13 }
 0x298   :  { %17564 = vst [vmem:[#allocation37_spill] sm:$0xff] %v14430_v60  ;;  %v5053_v6 = vpop.permute.xlu1 %5052  ;;  %v2383_v60 = vadd.f32 %v2341_v3, %v1467_v33  ;;  %v2386_v33 = vadd.f32 %v2344_v48, %v1470_v17  ;;  %v14487_v17 = vsel %vm2340_vm12, %v14241_v12, %v14253_v62  ;;  %v3258_v3 = vsel %vm3256_vm13, %v14255_v13, %v14324_v1 }
 0x299   :  { %v4175_v57 = vsel %vm4172_vm14, %v14346_v35, %v14340_v19  ;;  %v3303_v24 = vadd.f32 %v3261_v31, %v2387_v10  ;;  %v3304_v56 = vadd.f32 %v3262_v39, %v2388_v47  ;;  %v3301_v52 = vadd.f32 %v3259_v11, %v2385_v21 }
 0x29a   :  { %v4176_v12 = vsel %vm4172_vm14, %v14340_v19, %v14336_v28  ;;  %v3302_v27 = vadd.f32 %v3260_v54, %v2386_v33  ;;  %v4173_v63 = vsel %vm4172_vm14, %v14342_v25, %v14332_v8  ;;  %v4174_v13 = vsel %vm4172_vm14, %v14332_v8, %v14346_v35 }
 0x29b   :  { %v14467_v16 = vpop.permute.xlu0 %4156  ;;  %v5091_v1 = vsel %vm5088_vm15, %v14354_v22, %v14404_v59  ;;  %v3299_v48 = vadd.f32 %v3257_v29, %v2383_v60  ;;  %v3300_v46 = vadd.f32 %v3258_v3, %v2384_v18  ;;  %v4177_v19 = vsel %vm4172_vm14, %v14336_v28, %v14344_v44 }
 0x29c   :  { %v5057_v23 = vpop.permute.xlu1 %5056  ;;  %v4217_v14 = vadd.f32 %v4175_v57, %v3301_v52  ;;  %v3263_v25 = vsel %vm3256_vm13, %v14269_v61, %v14284_v50  ;;  %v3264_v8 = vsel %vm3256_vm13, %v14284_v50, %v14292_v7  ;;  %v4218_v35 = vadd.f32 %v4176_v12, %v3302_v27 }
 0x29d   :  { %v5092_v9 = vsel %vm5088_vm15, %v14404_v59, %v5053_v6  ;;  %v4215_v10 = vadd.f32 %v4173_v63, %v3299_v48  ;;  %v4216_v60 = vadd.f32 %v4174_v13, %v3300_v46  ;;  %v4178_v18 = vsel %vm4172_vm14, %v14344_v44, %v14348_v38 }
 0x29e   :  { %v14526_v28 = vadd.f32 %v5091_v1, %v4217_v14  ;;  %v4219_v33 = vadd.f32 %v4177_v19, %v3303_v24  ;;  %v4179_v59 = vsel %vm4172_vm14, %v14348_v38, %v14356_v15  ;;  %v14536_v11 = vadd.f32 %v5092_v9, %v4218_v35 }
 0x29f   :  { %v14501_v40 = vpop.permute.xlu0 %4158  ;;  %v3305_v54 = vadd.f32 %v3263_v25, %v2389_v5  ;;  %v3306_v52 = vadd.f32 %v3264_v8, %v2390_v37  ;;  %v2351_v37 = vsel %vm2340_vm12, %v14260_v58, %v14274_v42 }
 0x2a0   :  { %v5055_v32 = vpop.permute.xlu1 %5054  ;;  %v5202_v27 = vmul.f32 %v14450_v41, %v14536_v11 }
 0x2a1   :  { %v5093_v61 = vsel %vm5088_vm15, %v5053_v6, %v5055_v32  ;;  %v2350_v6 = vsel %vm2340_vm12, %v14253_v62, %v14260_v58  ;;  %v5094_v29 = vsel %vm5088_vm15, %v5055_v32, %v5057_v23  ;;  %v4180_v62 = vsel %vm4172_vm14, %v14356_v15, %v14352_v53 }
 0x2a2   :  { %v14548_v3 = vadd.f32 %v5093_v61, %v4219_v33  ;;  %v4221_v5 = vadd.f32 %v4179_v59, %v3305_v54  ;;  %v3265_v15 = vsel %vm3256_vm13, %v14292_v7, %v14308_v30  ;;  %v4222_v48 = vadd.f32 %v4180_v62, %v3306_v52  ;;  %v17566_v33 = vld [vmem:[#allocation21_spill] sm:$0xff] }
 0x2a3   :  { %v5047_v21 = vpop.permute.xlu0 %5046  ;;  %v2391_v58 = vadd.f32 %v14487_v17, %v14408_v45  ;;  %v2392_v8 = vadd.f32 %v2350_v6, %v14417_v36  ;;  %v3266_v7 = vsel %vm3256_vm13, %v14308_v30, %v14300_v51  ;;  %v2352_v45 = vsel %vm2340_vm12, %v14274_v42, %v14267_v2 }
 0x2a4   :  { %v5089_v31 = vsel %vm5088_vm15, %v14350_v34, %v5047_v21  ;;  %v5090_v50 = vsel %vm5088_vm15, %v5047_v21, %v14354_v22  ;;  %v5059_v39 = vpop.permute.xlu1 %5058  ;;  %v4220_v34 = vadd.f32 %v4178_v18, %v3304_v56  ;;  %v5201_v22 = vmul.f32 %v14444_v49, %v14526_v28 }
 0x2a5   :  { %v14538_v44 = vadd.f32 %v5089_v31, %v4215_v10  ;;  %v14540_v47 = vadd.f32 %v5090_v50, %v4216_v60  ;;  %v5095_v56 = vsel %vm5088_vm15, %v5057_v23, %v5059_v39  ;;  %v5203_v19 = vmul.f32 %v14456_v43, %v14548_v3 }
 0x2a6   :  { %v14562_v63 = vadd.f32 %v5094_v29, %v4220_v34  ;;  %v5222_v46 = vsel %vm540_vm4, %v5201_v22, 0.0  ;;  %v14576_v14 = vadd.f32 %v5095_v56, %v4221_v5  ;;  %v4181_v10 = vsel %vm4172_vm14, %v14352_v53, %v14360_v4  ;;  %v17567_v53 = vld [vmem:[#allocation29_spill] sm:$0xff]  ;;  %v17569_v56 = vld [vmem:[#allocation36_spill] sm:$0xff] }
 0x2a7   :  { %v5199_v38 = vmul.f32 %v14453_v26, %v14538_v44  ;;  %v5200_v57 = vmul.f32 %v14470_v55, %v14540_v47  ;;  %v14554_v24 = vpop.permute.xlu0 %2332  ;;  %v5224_v60 = vsel %vm540_vm4, %v5202_v27, 0.0  ;;  %v2393_v36 = vadd.f32 %v2351_v37, %v14421_v20  ;;  %v17568_v20 = vld [vmem:[#allocation34_spill] sm:$0xff] }
 0x2a8   :  { %v5061_v12 = vpop.permute.xlu1 %5060  ;;  %v5204_v18 = vmul.f32 %v14453_v26, %v14562_v63  ;;  %v3307_v30 = vadd.f32 %v3265_v15, %v2391_v58  ;;  %v3267_v61 = vsel %vm3256_vm13, %v14300_v51, %v17566_v33  ;;  %v4182_v31 = vsel %vm4172_vm14, %v14360_v4, %v17567_v53 }
 0x2a9   :  { %v5219_v13 = vsel %vm540_vm4, %v5199_v38, 0.0  ;;  %v5220_v1 = vsel %vm540_vm4, %v5200_v57, 0.0  ;;  %v5096_v23 = vsel %vm5088_vm15, %v5059_v39, %v5061_v12  ;;  %v5226_v50 = vsel %vm540_vm4, %v5203_v19, 0.0  ;;  %v17571_v19 = vld [vmem:[#allocation32_spill] sm:$0xff] }
 0x2aa   :  { %v5221_v32 = vadd.f32 %v5220_v1, %v5219_v13  ;;  %v14592_v21 = vadd.f32 %v5096_v23, %v4222_v48  ;;  %v5205_v39 = vmul.f32 %v14470_v55, %v14576_v14  ;;  %v3308_v42 = vadd.f32 %v3266_v7, %v2392_v8  ;;  %v17570_v13 = vld [vmem:[#allocation22_spill] sm:$0xff] }
 0x2ab   :  { %v14578_v25 = vpop.permute.xlu0 %4160  ;;  %v4223_v6 = vadd.f32 %v4181_v10, %v3307_v30  ;;  %v4183_v54 = vsel %vm4172_vm14, %v17567_v53, %v17568_v20  ;;  %v5228_v51 = vsel %vm540_vm4, %v5204_v18, 0.0  ;;  %v3309_v57 = vadd.f32 %v3267_v61, %v2393_v36  ;;  %v17572_v36 = vld [vmem:[#allocation16_spill] sm:$0xff]  ;;  %v17573_v53 = vld [vmem:[#allocation2_spill] sm:$0xff] }
 0x2ac   :  { %v5223_v35 = vadd.f32 %v5222_v46, %v5221_v32  ;;  %v5065_v9 = vpop.permute.xlu1 %5064  ;;  %v5206_v4 = vmul.f32 %v14444_v49, %v14592_v21  ;;  %v4224_v52 = vadd.f32 %v4182_v31, %v3308_v42  ;;  %v2394_v27 = vadd.f32 %v2352_v45, %v17569_v56  ;;  %v17574_v31 = vld [vmem:[#allocation15_spill] sm:$0xff] }
 0x2ad   :  { %v3268_v1 = vsel %vm3256_vm13, %v17566_v33, %v17570_v13  ;;  %v5230_v37 = vsel %vm540_vm4, %v5205_v39, 0.0  ;;  %v4225_v32 = vadd.f32 %v4183_v54, %v3309_v57  ;;  %v4184_v58 = vsel %vm4172_vm14, %v17568_v20, %v17571_v19  ;;  %v17576_v20 = vld [vmem:[#allocation3_spill] sm:$0xff] }
 0x2ae   :  { %v5225_v17 = vadd.f32 %v5224_v60, %v5223_v35  ;;  %v5232_v8 = vsel %vm540_vm4, %v5206_v4, 0.0  ;;  %v3310_v35 = vadd.f32 %v3268_v1, %v2394_v27  ;;  %v2353_v30 = vsel %vm2340_vm12, %v14267_v2, %v17572_v36  ;;  %v17579_v57 = vld [vmem:[#allocation23_spill] sm:$0xff] }
 0x2af   :  { %v14607_v59 = vpop.permute.xlu0 %2334  ;;  %v1480_v54 = vadd.f32 %v17574_v31, %v17576_v20  ;;  %v17580_v27 = vld [vmem:[#allocation19_spill] sm:$0xff]  ;;  %v17587_v20 = vld [vmem:[#allocation26_spill] sm:$0xff] }
 0x2b0   :  { %v5227_v34 = vadd.f32 %v5226_v50, %v5225_v17  ;;  %v5063_v29 = vpop.permute.xlu1 %5062  ;;  %v4226_v17 = vadd.f32 %v4184_v58, %v3310_v35  ;;  %v17575_v50 = vld [vmem:[#allocation17_spill] sm:$0xff] }
 0x2b1   :  { %v5097_v22 = vsel %vm5088_vm15, %v5061_v12, %v5063_v29  ;;  %v5098_v38 = vsel %vm5088_vm15, %v5063_v29, %v5065_v9  ;;  %v2354_v39 = vsel %vm2340_vm12, %v17572_v36, %v17575_v50  ;;  %v17577_v29 = vld [vmem:[#allocation4_spill] sm:$0xff]  ;;  %v2355_v1 = vsel %vm2340_vm12, %v17575_v50, %v17580_v27  ;;  %v17583_v58 = vld [vmem:[#allocation37_spill] sm:$0xff] }
 0x2b2   :  { %v5229_v62 = vadd.f32 %v5228_v51, %v5227_v34  ;;  %v14617_v5 = vadd.f32 %v5097_v22, %v4223_v6  ;;  %v14626_v12 = vadd.f32 %v5098_v38, %v4224_v52  ;;  %v1481_v51 = vadd.f32 %v17574_v31, %v17577_v29  ;;  %v17578_v22 = vld [vmem:[#allocation24_spill] sm:$0xff]  ;;  %v17585_v50 = vld [vmem:[#allocation25_spill] sm:$0xff] }
 0x2b3   :  { %v14624_v15 = vpop.permute.xlu0 %4162  ;;  %v3269_v38 = vsel %vm3256_vm13, %v17570_v13, %v17578_v22  ;;  %v3270_v52 = vsel %vm3256_vm13, %v17578_v22, %v17579_v57  ;;  %v2396_v56 = vadd.f32 %v2354_v39, %v1480_v54  ;;  %v3272_v54 = vsel %vm3256_vm13, %v17585_v50, %v17587_v20 }
 0x2b4   :  { %v5231_v23 = vadd.f32 %v5230_v37, %v5229_v62  ;;  %v5207_v48 = vmul.f32 %v14450_v41, %v14617_v5  ;;  %v5067_v46 = vpop.permute.xlu1 %5066  ;;  %v5208_v33 = vmul.f32 %v14456_v43, %v14626_v12  ;;  %v17581_v37 = vld [vmem:[#allocation18_spill] sm:$0xff] }
 0x2b5   :  { %v5099_v7 = vsel %vm5088_vm15, %v5065_v9, %v5067_v46  ;;  %v1479_v9 = vadd.f32 %v17574_v31, %v17573_v53  ;;  %v2397_v53 = vadd.f32 %v2355_v1, %v1481_v51  ;;  %v4187_v51 = vsel %vm4172_vm14, %v14467_v16, %v14501_v40 }
 0x2b6   :  { %v5233_v10 = vadd.f32 %v5232_v8, %v5231_v23  ;;  %v5234_v60 = vsel %vm540_vm4, %v5207_v48, 0.0  ;;  %v14636_v18 = vadd.f32 %v5099_v7, %v4225_v32  ;;  %v2356_v32 = vsel %vm2340_vm12, %v17580_v27, %v17581_v37 }
 0x2b7   :  { %v14638_v45 = vpop.permute.xlu0 %2336  ;;  %v2395_v4 = vadd.f32 %v2353_v30, %v1479_v9  ;;  %v5236_v23 = vsel %vm540_vm4, %v5208_v33, 0.0  ;;  %v4185_v8 = vsel %vm4172_vm14, %v17571_v19, %v17583_v58  ;;  %v4186_v7 = vsel %vm4172_vm14, %v17583_v58, %v14467_v16 }
 0x2b8   :  { %v5069_v61 = vpop.permute.xlu1 %5068  ;;  %v5235_v42 = vadd.f32 %v5234_v60, %v5233_v10  ;;  %v5209_v2 = vmul.f32 %v14453_v26, %v14636_v18  ;;  %v3312_v60 = vadd.f32 %v3270_v52, %v2396_v56  ;;  %v3271_v19 = vsel %vm3256_vm13, %v17579_v57, %v17585_v50 }
 0x2b9   :  { %v5100_v6 = vsel %vm5088_vm15, %v5067_v46, %v5069_v61  ;;  %v17582_v46 = vld [vmem:[#allocation5_spill] sm:$0xff]  ;;  %v3311_v10 = vadd.f32 %v3269_v38, %v2395_v4  ;;  %v3313_v52 = vadd.f32 %v3271_v19, %v2397_v53 }
 0x2ba   :  { %v14655_v34 = vadd.f32 %v5100_v6, %v4226_v17  ;;  %v1482_v13 = vadd.f32 %v17574_v31, %v17582_v46  ;;  %v5237_v35 = vadd.f32 %v5236_v23, %v5235_v42  ;;  %v5238_v36 = vsel %vm540_vm4, %v5209_v2, 0.0  ;;  %v17584_v17 = vld [vmem:[#allocation6_spill] sm:$0xff]  ;;  %v17586_v6 = vld [vmem:[#allocation20_spill] sm:$0xff]  ;;  %v17589_v23 = vld [vmem:[#allocation7_spill] sm:$0xff] }
 0x2bb   :  { %v14665_v62 = vpop.permute.xlu0 %4164  ;;  %v1483_v33 = vadd.f32 %v17574_v31, %v17584_v17  ;;  %v2357_v42 = vsel %vm2340_vm12, %v17581_v37, %v17586_v6  ;;  %v4227_v2 = vadd.f32 %v4185_v8, %v3311_v10  ;;  %v4228_v29 = vadd.f32 %v4186_v7, %v3312_v60  ;;  %v17588_v37 = vld [vmem:[#allocation8_spill] sm:$0xff]  ;;  %v17590_v60 = vld [vmem:[#allocation27_spill] sm:$0xff] }
 0x2bc   :  { %v5073_v48 = vpop.permute.xlu1 %5072  ;;  %v5210_v30 = vmul.f32 %v14470_v55, %v14655_v34  ;;  %v2398_v9 = vadd.f32 %v2356_v32, %v1482_v13  ;;  %v5239_v22 = vadd.f32 %v5238_v36, %v5237_v35  ;;  %v1484_v32 = vadd.f32 %v17574_v31, %v17588_v37 }
 0x2bd   :  { %v1485_v46 = vadd.f32 %v17574_v31, %v17589_v23  ;;  %v2399_v13 = vadd.f32 %v2357_v42, %v1483_v33  ;;  %v2358_v16 = vsel %vm2340_vm12, %v17586_v6, %v14554_v24  ;;  %v4229_v58 = vadd.f32 %v4187_v51, %v3313_v52 }
 0x2be   :  { %v5240_v56 = vsel %vm540_vm4, %v5210_v30, 0.0  ;;  %v2359_v8 = vsel %vm2340_vm12, %v14554_v24, %v14607_v59  ;;  %v3273_v36 = vsel %vm3256_vm13, %v17587_v20, %v17590_v60  ;;  %v4188_v30 = vsel %vm4172_vm14, %v14501_v40, %v14578_v25  ;;  %v17591_v40 = vld [vmem:[#allocation28_spill] sm:$0xff] }
 0x2bf   :  { %v14690_v39 = vpop.permute.xlu0 %3252  ;;  %v5241_v17 = vadd.f32 %v5240_v56, %v5239_v22  ;;  %v2400_v53 = vadd.f32 %v2358_v16, %v1484_v32  ;;  %v2401_v19 = vadd.f32 %v2359_v8, %v1485_v46  ;;  %v3315_v42 = vadd.f32 %v3273_v36, %v2399_v13  ;;  %v17592_v22 = vld [vmem:[#allocation30_spill] sm:$0xff]  ;;  %v17593_v32 = vld [vmem:[#allocation9_spill] sm:$0xff] }
 0x2c0   :  { %v5071_v4 = vpop.permute.xlu1 %5070  ;;  %v1486_v23 = vadd.f32 %v17574_v31, %v17593_v32  ;;  %v17594_v46 = vld [vmem:[#allocation33_spill] sm:$0xff] }
 0x2c1   :  { %v5101_v38 = vsel %vm5088_vm15, %v5069_v61, %v5071_v4  ;;  %v5102_v57 = vsel %vm5088_vm15, %v5071_v4, %v5073_v48  ;;  %v3314_v61 = vadd.f32 %v3272_v54, %v2398_v9  ;;  %v4190_v4 = vsel %vm4172_vm14, %v14624_v15, %v14665_v62 }
 0x2c2   :  { %v14704_v27 = vadd.f32 %v5101_v38, %v4227_v2  ;;  %v14706_v1 = vadd.f32 %v5102_v57, %v4228_v29  ;;  %v4189_v29 = vsel %vm4172_vm14, %v14578_v25, %v14624_v15  ;;  %v3275_v38 = vsel %vm3256_vm13, %v17591_v40, %v17592_v22 }
 0x2c3   :  { %v5081_v35 = vpop.permute.xlu0 %5080  ;;  %v4230_v54 = vadd.f32 %v4188_v30, %v3314_v61  ;;  %v3317_v25 = vadd.f32 %v3275_v38, %v2401_v19  ;;  %v4191_v15 = vsel %vm4172_vm14, %v14665_v62, %v17594_v46  ;;  %v4231_v16 = vadd.f32 %v4189_v29, %v3315_v42 }
 0x2c4   :  { %v5211_v7 = vmul.f32 %v14444_v49, %v14704_v27  ;;  %v5075_v10 = vpop.permute.xlu1 %5074  ;;  %v5212_v24 = vmul.f32 %v14450_v41, %v14706_v1 }
 0x2c5   :  { %v5103_v33 = vsel %vm5088_vm15, %v5073_v48, %v5075_v10  ;;  %v3274_v48 = vsel %vm3256_vm13, %v17590_v60, %v17591_v40  ;;  %v4233_v62 = vadd.f32 %v4191_v15, %v3317_v25 }
 0x2c6   :  { %v5242_v9 = vsel %vm540_vm4, %v5211_v7, 0.0  ;;  %v14730_v50 = vadd.f32 %v5103_v33, %v4229_v58  ;;  %v3316_v57 = vadd.f32 %v3274_v48, %v2400_v53  ;;  %v5244_v52 = vsel %vm540_vm4, %v5212_v24, 0.0 }
 0x2c7   :  { %v5243_v6 = vadd.f32 %v5242_v9, %v5241_v17  ;;  %v5083_v56 = vpop.permute.xlu0 %5082  ;;  %v3276_v24 = vsel %vm3256_vm13, %v17592_v22, %v14690_v39 }
 0x2c8   :  { %v5213_v20 = vmul.f32 %v14456_v43, %v14730_v50  ;;  %v5077_v2 = vpop.permute.xlu1 %5076  ;;  %v4232_v61 = vadd.f32 %v4190_v4, %v3316_v57  ;;  %v5107_v60 = vsel %vm5088_vm15, %v5081_v35, %v5083_v56 }
 0x2c9   :  { %v5104_v51 = vsel %vm5088_vm15, %v5075_v10, %v5077_v2  ;;  %v5245_v13 = vadd.f32 %v5244_v52, %v5243_v6  ;;  %v2360_v10 = vsel %vm2340_vm12, %v14607_v59, %v14638_v45  ;;  %v14772_v59 = vadd.f32 %v5107_v60, %v4233_v62 }
 0x2ca   :  { %v14748_v37 = vadd.f32 %v5104_v51, %v4230_v54  ;;  %v5246_v58 = vsel %vm540_vm4, %v5213_v20, 0.0  ;;  %v2402_v19 = vadd.f32 %v2360_v10, %v1486_v23 }
 0x2cb   :  { %v5247_v9 = vadd.f32 %v5246_v58, %v5245_v13  ;;  %v5217_v29 = vmul.f32 %v14450_v41, %v14772_v59 }
 0x2cc   :  { %v5214_v8 = vmul.f32 %v14453_v26, %v14748_v37  ;;  %v5079_v7 = vpop.permute.xlu1 %5078 }
 0x2cd   :  { %v5105_v36 = vsel %vm5088_vm15, %v5077_v2, %v5079_v7  ;;  %v5106_v30 = vsel %vm5088_vm15, %v5079_v7, %v5081_v35  ;;  %v3318_v2 = vadd.f32 %v3276_v24, %v2402_v19  ;;  %v5254_v23 = vsel %vm540_vm4, %v5217_v29, 0.0 }
 0x2ce   :  { %v5248_v17 = vsel %vm540_vm4, %v5214_v8, 0.0  ;;  %v14765_v33 = vadd.f32 %v5105_v36, %v4231_v16  ;;  %v14767_v53 = vadd.f32 %v5106_v30, %v4232_v61 }
 0x2cf   :  { %v5249_v54 = vadd.f32 %v5248_v17, %v5247_v9 }
 0x2d0   :  { %v5215_v6 = vmul.f32 %v14470_v55, %v14765_v33  ;;  %v5216_v35 = vmul.f32 %v14444_v49, %v14767_v53  ;;  %v14778_v42 = vpop.permute.xlu1 %4168 }
 0x2d1   :  { %v4192_v20 = vsel %vm4172_vm14, %v17594_v46, %v14778_v42 }
 0x2d2   :  { %v5250_v40 = vsel %vm540_vm4, %v5215_v6, 0.0  ;;  %v5252_v4 = vsel %vm540_vm4, %v5216_v35, 0.0  ;;  %v4234_v51 = vadd.f32 %v4192_v20, %v3318_v2 }
 0x2d3   :  { %v5251_v48 = vadd.f32 %v5250_v40, %v5249_v54 }
 0x2d4   :  { %v14787_v22 = vpop.permute.xlu1 %5084 }
 0x2d5   :  { %v5108_v38 = vsel %vm5088_vm15, %v5083_v56, %v14787_v22  ;;  %v5253_v57 = vadd.f32 %v5252_v4, %v5251_v48 }
 0x2d6   :  { %v14791_v52 = vadd.f32 %v5108_v38, %v4234_v51 }
 0x2d7   :  { %v5255_v25 = vadd.f32 %v5254_v23, %v5253_v57 }
 0x2d8   :  { %v5218_v32 = vmul.f32 %v14456_v43, %v14791_v52 }
 0x2da   :  { %v5256_v46 = vsel %vm540_vm4, %v5218_v32, 0.0 }
 0x2db   :  { %v5257_v15 = vadd.f32 %v5256_v46, %v5255_v25 }
 0x2dd   :  { %5258 = vadd.xlane.f32.xlu0 %v5257_v15 }
 0x36a   :  { %v5259_v13 = vpop.xlane.xlu0 %5258 }
 0x36b   :  { %v14797_v16 = vmul.f32 0.000625, %v5259_v13 }
 0x36d   :  { %v14801_v61 = vsub.f32 %v14538_v44, %v14797_v16  ;;  %v14805_v56 = vsub.f32 %v14540_v47, %v14797_v16  ;;  %v14809_v58 = vsub.f32 %v14526_v28, %v14797_v16  ;;  %v14813_v8 = vsub.f32 %v14536_v11, %v14797_v16 }
 0x36e   :  { %v14821_v44 = vsub.f32 %v14548_v3, %v14797_v16  ;;  %v14827_v28 = vsub.f32 %v14562_v63, %v14797_v16  ;;  %v14833_v30 = vsub.f32 %v14576_v14, %v14797_v16  ;;  %v14839_v17 = vsub.f32 %v14592_v21, %v14797_v16 }
 0x36f   :  { %v5281_v7 = vmul.f32 %v14801_v61, %v14453_v26  ;;  %v5282_v10 = vmul.f32 %v14805_v56, %v14470_v55  ;;  %v5283_v47 = vmul.f32 %v14809_v58, %v14444_v49  ;;  %v5284_v11 = vmul.f32 %v14813_v8, %v14450_v41 }
 0x370   :  { %v5285_v3 = vmul.f32 %v14821_v44, %v14456_v43  ;;  %v5286_v63 = vmul.f32 %v14827_v28, %v14453_v26  ;;  %v14847_v14 = vsub.f32 %v14617_v5, %v14797_v16  ;;  %v5287_v35 = vmul.f32 %v14833_v30, %v14470_v55 }
 0x371   :  { %v5301_v60 = vmul.f32 %v5281_v7, %v5281_v7  ;;  %v5302_v36 = vmul.f32 %v5282_v10, %v5282_v10  ;;  %v5303_v62 = vmul.f32 %v5283_v47, %v5283_v47  ;;  %v5304_v24 = vmul.f32 %v5284_v11, %v5284_v11 }
 0x372   :  { %v5305_v54 = vmul.f32 %v5285_v3, %v5285_v3  ;;  %v14854_v2 = vsub.f32 %v14626_v12, %v14797_v16  ;;  %v5288_v40 = vmul.f32 %v14839_v17, %v14444_v49  ;;  %v5306_v48 = vmul.f32 %v5286_v63, %v5286_v63 }
 0x373   :  { %v5321_v9 = vsel %vm540_vm4, %v5301_v60, 0.0  ;;  %v5322_v19 = vsel %vm540_vm4, %v5302_v36, 0.0  ;;  %v5324_v21 = vsel %vm540_vm4, %v5303_v62, 0.0  ;;  %v5326_v29 = vsel %vm540_vm4, %v5304_v24, 0.0 }
 0x374   :  { %v5323_v6 = vadd.f32 %v5322_v19, %v5321_v9  ;;  %v14861_v5 = vsub.f32 %v14636_v18, %v14797_v16  ;;  %v5289_v51 = vmul.f32 %v14847_v14, %v14450_v41  ;;  %v5307_v38 = vmul.f32 %v5287_v35, %v5287_v35 }
 0x375   :  { %v5328_v57 = vsel %vm540_vm4, %v5305_v54, 0.0  ;;  %v14868_v12 = vsub.f32 %v14655_v34, %v14797_v16  ;;  %v5290_v23 = vmul.f32 %v14854_v2, %v14456_v43  ;;  %v5308_v25 = vmul.f32 %v5288_v40, %v5288_v40 }
 0x376   :  { %v5325_v20 = vadd.f32 %v5324_v21, %v5323_v6  ;;  %v5330_v46 = vsel %vm540_vm4, %v5306_v48, 0.0  ;;  %v14875_v18 = vsub.f32 %v14704_v27, %v14797_v16  ;;  %v5291_v13 = vmul.f32 %v14861_v5, %v14453_v26 }
 0x377   :  { %v5309_v7 = vmul.f32 %v5289_v51, %v5289_v51  ;;  %v5332_v10 = vsel %vm540_vm4, %v5307_v38, 0.0  ;;  %v14882_v34 = vsub.f32 %v14706_v1, %v14797_v16  ;;  %v5292_v11 = vmul.f32 %v14868_v12, %v14470_v55 }
 0x378   :  { %v5327_v4 = vadd.f32 %v5326_v29, %v5325_v20  ;;  %v5310_v60 = vmul.f32 %v5290_v23, %v5290_v23  ;;  %v5334_v36 = vsel %vm540_vm4, %v5308_v25, 0.0  ;;  %v14889_v27 = vsub.f32 %v14730_v50, %v14797_v16 }
 0x379   :  { %v5293_v62 = vmul.f32 %v14875_v18, %v14444_v49  ;;  %v5311_v63 = vmul.f32 %v5291_v13, %v5291_v13  ;;  %v5336_v24 = vsel %vm540_vm4, %v5309_v7, 0.0  ;;  %v14896_v1 = vsub.f32 %v14748_v37, %v14797_v16 }
 0x37a   :  { %v5329_v32 = vadd.f32 %v5328_v57, %v5327_v4  ;;  %v5294_v19 = vmul.f32 %v14882_v34, %v14450_v41  ;;  %v5312_v6 = vmul.f32 %v5292_v11, %v5292_v11  ;;  %v5338_v35 = vsel %vm540_vm4, %v5310_v60, 0.0 }
 0x37b   :  { %v14903_v50 = vsub.f32 %v14765_v33, %v14797_v16  ;;  %v5295_v21 = vmul.f32 %v14889_v27, %v14456_v43  ;;  %v5313_v20 = vmul.f32 %v5293_v62, %v5293_v62  ;;  %v5340_v40 = vsel %vm540_vm4, %v5311_v63, 0.0 }
 0x37c   :  { %v5331_v15 = vadd.f32 %v5330_v46, %v5329_v32  ;;  %v14910_v37 = vsub.f32 %v14767_v53, %v14797_v16  ;;  %v5296_v29 = vmul.f32 %v14896_v1, %v14453_v26  ;;  %v5314_v4 = vmul.f32 %v5294_v19, %v5294_v19 }
 0x37d   :  { %v5342_v51 = vsel %vm540_vm4, %v5312_v6, 0.0  ;;  %v14917_v33 = vsub.f32 %v14772_v59, %v14797_v16  ;;  %v5297_v57 = vmul.f32 %v14903_v50, %v14470_v55  ;;  %v5315_v32 = vmul.f32 %v5295_v21, %v5295_v21 }
 0x37e   :  { %v5333_v47 = vadd.f32 %v5332_v10, %v5331_v15  ;;  %v5344_v23 = vsel %vm540_vm4, %v5313_v20, 0.0  ;;  %v14924_v53 = vsub.f32 %v14791_v52, %v14797_v16  ;;  %v5298_v26 = vmul.f32 %v14910_v37, %v14444_v49 }
 0x37f   :  { %v5316_v46 = vmul.f32 %v5296_v29, %v5296_v29  ;;  %v5346_v15 = vsel %vm540_vm4, %v5314_v4, 0.0  ;;  %v5299_v59 = vmul.f32 %v14917_v33, %v14450_v41  ;;  %v5317_v7 = vmul.f32 %v5297_v57, %v5297_v57 }
 0x380   :  { %v5335_v3 = vadd.f32 %v5334_v36, %v5333_v47  ;;  %v5348_v55 = vsel %vm540_vm4, %v5315_v32, 0.0  ;;  %v5300_v47 = vmul.f32 %v14924_v53, %v14456_v43  ;;  %v5318_v11 = vmul.f32 %v5298_v26, %v5298_v26  ;;  %v5394_v43 = vld [vmem:[%s17470_s4] sm:$0x3f] }
 0x381   :  { %v5350_v52 = vsel %vm540_vm4, %v5316_v46, 0.0  ;;  %v5319_v36 = vmul.f32 %v5299_v59, %v5299_v59  ;;  %v5352_v49 = vsel %vm540_vm4, %v5317_v7, 0.0 }
 0x382   :  { %v5337_v9 = vadd.f32 %v5336_v24, %v5335_v3  ;;  %v5320_v62 = vmul.f32 %v5300_v47, %v5300_v47  ;;  %v5354_v63 = vsel %vm540_vm4, %v5318_v11, 0.0 }
 0x383   :  { %v5356_v41 = vsel %vm540_vm4, %v5319_v36, 0.0 }
 0x384   :  { %v5339_v54 = vadd.f32 %v5338_v35, %v5337_v9  ;;  %v5358_v19 = vsel %vm540_vm4, %v5320_v62, 0.0  ;;  %v17595_v35 = vld [vmem:[#allocation12_spill] sm:$0xff] }
 0x386   :  { %v5341_v48 = vadd.f32 %v5340_v40, %v5339_v54  ;;  %v17596_v54 = vld [vmem:[#allocation14_spill] sm:$0xff] }
 0x388   :  { %v5343_v38 = vadd.f32 %v5342_v51, %v5341_v48  ;;  %v5366_v48 = vld [vmem:[%s17471_s3] sm:$0x3f]  ;;  %v17597_v51 = vld [vmem:[#allocation11_spill] sm:$0xff] }
 0x38a   :  { %v5345_v25 = vadd.f32 %v5344_v23, %v5343_v38  ;;  %v17598_v38 = vld [vmem:[#allocation13_spill] sm:$0xff]  ;;  %v17599_v23 = vld [vmem:[#allocation10_spill] sm:$0xff] }
 0x38c   :  { %v5347_v13 = vadd.f32 %v5346_v15, %v5345_v25  ;;  %v1487_v25 = vadd.f32 %v17574_v31, %v17599_v23 }
 0x38e   :  { %v5349_v10 = vadd.f32 %v5348_v55, %v5347_v13 }
 0x390   :  { %v5351_v60 = vadd.f32 %v5350_v52, %v5349_v10 }
 0x392   :  { %v5353_v3 = vadd.f32 %v5352_v49, %v5351_v60 }
 0x394   :  { %v5355_v24 = vadd.f32 %v5354_v63, %v5353_v3 }
 0x396   :  { %v5357_v9 = vadd.f32 %v5356_v41, %v5355_v24 }
 0x398   :  { %v5359_v6 = vadd.f32 %v5358_v19, %v5357_v9 }
 0x39a   :  { %5360 = vadd.xlane.f32.xlu1 %v5359_v6 }
 0x3ab   :  { %5397 = vperm.xlu1 %12547, %v5394_v43  }
 0x3af   :  { %3254 = vrot.lane.b32.xlu1 %v17595_v35, %s12932_s17 }
 0x3b3   :  { %5086 = vrot.lane.b32.xlu1 %v17596_v54, %s12934_s19 }
 0x427   :  { %v5361_v21 = vpop.xlane.xlu1 %5360 }
 0x428   :  { %v5362_v20 = vmul.f32 0.000625, %v5361_v21 }
 0x42a   :  { %v5364_v40 = vadd.f32 1e-05, %v5362_v20 }
 0x42b   :  { %v14953_v57 = vpop.permute.xlu1 %5397 }
 0x42c   :  { %12870 = vrsqrt.f32 %v5364_v40 }
 0x42f   :  { %v3255_v32 = vpop.permute.xlu1 %3254 }
 0x430   :  { %v3277_v26 = vsel %vm3256_vm13, %v14690_v39, %v3255_v32 }
 0x436   :  { %v12871_v29 = vpop.eup %12870 }
 0x437   :  { %v5367_v4 = vmul.f32 %v12871_v29, %v5366_v48 }
 0x439   :  { %5370 = vperm.xlu0 %12546, %v5367_v4  }
 0x43d   :  { %2338 = vrot.lane.b32.xlu0 %v17597_v51, %s12931_s1 }
 0x441   :  { %4170 = vrot.lane.b32.xlu0 %v17598_v38, %s12933_s18 }
 0x4b8   :  { %v14959_v46 = vpop.permute.xlu0 %5370 }
 0x4b9   :  { %v5374_v15 = vmul.f32 %v14959_v46, %v14805_v56  ;;  %v5375_v13 = vmul.f32 %v14959_v46, %v14809_v58  ;;  %v5376_v59 = vmul.f32 %v14959_v46, %v14813_v8  ;;  %v5377_v7 = vmul.f32 %v14959_v46, %v14821_v44 }
 0x4ba   :  { %v5373_v31 = vmul.f32 %v14959_v46, %v14801_v61  ;;  %v5378_v39 = vmul.f32 %v14959_v46, %v14827_v28  ;;  %v5379_v55 = vmul.f32 %v14959_v46, %v14833_v30  ;;  %v5380_v56 = vmul.f32 %v14959_v46, %v14839_v17 }
 0x4bb   :  { %v14978_v58 = vadd.f32 %v14953_v57, %v5374_v15  ;;  %v14981_v8 = vadd.f32 %v14953_v57, %v5375_v13  ;;  %v14984_v44 = vadd.f32 %v14953_v57, %v5376_v59  ;;  %v14987_v61 = vadd.f32 %v14953_v57, %v5377_v7 }
 0x4bc   :  { %v2339_v10 = vpop.permute.xlu0 %2338  ;;  %v14990_v28 = vadd.f32 %v14953_v57, %v5373_v31  ;;  %v14993_v30 = vadd.f32 %v14953_v57, %v5378_v39  ;;  %v14996_v17 = vadd.f32 %v14953_v57, %v5379_v55  ;;  %v14999_v47 = vadd.f32 %v14953_v57, %v5380_v56 }
 0x4bd   :  { %v2361_v11 = vsel %vm2340_vm12, %v14638_v45, %v2339_v10  ;;  %v12548_v52 = vpack.i.bf16 %v14981_v8, %v14978_v58  ;;  %v12553_v60 = vpack.i.bf16 %v14987_v61, %v14984_v44  ;;  %v5381_v36 = vmul.f32 %v14959_v46, %v14847_v14  ;;  %v5087_v45 = vpop.permute.xlu1 %5086 }
 0x4be   :  { %v2403_v49 = vadd.f32 %v2361_v11, %v1487_v25  ;;  %v12558_v3 = vpack.i.bf16 %v14993_v30, %v14990_v28  ;;  %v12563_v62 = vpack.i.bf16 %v14999_v47, %v14996_v17  ;;  %v5382_v63 = vmul.f32 %v14959_v46, %v14854_v2 }
 0x4bf   :  { %12549 = vrot.lane.b32.xlu0 %v12548_v52, %s12925_s15  ;;  %12554 = vrot.lane.b32.xlu1 %v12553_v60, %s12925_s15  ;;  %v15018_v24 = vadd.f32 %v14953_v57, %v5381_v36  ;;  %v5383_v14 = vmul.f32 %v14959_v46, %v14861_v5  ;;  %v5384_v41 = vmul.f32 %v14959_v46, %v14868_v12 }
 0x4c0   :  { %v4171_v9 = vpop.permute.xlu0 %4170  ;;  %v3319_v19 = vadd.f32 %v3277_v26, %v2403_v49  ;;  %v15025_v6 = vadd.f32 %v14953_v57, %v5382_v63  ;;  %v5385_v2 = vmul.f32 %v14959_v46, %v14875_v18  ;;  %v5386_v43 = vmul.f32 %v14959_v46, %v14882_v34 }
 0x4c1   :  { %v4193_v35 = vsel %vm4172_vm14, %v14778_v42, %v4171_v9  ;;  %v15034_v54 = vadd.f32 %v14953_v57, %v5383_v14  ;;  %v15037_v5 = vadd.f32 %v14953_v57, %v5384_v41  ;;  %v5387_v12 = vmul.f32 %v14959_v46, %v14889_v27 }
 0x4c2   :  { %v5109_v21 = vsel %vm5088_vm15, %v14787_v22, %v5087_v45  ;;  %v4235_v20 = vadd.f32 %v4193_v35, %v3319_v19  ;;  %v12568_v18 = vpack.i.bf16 %v15025_v6, %v15018_v24  ;;  %v15048_v42 = vadd.f32 %v14953_v57, %v5385_v2 }
 0x4c3   :  { %12559 = vrot.lane.b32.xlu0 %v12558_v3, %s12925_s15  ;;  %12564 = vrot.lane.b32.xlu1 %v12563_v62, %s12925_s15  ;;  %v15051_v34 = vadd.f32 %v14953_v57, %v5386_v43  ;;  %v5388_v27 = vmul.f32 %v14959_v46, %v14896_v1  ;;  %v12573_v22 = vpack.i.bf16 %v15037_v5, %v15034_v54 }
 0x4c4   :  { %v5151_v40 = vadd.f32 %v5109_v21, %v4235_v20  ;;  %v15058_v48 = vadd.f32 %v14953_v57, %v5387_v12  ;;  %v5389_v29 = vmul.f32 %v14959_v46, %v14903_v50  ;;  %v5390_v51 = vmul.f32 %v14959_v46, %v14910_v37 }
 0x4c5   :  { %v15063_v4 = vadd.f32 %v14953_v57, %v5388_v27  ;;  %v5391_v38 = vmul.f32 %v14959_v46, %v14917_v33  ;;  %v5392_v1 = vmul.f32 %v14959_v46, %v14924_v53  ;;  %v12578_v50 = vpack.i.bf16 %v15051_v34, %v15048_v42 }
 0x4c6   :  { %v5363_v32 = vsub.f32 %v5151_v40, %v14797_v16  ;;  %v15077_v23 = vadd.f32 %v14953_v57, %v5389_v29  ;;  %v15082_v33 = vadd.f32 %v14953_v57, %v5390_v51 }
 0x4c7   :  { %12569 = vrot.lane.b32.xlu0 %v12568_v18, %s12925_s15  ;;  %12574 = vrot.lane.b32.xlu1 %v12573_v22, %s12925_s15  ;;  %v12583_v37 = vpack.i.bf16 %v15063_v4, %v15058_v48  ;;  %v15085_v53 = vadd.f32 %v14953_v57, %v5391_v38  ;;  %v15088_v25 = vadd.f32 %v14953_v57, %v5392_v1 }
 0x4c8   :  { %v5393_v16 = vmul.f32 %v14959_v46, %v5363_v32  ;;  %v12588_v26 = vpack.i.bf16 %v15082_v33, %v15077_v23 }
 0x4c9   :  { %v12593_v15 = vpack.i.bf16 %v15088_v25, %v15085_v53 }
 0x4ca   :  { %v5420_v13 = vadd.f32 %v14953_v57, %v5393_v16 }
 0x4cb   :  { %12579 = vrot.lane.b32.xlu0 %v12578_v50, %s12925_s15  ;;  %12584 = vrot.lane.b32.xlu1 %v12583_v37, %s12925_s15 }
 0x4cf   :  { %12589 = vrot.lane.b32.xlu0 %v12588_v26, %s12925_s15  ;;  %12594 = vrot.lane.b32.xlu1 %v12593_v15, %s12925_s15 }
 0x4d3   :  { %5482 = vrot.lane.b32.xlu0 %v5420_v13, %s12925_s15 }
 0x531   :  { %v12550_v59 = vpop.permute.xlu0 %12549  ;;  %v12555_v7 = vpop.permute.xlu1 %12554 }
 0x532   :  { %v12557_v31 = vunpack.i.h.bf16 %v12555_v7  ;;  %v12556_v39 = vunpack.i.l.bf16 %v12555_v7  ;;  %v12551_v55 = vunpack.i.l.bf16 %v12550_v59  ;;  %v12552_v19 = vunpack.i.h.bf16 %v12550_v59 }
 0x534   :  { %v5487_v10 = vsel %vm154_vm0, %v12556_v39, %v12557_v31  ;;  %v5485_v40 = vsel %vm154_vm0, %v12551_v55, %v12552_v19  ;;  %v5486_v22 = vsel %vm154_vm0, %v12552_v19, %v12556_v39 }
 0x535   :  { %v12560_v46 = vpop.permute.xlu0 %12559  ;;  %v12565_v56 = vpop.permute.xlu1 %12564  ;;  %v15104_v49 = vmax.f32 %v14984_v44, %v5487_v10  ;;  %v5527_v59 = vmax.f32 %v14981_v8, %v5486_v22 }
 0x536   :  { %v12561_v11 = vunpack.i.l.bf16 %v12560_v46  ;;  %v12567_v52 = vunpack.i.h.bf16 %v12565_v56  ;;  %v12566_v60 = vunpack.i.l.bf16 %v12565_v56 }
 0x538   :  { %v5484_v36 = vsel %vm154_vm0, %v12561_v11, %v12551_v55  ;;  %v5490_v63 = vsel %vm154_vm0, %v12566_v60, %v12567_v52 }
 0x539   :  { %v15107_v57 = vmax.f32 %v14990_v28, %v5484_v36  ;;  %v12570_v3 = vpop.permute.xlu0 %12569  ;;  %v12575_v62 = vpop.permute.xlu1 %12574  ;;  %v15114_v43 = vmax.f32 %v14996_v17, %v5490_v63 }
 0x53a   :  { %v12571_v45 = vunpack.i.l.bf16 %v12570_v3  ;;  %v12577_v14 = vunpack.i.h.bf16 %v12575_v62  ;;  %v12576_v41 = vunpack.i.l.bf16 %v12575_v62  ;;  %v12572_v11 = vunpack.i.h.bf16 %v12570_v3 }
 0x53b   :  { %v12603_v9 = vpack.i.bf16 %v15107_v57, %v15104_v49 }
 0x53c   :  { %v5491_v2 = vsel %vm154_vm0, %v12567_v52, %v12571_v45  ;;  %v5494_v12 = vsel %vm154_vm0, %v12576_v41, %v12577_v14 }
 0x53d   :  { %v15117_v44 = vmax.f32 %v14999_v47, %v5491_v2  ;;  %v12580_v28 = vpop.permute.xlu0 %12579  ;;  %v12585_v35 = vpop.permute.xlu1 %12584  ;;  %12604 = vrot.lane.b32.xlu0 %v12603_v9, %s12931_s1  ;;  %v12562_v47 = vunpack.i.h.bf16 %v12560_v46  ;;  %v15127_v29 = vmax.f32 %v15034_v54, %v5494_v12  ;;  %v5526_v54 = vmax.f32 %v14978_v58, %v5485_v40 }
 0x53e   :  { %v12581_v21 = vunpack.i.l.bf16 %v12580_v28  ;;  %v12587_v20 = vunpack.i.h.bf16 %v12585_v35  ;;  %v12586_v18 = vunpack.i.l.bf16 %v12585_v35  ;;  %v12582_v36 = vunpack.i.h.bf16 %v12580_v28 }
 0x53f   :  { %v12613_v27 = vpack.i.bf16 %v15117_v44, %v15114_v43  ;;  %v5488_v55 = vsel %vm154_vm0, %v12557_v31, %v12562_v47  ;;  %v5489_v58 = vsel %vm154_vm0, %v12562_v47, %v12566_v60  ;;  %v12598_v52 = vpack.i.bf16 %v5527_v59, %v5526_v54 }
 0x540   :  { %v5495_v17 = vsel %vm154_vm0, %v12577_v14, %v12581_v21  ;;  %v5498_v32 = vsel %vm154_vm0, %v12586_v18, %v12587_v20  ;;  %v5529_v31 = vmax.f32 %v14987_v61, %v5488_v55  ;;  %v5492_v60 = vsel %vm154_vm0, %v12571_v45, %v12572_v11 }
 0x541   :  { %v15130_v51 = vmax.f32 %v15037_v5, %v5495_v17  ;;  %v12590_v38 = vpop.permute.xlu0 %12589  ;;  %v12595_v1 = vpop.permute.xlu1 %12594  ;;  %12614 = vrot.lane.b32.xlu0 %v12613_v27, %s12931_s1  ;;  %v15140_v5 = vmax.f32 %v15058_v48, %v5498_v32  ;;  %v5496_v62 = vsel %vm154_vm0, %v12581_v21, %v12582_v36  ;;  %v5497_v63 = vsel %vm154_vm0, %v12582_v36, %v12586_v18 }
 0x542   :  { %v12591_v50 = vunpack.i.l.bf16 %v12590_v38  ;;  %v12597_v37 = vunpack.i.h.bf16 %v12595_v1  ;;  %v12596_v16 = vunpack.i.l.bf16 %v12595_v1  ;;  %v12592_v45 = vunpack.i.h.bf16 %v12590_v38 }
 0x543   :  { %v12623_v26 = vpack.i.bf16 %v15130_v51, %v15127_v29  ;;  %v15178_v14 = vmax.f32 %v15048_v42, %v5496_v62 }
 0x544   :  { %v5499_v15 = vsel %vm154_vm0, %v12587_v20, %v12591_v50  ;;  %v5502_v46 = vsel %vm154_vm0, %v12596_v16, %v12597_v37  ;;  %v5501_v9 = vsel %vm154_vm0, %v12592_v45, %v12596_v16 }
 0x545   :  { %v15143_v7 = vmax.f32 %v15063_v4, %v5499_v15  ;;  %v5483_v39 = vpop.permute.xlu0 %5482  ;;  %12624 = vrot.lane.b32.xlu0 %v12623_v26, %s12931_s1  ;;  %v15157_v4 = vmax.f32 %v15085_v53, %v5502_v46  ;;  %v15169_v53 = vmax.f32 %v15018_v24, %v5492_v60  ;;  %v15192_v2 = vmax.f32 %v15082_v33, %v5501_v9 }
 0x546   :  { %v5503_v56 = vsel %vm154_vm0, %v12597_v37, %v5483_v39  ;;  %v5545_v10 = vmax.f32 %v5420_v13, %v5483_v39  ;;  %v5530_v13 = vmax.f32 %v14993_v30, %v5489_v58 }
 0x547   :  { %v15151_v8 = vmax.f32 %v15088_v25, %v5503_v56  ;;  %v12633_v48 = vpack.i.bf16 %v15143_v7, %v15140_v5  ;;  %v5493_v25 = vsel %vm154_vm0, %v12572_v11, %v12576_v41  ;;  %v15181_v41 = vmax.f32 %v15051_v34, %v5497_v63 }
 0x548   :  { %5607 = vrot.lane.b32.xlu1 %v5545_v10, %s12931_s1  ;;  %v15172_v61 = vmax.f32 %v15025_v6, %v5493_v25  ;;  %v12608_v30 = vpack.i.bf16 %v5530_v13, %v5529_v31  ;;  %v5500_v6 = vsel %vm154_vm0, %v12591_v50, %v12592_v45 }
 0x549   :  { %12634 = vrot.lane.b32.xlu0 %v12633_v48, %s12931_s1  ;;  %v12643_v3 = vpack.i.bf16 %v15151_v8, %v15157_v4  ;;  %v15189_v19 = vmax.f32 %v15077_v23, %v5500_v6  ;;  %v12628_v42 = vpack.i.bf16 %v15181_v41, %v15178_v14 }
 0x54a   :  { %v12618_v24 = vpack.i.bf16 %v15172_v61, %v15169_v53 }
 0x54b   :  { %v12638_v34 = vpack.i.bf16 %v15192_v2, %v15189_v19 }
 0x54c   :  { %12599 = vrot.lane.b32.xlu1 %v12598_v52, %s12931_s1 }
 0x54d   :  { %12644 = vrot.lane.b32.xlu0 %v12643_v3, %s12931_s1 }
 0x550   :  { %12609 = vrot.lane.b32.xlu1 %v12608_v30, %s12931_s1 }
 0x554   :  { %12619 = vrot.lane.b32.xlu1 %v12618_v24, %s12931_s1 }
 0x558   :  { %12629 = vrot.lane.b32.xlu1 %v12628_v42, %s12931_s1 }
 0x55c   :  { %12639 = vrot.lane.b32.xlu1 %v12638_v34, %s12931_s1 }
 0x5af   :  { %v12605_v28 = vpop.permute.xlu0 %12604 }
 0x5b0   :  { %v12606_v21 = vunpack.i.l.bf16 %v12605_v28  ;;  %v12607_v33 = vunpack.i.h.bf16 %v12605_v28 }
 0x5b3   :  { %v12615_v23 = vpop.permute.xlu0 %12614 }
 0x5b4   :  { %v12616_v17 = vunpack.i.l.bf16 %v12615_v23  ;;  %v12617_v46 = vunpack.i.h.bf16 %v12615_v23 }
 0x5b6   :  { %v5615_v3 = vsel %vm2340_vm12, %v12616_v17, %v12617_v46 }
 0x5b7   :  { %v12625_v11 = vpop.permute.xlu0 %12624  ;;  %v15246_v9 = vmax.f32 %v15114_v43, %v5615_v3 }
 0x5b8   :  { %v12626_v30 = vunpack.i.l.bf16 %v12625_v11  ;;  %v12627_v42 = vunpack.i.h.bf16 %v12625_v11 }
 0x5ba   :  { %v15200_v35 = vpop.permute.xlu1 %5607 }
 0x5bb   :  { %v15209_v1 = vmax.f32 %v5545_v10, %v15200_v35 }
 0x5bd   :  { %17600 = vst [vmem:[#allocation21_spill] sm:$0xff] %v15209_v1  ;;  %v5712_v10 = vrot.slane %v15209_v1, 2 }
 0x5be   :  { %v12600_v12 = vpop.permute.xlu1 %12599 }
 0x5bf   :  { %v12602_v20 = vunpack.i.h.bf16 %v12600_v12  ;;  %v12601_v18 = vunpack.i.l.bf16 %v12600_v12  ;;  %v12635_v12 = vpop.permute.xlu0 %12634 }
 0x5c1   :  { %v5611_v27 = vsel %vm2340_vm12, %v12602_v20, %v12606_v21  ;;  %v5610_v40 = vsel %vm2340_vm12, %v12601_v18, %v12602_v20  ;;  %v5609_v32 = vsel %vm2340_vm12, %v12607_v33, %v12601_v18 }
 0x5c2   :  { %v15204_v22 = vmax.f32 %v5527_v59, %v5611_v27  ;;  %v15206_v47 = vmax.f32 %v5526_v54, %v5610_v40  ;;  %v12610_v38 = vpop.permute.xlu1 %12609  ;;  %v15218_v54 = vmax.f32 %v15107_v57, %v5609_v32  ;;  %v5619_v40 = vsel %vm2340_vm12, %v12626_v30, %v12627_v42 }
 0x5c3   :  { %v12612_v50 = vunpack.i.h.bf16 %v12610_v38  ;;  %v12611_v37 = vunpack.i.l.bf16 %v12610_v38 }
 0x5c4   :  { %v12648_v16 = vpack.i.bf16 %v15204_v22, %v15206_v47  ;;  %v5693_v58 = vrot.slane %v15206_v47, 2 }
 0x5c5   :  { %v5614_v26 = vsel %vm2340_vm12, %v12612_v50, %v12616_v17  ;;  %v5612_v15 = vsel %vm2340_vm12, %v12606_v21, %v12611_v37  ;;  %v5613_v59 = vsel %vm2340_vm12, %v12611_v37, %v12612_v50  ;;  %v12636_v17 = vunpack.i.l.bf16 %v12635_v12 }
 0x5c6   :  { %v15221_v39 = vmax.f32 %v15104_v49, %v5612_v15  ;;  %v12620_v55 = vpop.permute.xlu1 %12619  ;;  %12649 = vrot.lane.b32.xlu0 %v12648_v16, %s12927_s21  ;;  %v15226_v48 = vmax.f32 %v5530_v13, %v5614_v26  ;;  %v15228_v52 = vmax.f32 %v5529_v31, %v5613_v59  ;;  %v5694_v49 = vrot.slane %v15204_v22, 2 }
 0x5c7   :  { %v12621_v56 = vunpack.i.l.bf16 %v12620_v55  ;;  %v12622_v60 = vunpack.i.h.bf16 %v12620_v55  ;;  %v15275_v15 = vmax.f32 %v15127_v29, %v5619_v40  ;;  %v12637_v59 = vunpack.i.h.bf16 %v12635_v12 }
 0x5c8   :  { %v12653_v57 = vpack.i.bf16 %v15221_v39, %v15218_v54  ;;  %v12693_v31 = vpack.i.bf16 %v5694_v49, %v5693_v58  ;;  %v12658_v62 = vpack.i.bf16 %v15226_v48, %v15228_v52  ;;  %v5695_v63 = vrot.slane %v15221_v39, 2 }
 0x5c9   :  { %v5616_v25 = vsel %vm2340_vm12, %v12617_v46, %v12621_v56  ;;  %v5618_v45 = vsel %vm2340_vm12, %v12622_v60, %v12626_v30  ;;  %v5617_v24 = vsel %vm2340_vm12, %v12621_v56, %v12622_v60  ;;  %v5696_v34 = vrot.slane %v15228_v52, 2 }
 0x5ca   :  { %v12630_v36 = vpop.permute.xlu1 %12629  ;;  %5753 = vrot.lane.b32.xlu0 %v5712_v10, %s12925_s15  ;;  %12654 = vrot.lane.b32.xlu1 %v12653_v57, %s12927_s21  ;;  %v15238_v13 = vmax.f32 %v15117_v44, %v5616_v25  ;;  %v5692_v44 = vrot.slane %v15218_v54, 2  ;;  %v5697_v28 = vrot.slane %v15226_v48, 2  ;;  %v15254_v21 = vmax.f32 %v15172_v61, %v5618_v45 }
 0x5cb   :  { %v12631_v6 = vunpack.i.l.bf16 %v12630_v36  ;;  %v15257_v23 = vmax.f32 %v15169_v53, %v5617_v24  ;;  %v12632_v18 = vunpack.i.h.bf16 %v12630_v36  ;;  %v5901_v61 = vrot.slane %v15206_v47, 6 }
 0x5cc   :  { %v12663_v43 = vpack.i.bf16 %v15238_v13, %v15246_v9  ;;  %v12703_v20 = vpack.i.bf16 %v5695_v63, %v5692_v44  ;;  %v5902_v53 = vrot.slane %v15204_v22, 6  ;;  %v12713_v50 = vpack.i.bf16 %v5697_v28, %v5696_v34 }
 0x5cd   :  { %v5620_v33 = vsel %vm2340_vm12, %v12627_v42, %v12631_v6  ;;  %v12668_v32 = vpack.i.bf16 %v15254_v21, %v15257_v23  ;;  %v5622_v37 = vsel %vm2340_vm12, %v12632_v18, %v12636_v17  ;;  %v5621_v16 = vsel %vm2340_vm12, %v12631_v6, %v12632_v18 }
 0x5ce   :  { %12694 = vrot.lane.b32.xlu0 %v12693_v31, %s12925_s15  ;;  %12659 = vrot.lane.b32.xlu1 %v12658_v62, %s12927_s21  ;;  %v12640_v27 = vpop.permute.xlu1 %12639  ;;  %v15268_v38 = vmax.f32 %v15130_v51, %v5620_v33  ;;  %v12723_v55 = vpack.i.bf16 %v5902_v53, %v5901_v61  ;;  %v15279_v51 = vpop.permute.xlu0 %12644  ;;  %v15282_v46 = vmax.f32 %v15181_v41, %v5622_v37  ;;  %v5699_v29 = vrot.slane %v15238_v13, 2 }
 0x5cf   :  { %v12641_v26 = vunpack.i.l.bf16 %v12640_v27  ;;  %v15285_v56 = vmax.f32 %v15178_v14, %v5621_v16  ;;  %v12642_v58 = vunpack.i.h.bf16 %v12640_v27  ;;  %v5698_v57 = vrot.slane %v15246_v9, 2 }
 0x5d0   :  { %v12673_v10 = vpack.i.bf16 %v15268_v38, %v15275_v15  ;;  %v5623_v41 = vsel %vm2340_vm12, %v12636_v17, %v12637_v59  ;;  %v12646_v49 = vunpack.i.l.bf16 %v15279_v51  ;;  %v5904_v14 = vrot.slane %v15228_v52, 6 }
 0x5d1   :  { %v5624_v11 = vsel %vm2340_vm12, %v12637_v59, %v12641_v26  ;;  %v5905_v60 = vrot.slane %v15226_v48, 6  ;;  %v12678_v36 = vpack.i.bf16 %v15282_v46, %v15285_v56  ;;  %v12733_v3 = vpack.i.bf16 %v5699_v29, %v5698_v57 }
 0x5d2   :  { %12664 = vrot.lane.b32.xlu1 %v12663_v43, %s12927_s21  ;;  %12704 = vrot.lane.b32.xlu0 %v12703_v20, %s12925_s15  ;;  %v15299_v25 = vmax.f32 %v15143_v7, %v5624_v11  ;;  %v5626_v30 = vsel %vm2340_vm12, %v12642_v58, %v12646_v49  ;;  %v5625_v31 = vsel %vm2340_vm12, %v12641_v26, %v12642_v58  ;;  %v5700_v7 = vrot.slane %v15257_v23, 2 }
 0x5d3   :  { %v15308_v62 = vmax.f32 %v15140_v5, %v5623_v41  ;;  %v12743_v63 = vpack.i.bf16 %v5905_v60, %v5904_v14  ;;  %v15314_v45 = vmax.f32 %v15192_v2, %v5626_v30  ;;  %v15317_v24 = vmax.f32 %v15189_v19, %v5625_v31 }
 0x5d4   :  { %v5701_v44 = vrot.slane %v15254_v21, 2  ;;  %v5797_v5 = vrot.slane %v15206_v47, 4  ;;  %v5798_v2 = vrot.slane %v15204_v22, 4  ;;  %v5907_v19 = vrot.slane %v15238_v13, 6 }
 0x5d5   :  { %17601 = vst [vmem:[#allocation29_spill] sm:$0xff] %v15314_v45  ;;  %17602 = vst [vmem:[#allocation34_spill] sm:$0xff] %v15317_v24  ;;  %v12683_v6 = vpack.i.bf16 %v15299_v25, %v15308_v62  ;;  %v12688_v42 = vpack.i.bf16 %v15314_v45, %v15317_v24  ;;  %v5906_v28 = vrot.slane %v15246_v9, 6  ;;  %v5799_v12 = vrot.slane %v15221_v39, 4 }
 0x5d6   :  { %12669 = vrot.lane.b32.xlu1 %v12668_v32, %s12927_s21  ;;  %12714 = vrot.lane.b32.xlu0 %v12713_v50, %s12925_s15  ;;  %v12748_v34 = vpack.i.bf16 %v5701_v44, %v5700_v7  ;;  %v12698_v43 = vpack.i.bf16 %v5798_v2, %v5797_v5  ;;  %v5703_v18 = vrot.slane %v15268_v38, 2  ;;  %v5796_v33 = vrot.slane %v15218_v54, 4 }
 0x5d7   :  { %v12758_v20 = vpack.i.bf16 %v5907_v19, %v5906_v28  ;;  %v5702_v27 = vrot.slane %v15275_v15, 2  ;;  %v5800_v17 = vrot.slane %v15228_v52, 4  ;;  %v5801_v53 = vrot.slane %v15226_v48, 4 }
 0x5d8   :  { %v12708_v40 = vpack.i.bf16 %v5799_v12, %v5796_v33  ;;  %v5908_v32 = vrot.slane %v15257_v23, 6  ;;  %v5909_v50 = vrot.slane %v15254_v21, 6  ;;  %v5903_v37 = vrot.slane %v15221_v39, 6 }
 0x5d9   :  { %v12763_v61 = vpack.i.bf16 %v5703_v18, %v5702_v27  ;;  %v12718_v16 = vpack.i.bf16 %v5801_v53, %v5800_v17  ;;  %v5704_v59 = vrot.slane %v15285_v56, 2  ;;  %v5803_v11 = vrot.slane %v15238_v13, 4 }
 0x5da   :  { %12674 = vrot.lane.b32.xlu1 %v12673_v10, %s12927_s21  ;;  %12724 = vrot.lane.b32.xlu0 %v12723_v55, %s12924_s14  ;;  %v12773_v26 = vpack.i.bf16 %v5909_v50, %v5908_v32  ;;  %v5705_v55 = vrot.slane %v15282_v46, 2  ;;  %v5900_v10 = vrot.slane %v15218_v54, 6  ;;  %v5911_v57 = vrot.slane %v15268_v38, 6 }
 0x5db   :  { %v5802_v41 = vrot.slane %v15246_v9, 4  ;;  %v5910_v14 = vrot.slane %v15275_v15, 6  ;;  %v5804_v60 = vrot.slane %v15257_v23, 4  ;;  %v5805_v30 = vrot.slane %v15254_v21, 4 }
 0x5dc   :  { %v12728_v29 = vpack.i.bf16 %v5903_v37, %v5900_v10  ;;  %v12778_v58 = vpack.i.bf16 %v5705_v55, %v5704_v59  ;;  %v5707_v31 = vrot.slane %v15299_v25, 2  ;;  %v12647_v7 = vunpack.i.h.bf16 %v15279_v51 }
 0x5dd   :  { %v12753_v44 = vpack.i.bf16 %v5805_v30, %v5804_v60  ;;  %v5806_v2 = vrot.slane %v15275_v15, 4  ;;  %v5808_v12 = vrot.slane %v15285_v56, 4  ;;  %v5708_v33 = vrot.slane %v15317_v24, 2 }
 0x5de   :  { %12679 = vrot.lane.b32.xlu1 %v12678_v36, %s12927_s21  ;;  %12734 = vrot.lane.b32.xlu0 %v12733_v3, %s12925_s15  ;;  %v12738_v36 = vpack.i.bf16 %v5803_v11, %v5802_v41  ;;  %v12788_v3 = vpack.i.bf16 %v5911_v57, %v5910_v14  ;;  %v5628_v19 = vsel %vm2340_vm12, %v12647_v7, %v15200_v35  ;;  %v5709_v27 = vrot.slane %v15314_v45, 2 }
 0x5df   :  { %v5627_v28 = vsel %vm2340_vm12, %v12646_v49, %v12647_v7  ;;  %v15381_v35 = vmax.f32 %v15151_v8, %v5628_v19  ;;  %v5811_v17 = vrot.slane %v15299_v25, 4  ;;  %v5810_v53 = vrot.slane %v15308_v62, 4 }
 0x5e0   :  { %v15384_v51 = vmax.f32 %v15157_v4, %v5627_v28  ;;  %v5914_v32 = vrot.slane %v15308_v62, 6  ;;  %v5812_v8 = vrot.slane %v15317_v24, 4  ;;  %v5813_v50 = vrot.slane %v15314_v45, 4 }
 0x5e1   :  { %17603 = vst [vmem:[#allocation36_spill] sm:$0xff] %v15381_v35  ;;  %v12798_v4 = vpack.i.bf16 %v5811_v17, %v5810_v53  ;;  %v5917_v11 = vrot.slane %v15314_v45, 6  ;;  %v5919_v60 = vrot.slane %v15381_v35, 6  ;;  %v5920_v30 = vrot.slane %v15209_v1, 6 }
 0x5e2   :  { %12684 = vrot.lane.b32.xlu1 %v12683_v6, %s12927_s21  ;;  %12744 = vrot.lane.b32.xlu0 %v12743_v63, %s12924_s14  ;;  %v5706_v63 = vrot.slane %v15308_v62, 2  ;;  %v5807_v6 = vrot.slane %v15268_v38, 4  ;;  %17604 = vst [vmem:[#allocation22_spill] sm:$0xff] %v15384_v51  ;;  %v12813_v59 = vpack.i.bf16 %v5813_v50, %v5812_v8  ;;  %v5814_v55 = vrot.slane %v15384_v51, 4 }
 0x5e3   :  { %v5918_v14 = vrot.slane %v15384_v51, 6 }
 0x5e4   :  { %v12793_v5 = vpack.i.bf16 %v5707_v31, %v5706_v63  ;;  %v6130_v31 = vld [vmem:[%s17472_s6] sm:$0xff]  ;;  %v12843_v63 = vpack.i.bf16 %v15209_v1, %v15381_v35 }
 0x5e6   :  { %12689 = vrot.lane.b32.xlu1 %v12688_v42, %s12927_s21  ;;  %12749 = vrot.lane.b32.xlu0 %v12748_v34, %s12925_s15  ;;  %v5912_v42 = vrot.slane %v15285_v56, 6  ;;  %v5913_v34 = vrot.slane %v15282_v46, 6 }
 0x5e8   :  { %v12803_v18 = vpack.i.bf16 %v5913_v34, %v5912_v42 }
 0x5ea   :  { %12699 = vrot.lane.b32.xlu1 %v12698_v43, %s12926_s16  ;;  %12759 = vrot.lane.b32.xlu0 %v12758_v20, %s12924_s14  ;;  %v5809_v43 = vrot.slane %v15282_v46, 4  ;;  %v12768_v20 = vpack.i.bf16 %v5807_v6, %v5806_v2 }
 0x5ec   :  { %v12783_v49 = vpack.i.bf16 %v5809_v43, %v5808_v12 }
 0x5ee   :  { %12709 = vrot.lane.b32.xlu1 %v12708_v40, %s12926_s16  ;;  %12764 = vrot.lane.b32.xlu0 %v12763_v61, %s12925_s15  ;;  %v12808_v40 = vpack.i.bf16 %v5709_v27, %v5708_v33  ;;  %v5915_v61 = vrot.slane %v15299_v25, 6 }
 0x5f0   :  { %v12818_v37 = vpack.i.bf16 %v5915_v61, %v5914_v32 }
 0x5f2   :  { %12719 = vrot.lane.b32.xlu1 %v12718_v16, %s12926_s16  ;;  %12774 = vrot.lane.b32.xlu0 %v12773_v26, %s12924_s14  ;;  %v5710_v16 = vrot.slane %v15384_v51, 2  ;;  %v5711_v26 = vrot.slane %v15381_v35, 2 }
 0x5f4   :  { %v12823_v10 = vpack.i.bf16 %v5711_v26, %v5710_v16 }
 0x5f6   :  { %12729 = vrot.lane.b32.xlu1 %v12728_v29, %s12924_s14  ;;  %12779 = vrot.lane.b32.xlu0 %v12778_v58, %s12925_s15  ;;  %v5815_v29 = vrot.slane %v15381_v35, 4  ;;  %v5916_v58 = vrot.slane %v15317_v24, 6 }
 0x5f8   :  { %v12828_v57 = vpack.i.bf16 %v5815_v29, %v5814_v55  ;;  %v12833_v41 = vpack.i.bf16 %v5917_v11, %v5916_v58 }
 0x5fa   :  { %12739 = vrot.lane.b32.xlu1 %v12738_v36, %s12926_s16  ;;  %12789 = vrot.lane.b32.xlu0 %v12788_v3, %s12924_s14  ;;  %v5816_v36 = vrot.slane %v15209_v1, 4  ;;  %v12838_v3 = vpack.i.bf16 %v5919_v60, %v5918_v14 }
 0x5fe   :  { %12754 = vrot.lane.b32.xlu1 %v12753_v44, %s12926_s16  ;;  %12794 = vrot.lane.b32.xlu0 %v12793_v5, %s12925_s15 }
 0x602   :  { %12769 = vrot.lane.b32.xlu1 %v12768_v20, %s12926_s16  ;;  %12804 = vrot.lane.b32.xlu0 %v12803_v18, %s12924_s14 }
 0x606   :  { %12784 = vrot.lane.b32.xlu1 %v12783_v49, %s12926_s16  ;;  %12809 = vrot.lane.b32.xlu0 %v12808_v40, %s12925_s15 }
 0x60a   :  { %12799 = vrot.lane.b32.xlu1 %v12798_v4, %s12926_s16  ;;  %12819 = vrot.lane.b32.xlu0 %v12818_v37, %s12924_s14 }
 0x60e   :  { %12814 = vrot.lane.b32.xlu1 %v12813_v59, %s12926_s16  ;;  %12824 = vrot.lane.b32.xlu0 %v12823_v10, %s12925_s15 }
 0x612   :  { %12829 = vrot.lane.b32.xlu1 %v12828_v57, %s12926_s16  ;;  %12834 = vrot.lane.b32.xlu0 %v12833_v41, %s12924_s14 }
 0x616   :  { %5857 = vrot.lane.b32.xlu1 %v5816_v36, %s12926_s16  ;;  %12839 = vrot.lane.b32.xlu0 %v12838_v3, %s12924_s14 }
 0x61a   :  { %6040 = vrot.lane.b32.xlu1 %v15384_v51, %s12927_s21  ;;  %5961 = vrot.lane.b32.xlu0 %v5920_v30, %s12924_s14 }
 0x61e   :  { %12844 = vrot.lane.b32.xlu1 %v12843_v63, %s12927_s21  ;;  %6888 = vperm.xlu0 %12546, %v6130_v31  }
 0x638   :  { %v12650_v7 = vpop.permute.xlu0 %12649 }
 0x639   :  { %v12652_v49 = vunpack.i.h.bf16 %v12650_v7  ;;  %v12651_v40 = vunpack.i.l.bf16 %v12650_v7 }
 0x63b   :  { %v15437_v29 = vsel %vm473_vm6, %v12651_v40, %v12652_v49 }
 0x63c   :  { %v15421_v6 = vpop.permute.xlu0 %5753  ;;  %v12655_v44 = vpop.permute.xlu1 %12654 }
 0x63d   :  { %v12657_v17 = vunpack.i.h.bf16 %v12655_v44  ;;  %v12656_v61 = vunpack.i.l.bf16 %v12655_v44 }
 0x63f   :  { %v15440_v58 = vsel %vm473_vm6, %v12652_v49, %v12657_v17  ;;  %v15443_v11 = vsel %vm473_vm6, %v12656_v61, %v12651_v40 }
 0x640   :  { %v12695_v5 = vpop.permute.xlu0 %12694  ;;  %v12660_v42 = vpop.permute.xlu1 %12659 }
 0x641   :  { %v12697_v33 = vunpack.i.h.bf16 %v12695_v5  ;;  %v12696_v27 = vunpack.i.l.bf16 %v12695_v5  ;;  %v12661_v53 = vunpack.i.l.bf16 %v12660_v42  ;;  %v12662_v32 = vunpack.i.h.bf16 %v12660_v42 }
 0x643   :  { %v5756_v16 = vsel %vm154_vm0, %v12696_v27, %v12697_v33  ;;  %v15446_v57 = vsel %vm473_vm6, %v12657_v17, %v12661_v53  ;;  %v15451_v14 = vsel %vm473_vm6, %v12661_v53, %v12662_v32 }
 0x644   :  { %v12665_v34 = vpop.permute.xlu1 %12664  ;;  %v12705_v2 = vpop.permute.xlu0 %12704  ;;  %v6067_v41 = vsel %vm540_vm4, %v15206_v47, %v5756_v16 }
 0x645   :  { %v12667_v8 = vunpack.i.h.bf16 %v12665_v34  ;;  %v12666_v50 = vunpack.i.l.bf16 %v12665_v34  ;;  %v12707_v26 = vunpack.i.h.bf16 %v12705_v2  ;;  %v12706_v59 = vunpack.i.l.bf16 %v12705_v2 }
 0x647   :  { %v15454_v60 = vsel %vm473_vm6, %v12662_v32, %v12666_v50  ;;  %v15457_v36 = vsel %vm473_vm6, %v12666_v50, %v12667_v8  ;;  %v15464_v31 = vsel %vm154_vm0, %v12697_v33, %v12707_v26  ;;  %v5755_v63 = vsel %vm154_vm0, %v12706_v59, %v12696_v27 }
 0x648   :  { %v12670_v19 = vpop.permute.xlu1 %12669  ;;  %v12715_v28 = vpop.permute.xlu0 %12714  ;;  %v6066_v49 = vsel %vm540_vm4, %v15218_v54, %v5755_v63 }
 0x649   :  { %v12717_v55 = vunpack.i.h.bf16 %v12715_v28  ;;  %v12716_v10 = vunpack.i.l.bf16 %v12715_v28  ;;  %v12672_v47 = vunpack.i.h.bf16 %v12670_v19  ;;  %v12671_v7 = vunpack.i.l.bf16 %v12670_v19 }
 0x64a   :  { %v15482_v19 = vsel %vm540_vm4, %v15204_v22, %v15464_v31 }
 0x64b   :  { %v15468_v44 = vsel %vm154_vm0, %v12707_v26, %v12716_v10  ;;  %v15471_v5 = vsel %vm154_vm0, %v12716_v10, %v12717_v55  ;;  %v15491_v53 = vsel %vm473_vm6, %v12667_v8, %v12671_v7 }
 0x64c   :  { %v15423_v12 = vpop.permute.xlu1 %12674  ;;  %v15425_v43 = vpop.permute.xlu0 %12724  ;;  %v6069_v22 = vsel %vm540_vm4, %v15221_v39, %v15468_v44  ;;  %v15502_v54 = vsel %vm540_vm4, %v15228_v52, %v15471_v5 }
 0x64d   :  { %v12677_v42 = vunpack.i.h.bf16 %v15423_v12  ;;  %v12676_v34 = vunpack.i.l.bf16 %v15423_v12  ;;  %v17506_v2 = vunpack.i.h.bf16 %v15425_v43  ;;  %v17505_v28 = vunpack.i.l.bf16 %v15425_v43 }
 0x64e   :  { %v17616_v45 = vunpack.i.h.bf16 %v15425_v43 }
 0x64f   :  { %v15508_v8 = vsel %vm473_vm6, %v12676_v34, %v12677_v42  ;;  %v5964_v26 = vsel %vm374_vm1, %v17505_v28, %v17506_v2 }
 0x650   :  { %v15427_v20 = vpop.permute.xlu1 %12679  ;;  %v15429_v18 = vpop.permute.xlu0 %12734 }
 0x651   :  { %v12737_v33 = vunpack.i.h.bf16 %v15429_v18  ;;  %v12736_v27 = vunpack.i.l.bf16 %v15429_v18  ;;  %v12682_v40 = vunpack.i.h.bf16 %v15427_v20  ;;  %v12681_v12 = vunpack.i.l.bf16 %v15427_v20 }
 0x652   :  { %v15494_v18 = vsel %vm473_vm6, %v12671_v7, %v12672_v47  ;;  %v15505_v20 = vsel %vm473_vm6, %v12672_v47, %v12676_v34 }
 0x653   :  { %v15516_v59 = vsel %vm154_vm0, %v12717_v55, %v12736_v27  ;;  %v15519_v39 = vsel %vm154_vm0, %v12736_v27, %v12737_v33  ;;  %v15523_v10 = vsel %vm473_vm6, %v12677_v42, %v12681_v12  ;;  %v15526_v47 = vsel %vm473_vm6, %v12681_v12, %v12682_v40 }
 0x654   :  { %v15431_v4 = vpop.permute.xlu1 %12684  ;;  %v15433_v37 = vpop.permute.xlu0 %12744  ;;  %v15538_v42 = vsel %vm540_vm4, %v15226_v48, %v15516_v59  ;;  %v15543_v12 = vsel %vm540_vm4, %v15246_v9, %v15519_v39 }
 0x655   :  { %v12686_v7 = vunpack.i.l.bf16 %v15431_v4  ;;  %v12687_v55 = vunpack.i.h.bf16 %v15431_v4  ;;  %v12746_v1 = vunpack.i.l.bf16 %v15433_v37 }
 0x657   :  { %v15553_v48 = vsel %vm473_vm6, %v12682_v40, %v12686_v7  ;;  %v15563_v24 = vsel %vm473_vm6, %v12686_v7, %v12687_v55 }
 0x658   :  { %v15459_v3 = vpop.permute.xlu1 %12689  ;;  %v15461_v30 = vpop.permute.xlu0 %12749  ;;  %17607 = vst [vmem:[#allocation2_spill] sm:$0xff] %v15563_v24 }
 0x659   :  { %17605 = vst [vmem:[#allocation32_spill] sm:$0xff] %v15459_v3  ;;  %v12752_v9 = vunpack.i.h.bf16 %v15461_v30  ;;  %v17613_v7 = vunpack.i.l.bf16 %v15459_v3 }
 0x65c   :  { %v12700_v17 = vpop.permute.xlu1 %12699  ;;  %v15488_v61 = vpop.permute.xlu0 %12759 }
 0x65d   :  { %v12702_v32 = vunpack.i.h.bf16 %v12700_v17  ;;  %v12701_v50 = vunpack.i.l.bf16 %v12700_v17 }
 0x65f   :  { %v5860_v52 = vsel %vm264_vm3, %v12701_v50, %v12702_v32 }
 0x660   :  { %v6088_v34 = vsel %vm586_vm7, %v5756_v16, %v5860_v52  ;;  %v12710_v17 = vpop.permute.xlu1 %12709  ;;  %v15530_v28 = vpop.permute.xlu0 %12764 }
 0x661   :  { %v15533_v2 = vpack.c.bf16 %v6088_v34, %v6067_v41  ;;  %v12712_v27 = vunpack.i.h.bf16 %v12710_v17  ;;  %v12711_v0 = vunpack.i.l.bf16 %v12710_v17  ;;  %v12751_v41 = vunpack.i.l.bf16 %v15461_v30 }
 0x662   :  { %v6110_v34 = vsel %vm6108_vm8, %v5860_v52, %v5964_v26  ;;  %v12766_v40 = vunpack.i.l.bf16 %v15530_v28 }
 0x663   :  { %17606 = vst [vmem:[#allocation16_spill] sm:$0xff] %v15533_v2  ;;  %v5859_v17 = vsel %vm264_vm3, %v12711_v0, %v12701_v50  ;;  %11796 = vmatprep.subr.bf16.mxu1 %v15533_v2  ;;  %v5861_v51 = vsel %vm264_vm3, %v12702_v32, %v12712_v27  ;;  %v15580_v52 = vpack.c.bf16 %v15437_v29, %v6110_v34  ;;  %v12762_v34 = vunpack.i.h.bf16 %v15488_v61 }
 0x664   :  { %v6087_v16 = vsel %vm586_vm7, %v5755_v63, %v5859_v17  ;;  %v15558_v35 = vpop.permute.xlu1 %12719  ;;  %v15560_v4 = vpop.permute.xlu0 %12774  ;;  %v17611_v63 = vunpack.i.h.bf16 %v15433_v37  ;;  %v15589_v0 = vsel %vm154_vm0, %v12737_v33, %v12751_v41  ;;  %v6089_v2 = vsel %vm586_vm7, %v15464_v31, %v5861_v51 }
 0x665   :  { %v15565_v26 = vpack.c.bf16 %v6087_v16, %v6066_v49  ;;  %17612 = vst [vmem:[#allocation17_spill] sm:$0xff] %v15580_v52  ;;  %v12721_v49 = vunpack.i.l.bf16 %v15558_v35  ;;  %v15586_v16 = vsel %vm473_vm6, %v12687_v55, %v17613_v7  ;;  %v15596_v29 = vsel %vm154_vm0, %v12751_v41, %v12752_v9 }
 0x666   :  { %v5967_v32 = vsel %vm374_vm1, %v12746_v1, %v17611_v63  ;;  %17614 = vst [vmem:[#allocation3_spill] sm:$0xff] %v15586_v16  ;;  %v12722_v63 = vunpack.i.h.bf16 %v15558_v35  ;;  %v12761_v50 = vunpack.i.l.bf16 %v15488_v61  ;;  %v15607_v35 = vsel %vm154_vm0, %v12752_v9, %v12766_v40 }
 0x667   :  { %17608 = vst [vmem:[#allocation15_spill] sm:$0xff] %v15565_v26  ;;  %11798 = vmatpush1.bf16.msra.mxu1 %v15565_v26  ;;  %v5862_v55 = vsel %vm264_vm3, %v12712_v27, %v12721_v49  ;;  %v17615_v31 = vunpack.i.h.bf16 %v15530_v28  ;;  %v15617_v41 = vpack.c.bf16 %v6089_v2, %v15482_v19  ;;  %v12776_v24 = vunpack.i.l.bf16 %v15560_v4 }
 0x668   :  { %v12730_v7 = vpop.permute.xlu1 %12729  ;;  %v15601_v3 = vpop.permute.xlu0 %12779  ;;  %11801 = vmatprep.subr.msk.bf16.mxu1 %vm15571_vm10, %v15580_v52  ;;  %v6090_v61 = vsel %vm586_vm7, %v15468_v44, %v5862_v55  ;;  %v5863_v9 = vsel %vm264_vm3, %v12721_v49, %v12722_v63  ;;  %v17617_v44 = vunpack.i.l.bf16 %v15425_v43 }
 0x669   :  { %v15612_v33 = vsel %vm154_vm0, %v12766_v40, %v17615_v31  ;;  %v12732_v27 = vunpack.i.h.bf16 %v12730_v7  ;;  %v15619_v26 = vpack.c.bf16 %v6090_v61, %v6069_v22  ;;  %v12731_v16 = vunpack.i.l.bf16 %v12730_v7 }
 0x66a   :  { %v12782_v7 = vunpack.i.h.bf16 %v15601_v3  ;;  %v12781_v43 = vunpack.i.l.bf16 %v15601_v3 }
 0x66b   :  { %v5965_v40 = vsel %vm374_vm1, %v17616_v45, %v12732_v27  ;;  %v5966_v31 = vsel %vm374_vm1, %v12732_v27, %v12746_v1  ;;  %v5963_v2 = vsel %vm374_vm1, %v12731_v16, %v17617_v44  ;;  %11806 = vmatprep.subr.bf16.mxu0 %v15619_v26  ;;  %v15652_v16 = vsel %vm540_vm4, %v15257_v23, %v15596_v29 }
 0x66c   :  { %v6111_v19 = vsel %vm6108_vm8, %v5861_v51, %v5965_v40  ;;  %v6112_v22 = vsel %vm6108_vm8, %v5862_v55, %v5966_v31  ;;  %v12740_v49 = vpop.permute.xlu1 %12739  ;;  %v15635_v61 = vpop.permute.xlu0 %12789  ;;  %v6109_v52 = vsel %vm6108_vm8, %v5859_v17, %v5963_v2  ;;  %11808 = vmatpush1.bf16.msra.mxu0 %v15617_v41  ;;  %v6073_v51 = vsel %vm540_vm4, %v15238_v13, %v15589_v0 }
 0x66d   :  { %v15639_v45 = vpack.c.bf16 %v15446_v57, %v6112_v22  ;;  %v15642_v1 = vpack.c.bf16 %v15440_v58, %v6111_v19  ;;  %v15655_v17 = vpack.c.bf16 %v15443_v11, %v6109_v52  ;;  %v12742_v57 = vunpack.i.h.bf16 %v12740_v49 }
 0x66e   :  { %v17618_v58 = vunpack.i.h.bf16 %v15433_v37  ;;  %v5969_v27 = vsel %vm374_vm1, %v12761_v50, %v12762_v34  ;;  %v6091_v40 = vsel %vm586_vm7, %v15471_v5, %v5863_v9  ;;  %v12741_v31 = vunpack.i.l.bf16 %v12740_v49 }
 0x66f   :  { %11811 = vmatprep.subr.msk.bf16.mxu0 %vm15571_vm10, %v15639_v45  ;;  %v15669_v13 = vsel %vm540_vm4, %v15254_v21, %v15607_v35  ;;  %v15674_v23 = vsel %vm540_vm4, %v15275_v15, %v15612_v33  ;;  %v6113_v37 = vsel %vm6108_vm8, %v5863_v9, %v5967_v32  ;;  %v5970_v11 = vsel %vm374_vm1, %v12762_v34, %v12776_v24  ;;  %v15686_v21 = vld [vmem:[%s17473_s5] sm:$0xff] }
 0x670   :  { %v5968_v55 = vsel %vm374_vm1, %v17618_v58, %v12761_v50  ;;  %11804 = vmatpush1.bf16.msk.msra.mxu1 %vm15571_vm10, %v15655_v17  ;;  %v12755_v5 = vpop.permute.xlu1 %12754  ;;  %v15681_v50 = vpop.permute.xlu0 %12794  ;;  %v17619_v52 = vunpack.i.h.bf16 %v15560_v4  ;;  %v17620_v32 = vunpack.i.h.bf16 %v15530_v28  ;;  %v15699_v9 = vsel %vm154_vm0, %v12781_v43, %v12782_v7  ;;  %11814 = vmatpush1.bf16.msk.msra.mxu0 %vm15571_vm10, %v15642_v1 }
 0x671   :  { %v5864_v44 = vsel %vm264_vm3, %v12722_v63, %v12741_v31  ;;  %v15706_v2 = vpack.c.bf16 %v6091_v40, %v15502_v54  ;;  %v15713_v22 = vpack.c.bf16 %v15451_v14, %v6113_v37  ;;  %v17522_v63 = vunpack.i.h.bf16 %v15635_v61 }
 0x672   :  { %v5971_v15 = vsel %vm374_vm1, %v12776_v24, %v17619_v52  ;;  %v15694_v34 = vsel %vm154_vm0, %v17620_v32, %v12781_v43  ;;  %v5865_v24 = vsel %vm264_vm3, %v12741_v31, %v12742_v57  ;;  %v6092_v28 = vsel %vm586_vm7, %v15516_v59, %v5864_v44 }
 0x673   :  { %v6114_v19 = vsel %vm6108_vm8, %v5864_v44, %v5968_v55  ;;  %v15716_v49 = vpack.c.bf16 %v6092_v28, %v15538_v42  ;;  %v12791_v43 = vunpack.i.l.bf16 %v15635_v61  ;;  %11235 = vmatmul.mubr.msk.f32.vlgmr.msra.gmra.mrb[54].mxu1 %vm6132_vm9, %v15686_v21  ;;  %v15725_v54 = vsel %vm540_vm4, %v15268_v38, %v15694_v34  ;;  %11238 = vmatmul.mubr.msk.f32.vlgmr.msra.gmra.mrb[56].mxu0 %vm6132_vm9, %v15686_v21 }
 0x674   :  { %v15730_v14 = vsel %vm540_vm4, %v15285_v56, %v15699_v9  ;;  %v12757_v59 = vunpack.i.h.bf16 %v12755_v5  ;;  %v12756_v42 = vunpack.i.l.bf16 %v12755_v5  ;;  %v12770_v58 = vpop.permute.xlu1 %12769  ;;  %v15734_v55 = vpop.permute.xlu0 %12804  ;;  %v17621_v40 = vmov 0.0  }
 0x675   :  { %6382 = vmatprep.mubr.f32.mxu1 %v17621_v40  ;;  %v6093_v31 = vsel %vm586_vm7, %v15519_v39, %v5865_v24  ;;  %v6115_v38 = vsel %vm6108_vm8, %v5865_v24, %v5969_v27  ;;  %v15741_v37 = vpack.c.bf16 %v15454_v60, %v6114_v19  ;;  %11816 = vmatprep.subr.bf16.mxu1 %v15716_v49  ;;  %v12771_v56 = vunpack.i.l.bf16 %v12770_v58 }
 0x676   :  { %6453 = vmatprep.mubr.f32.mxu0 %v17621_v40  ;;  %v5866_v5 = vsel %vm264_vm3, %v12742_v57, %v12756_v42  ;;  %v5867_v52 = vsel %vm264_vm3, %v12756_v42, %v12757_v59  ;;  %v12796_v32 = vunpack.i.l.bf16 %v15681_v50  ;;  %v12772_v44 = vunpack.i.h.bf16 %v12770_v58  ;;  %11818 = vmatpush1.bf16.msra.mxu1 %v15706_v2 }
 0x677   :  { %v17622_v39 = vunpack.i.h.bf16 %v15560_v4  ;;  %v5973_v60 = vsel %vm374_vm1, %v12791_v43, %v17522_v63  ;;  %v6094_v24 = vsel %vm586_vm7, %v15589_v0, %v5866_v5  ;;  %v12797_v57 = vunpack.i.h.bf16 %v15681_v50  ;;  %11821 = vmatprep.subr.msk.bf16.mxu1 %vm15571_vm10, %v15741_v37 }
 0x678   :  { %v15762_v28 = vpack.c.bf16 %v6093_v31, %v15543_v12  ;;  %v6095_v4 = vsel %vm586_vm7, %v15596_v29, %v5867_v52  ;;  %v6116_v19 = vsel %vm6108_vm8, %v5866_v5, %v5970_v11  ;;  %v15767_v42 = vpack.c.bf16 %v6094_v24, %v6073_v51  ;;  %v15769_v58 = vpop.permute.xlu0 %12809 }
 0x679   :  { %v5972_v27 = vsel %vm374_vm1, %v17622_v39, %v12791_v43  ;;  %v12785_v43 = vpop.permute.xlu1 %12784  ;;  %v15772_v0 = vpack.c.bf16 %v15457_v36, %v6115_v38  ;;  %v6117_v39 = vsel %vm6108_vm8, %v5867_v52, %v5971_v15  ;;  %v5868_v63 = vsel %vm264_vm3, %v12757_v59, %v12771_v56 }
 0x67a   :  { %v12807_v12 = vunpack.i.h.bf16 %v15734_v55  ;;  %v5768_v29 = vsel %vm154_vm0, %v12782_v7, %v12796_v32  ;;  %v5869_v11 = vsel %vm264_vm3, %v12771_v56, %v12772_v44  ;;  %v6096_v51 = vsel %vm586_vm7, %v15607_v35, %v5868_v63  ;;  %11826 = vmatprep.subr.bf16.mxu0 %v15767_v42  ;;  %11824 = vmatpush1.bf16.msk.msra.mxu1 %vm15571_vm10, %v15713_v22 }
 0x67b   :  { %v12806_v31 = vunpack.i.l.bf16 %v15734_v55  ;;  %v15786_v36 = vpack.c.bf16 %v15491_v53, %v6116_v19  ;;  %v15789_v15 = vpack.c.bf16 %v6095_v4, %v15652_v16  ;;  %v5769_v3 = vsel %vm154_vm0, %v12796_v32, %v12797_v57  ;;  %11828 = vmatpush1.bf16.msra.mxu0 %v15762_v28 }
 0x67c   :  { %v15795_v7 = vpack.c.bf16 %v6096_v51, %v15669_v13  ;;  %v15801_v35 = vpack.c.bf16 %v15494_v18, %v6117_v39  ;;  %v6118_v53 = vsel %vm6108_vm8, %v5868_v63, %v5972_v27  ;;  %v12787_v59 = vunpack.i.h.bf16 %v12785_v43  ;;  %v15805_v38 = vpop.permute.xlu0 %12819 }
 0x67d   :  { %v12786_v55 = vunpack.i.l.bf16 %v12785_v43  ;;  %v12800_v16 = vpop.permute.xlu1 %12799  ;;  %v6079_v13 = vsel %vm540_vm4, %v15282_v46, %v5768_v29  ;;  %v6097_v56 = vsel %vm586_vm7, %v15612_v33, %v5869_v11  ;;  %11831 = vmatprep.subr.msk.bf16.mxu0 %vm15571_vm10, %v15786_v36  ;;  %v6080_v5 = vsel %vm540_vm4, %v15308_v62, %v5769_v3  ;;  %11241 = vmatmul.mubr.msk.f32.vlgmr.msra.gmra.mrb[56].mxu1 %vm6132_vm9, %v15686_v21 }
 0x67e   :  { %11836 = vmatprep.subr.bf16.mxu1 %v15795_v7  ;;  %v12802_v18 = vunpack.i.h.bf16 %v12800_v16  ;;  %v12801_v63 = vunpack.i.l.bf16 %v12800_v16  ;;  %v6119_v52 = vsel %vm6108_vm8, %v5869_v11, %v5973_v60  ;;  %v15823_v33 = vpack.c.bf16 %v15505_v20, %v6118_v53  ;;  %6524 = vmatprep.mubr.f32.mxu1 %v17621_v40 }
 0x67f   :  { %v5870_v32 = vsel %vm264_vm3, %v12772_v44, %v12786_v55  ;;  %v5871_v46 = vsel %vm264_vm3, %v12786_v55, %v12787_v59  ;;  %v17623_v27 = vunpack.i.h.bf16 %v15635_v61  ;;  %v12821_v62 = vunpack.i.l.bf16 %v15805_v38  ;;  %11838 = vmatpush1.bf16.msra.mxu1 %v15789_v15  ;;  %11834 = vmatpush1.bf16.msk.msra.mxu0 %vm15571_vm10, %v15772_v0 }
 0x680   :  { %v6098_v4 = vsel %vm586_vm7, %v15694_v34, %v5870_v32  ;;  %v15833_v44 = vpack.c.bf16 %v6097_v56, %v15674_v23  ;;  %v12811_v20 = vunpack.i.l.bf16 %v15769_v58  ;;  %v15843_v34 = vpop.permute.xlu0 %12824  ;;  %v15846_v43 = vpack.c.bf16 %v15508_v8, %v6119_v52  ;;  %11841 = vmatprep.subr.msk.bf16.mxu1 %vm15571_vm10, %v15823_v33 }
 0x681   :  { %v5974_v24 = vsel %vm374_vm1, %v17623_v27, %v12806_v31  ;;  %v15837_v19 = vpack.c.bf16 %v6098_v4, %v15725_v54  ;;  %v12815_v61 = vpop.permute.xlu1 %12814  ;;  %v6099_v23 = vsel %vm586_vm7, %v15699_v9, %v5871_v46  ;;  %v5872_v39 = vsel %vm264_vm3, %v12787_v59, %v12801_v63 }
 0x682   :  { %v6120_v60 = vsel %vm6108_vm8, %v5870_v32, %v5974_v24  ;;  %v5873_v54 = vsel %vm264_vm3, %v12801_v63, %v12802_v18  ;;  %v5975_v11 = vsel %vm374_vm1, %v12806_v31, %v12807_v12  ;;  %v12812_v51 = vunpack.i.h.bf16 %v15769_v58  ;;  %11244 = vmatmul.mubr.msk.f32.vlgmr.msra.gmra.mrb[58].mxu0 %vm6132_vm9, %v15686_v21 }
 0x683   :  { %v6100_v53 = vsel %vm586_vm7, %v5768_v29, %v5872_v39  ;;  %v12822_v8 = vunpack.i.h.bf16 %v15805_v38  ;;  %11846 = vmatprep.subr.bf16.mxu0 %v15837_v19  ;;  %v6121_v9 = vsel %vm6108_vm8, %v5871_v46, %v5975_v11  ;;  %v15862_v59 = vpack.c.bf16 %v15523_v10, %v6120_v60  ;;  %11844 = vmatpush1.bf16.msk.msra.mxu1 %vm15571_vm10, %v15801_v35 }
 0x684   :  { %v15864_v55 = vpack.c.bf16 %v6100_v53, %v6079_v13  ;;  %v5976_v16 = vsel %vm374_vm1, %v12807_v12, %v12821_v62  ;;  %v15870_v58 = vpack.c.bf16 %v6099_v23, %v15730_v14  ;;  %v5770_v29 = vsel %vm154_vm0, %v12797_v57, %v12811_v20  ;;  %11848 = vmatpush1.bf16.msra.mxu0 %v15833_v44  ;;  %v15880_v12 = vpop.permute.xlu0 %12834  ;;  %v17625_v53 = vld [vmem:[#allocation34_spill] sm:$0xff] }
 0x685   :  { %v6101_v31 = vsel %vm586_vm7, %v5769_v3, %v5873_v54  ;;  %v12816_v38 = vunpack.i.l.bf16 %v12815_v61  ;;  %v12830_v10 = vpop.permute.xlu1 %12829  ;;  %v6122_v13 = vsel %vm6108_vm8, %v5872_v39, %v5976_v16  ;;  %v12817_v14 = vunpack.i.h.bf16 %v12815_v61  ;;  %11851 = vmatprep.subr.msk.bf16.mxu0 %vm15571_vm10, %v15862_v59  ;;  %6595 = vmatprep.mubr.f32.mxu0 %v17621_v40 }
 0x686   :  { %v12827_v56 = vunpack.i.h.bf16 %v15843_v34  ;;  %v12826_v50 = vunpack.i.l.bf16 %v15843_v34  ;;  %v15890_v57 = vpack.c.bf16 %v15526_v47, %v6121_v9  ;;  %v5771_v3 = vsel %vm154_vm0, %v12811_v20, %v12812_v51  ;;  %11856 = vmatprep.subr.bf16.mxu1 %v15864_v55  ;;  %11247 = vmatmul.mubr.msk.f32.vlgmr.msra.gmra.mrb[58].mxu1 %vm6132_vm9, %v15686_v21  ;;  %v17624_v34 = vld [vmem:[#allocation29_spill] sm:$0xff] }
 0x687   :  { %v5874_v63 = vsel %vm264_vm3, %v12802_v18, %v12816_v38  ;;  %v12831_v52 = vunpack.i.l.bf16 %v12830_v10  ;;  %v6081_v32 = vsel %vm540_vm4, %v15299_v25, %v5770_v29  ;;  %v15898_v46 = vpack.c.bf16 %v6101_v31, %v6080_v5  ;;  %11858 = vmatpush1.bf16.msra.mxu1 %v15870_v58  ;;  %6666 = vmatprep.mubr.f32.mxu1 %v17621_v40 }
 0x688   :  { %v6102_v27 = vsel %vm586_vm7, %v5770_v29, %v5874_v63  ;;  %v5772_v24 = vsel %vm154_vm0, %v12812_v51, %v12826_v50  ;;  %v5977_v47 = vsel %vm374_vm1, %v12821_v62, %v12822_v8  ;;  %v15906_v18 = vpack.c.bf16 %v15553_v48, %v6122_v13  ;;  %11854 = vmatpush1.bf16.msk.msra.mxu0 %vm15571_vm10, %v15846_v43  ;;  %v12840_v5 = vpop.permute.xlu0 %12839 }
 0x689   :  { %v15908_v4 = vpack.c.bf16 %v6102_v27, %v6081_v32  ;;  %v12832_v60 = vunpack.i.h.bf16 %v12830_v10  ;;  %v15913_v25 = vpop.permute.xlu1 %5857  ;;  %v5875_v20 = vsel %vm264_vm3, %v12816_v38, %v12817_v14  ;;  %v5774_v61 = vsel %vm154_vm0, %v12827_v56, %v15421_v6  ;;  %v17626_v27 = vld [vmem:[#allocation36_spill] sm:$0xff] }
 0x68a   :  { %v5876_v62 = vsel %vm264_vm3, %v12817_v14, %v12831_v52  ;;  %v12837_v48 = vunpack.i.h.bf16 %v15880_v12  ;;  %v6083_v23 = vsel %vm540_vm4, %v17624_v34, %v5772_v24  ;;  %v12836_v11 = vunpack.i.l.bf16 %v15880_v12  ;;  %11861 = vmatprep.subr.msk.bf16.mxu1 %vm15571_vm10, %v15906_v18  ;;  %v17629_v34 = vld [vmem:[#allocation22_spill] sm:$0xff] }
 0x68b   :  { %v6104_v39 = vsel %vm586_vm7, %v5772_v24, %v5876_v62  ;;  %11866 = vmatprep.subr.bf16.mxu0 %v15908_v4  ;;  %v5878_v51 = vsel %vm264_vm3, %v12832_v60, %v15913_v25  ;;  %v6082_v9 = vsel %vm540_vm4, %v17625_v53, %v5771_v3  ;;  %v6123_v16 = vsel %vm6108_vm8, %v5873_v54, %v5977_v47 }
 0x68c   :  { %v15935_v29 = vpack.c.bf16 %v6104_v39, %v6083_v23  ;;  %11250 = vmatmul.mubr.msk.f32.vlgmr.msra.gmra.mrb[60].mxu0 %vm6132_vm9, %v15686_v21  ;;  %v6106_v31 = vsel %vm586_vm7, %v5774_v61, %v5878_v51  ;;  %v6103_v38 = vsel %vm586_vm7, %v5771_v3, %v5875_v20  ;;  %v5773_v10 = vsel %vm154_vm0, %v12826_v50, %v12827_v56  ;;  %v15952_v56 = vpop.permute.xlu0 %5961  ;;  %v17628_v3 = vld [vmem:[#allocation3_spill] sm:$0xff] }
 0x68d   :  { %v5877_v12 = vsel %vm264_vm3, %v12831_v52, %v12832_v60  ;;  %v5978_v13 = vsel %vm374_vm1, %v12822_v8, %v12836_v11  ;;  %11868 = vmatpush1.bf16.msra.mxu0 %v15898_v46  ;;  %v6041_v14 = vpop.permute.xlu1 %6040  ;;  %v5979_v54 = vsel %vm374_vm1, %v12836_v11, %v12837_v48  ;;  %v6085_v24 = vsel %vm540_vm4, %v17626_v27, %v5774_v61  ;;  %v17627_v8 = vld [vmem:[#allocation2_spill] sm:$0xff]  ;;  %v17630_v11 = vld [vmem:[#allocation32_spill] sm:$0xff] }
 0x68e   :  { %v6124_v32 = vsel %vm6108_vm8, %v5874_v63, %v5978_v13  ;;  %v12842_v47 = vunpack.i.h.bf16 %v12840_v5  ;;  %11864 = vmatpush1.bf16.msk.msra.mxu1 %vm15571_vm10, %v15890_v57  ;;  %6737 = vmatprep.mubr.f32.mxu0 %v17621_v40  ;;  %v15956_v50 = vpack.c.bf16 %v17627_v8, %v6123_v16  ;;  %v15961_v60 = vpack.c.bf16 %v6106_v31, %v6085_v24 }
 0x68f   :  { %v15959_v52 = vpack.c.bf16 %v17628_v3, %v6124_v32  ;;  %v12841_v63 = vunpack.i.l.bf16 %v12840_v5  ;;  %11876 = vmatprep.subr.bf16.mxu1 %v15935_v29  ;;  %v15964_v61 = vpack.c.bf16 %v6103_v38, %v6082_v9  ;;  %v6084_v23 = vsel %vm540_vm4, %v17629_v34, %v5773_v10 }
 0x690   :  { %v6105_v39 = vsel %vm586_vm7, %v5773_v10, %v5877_v12  ;;  %v17631_v53 = vunpack.i.h.bf16 %v17630_v11  ;;  %v6125_v13 = vsel %vm6108_vm8, %v5875_v20, %v5979_v54  ;;  %v5982_v9 = vsel %vm374_vm1, %v12842_v47, %v15952_v56 }
 0x691   :  { %11253 = vmatmul.mubr.msk.f32.vlgmr.msra.gmra.mrb[60].mxu1 %vm6132_vm9, %v15686_v21  ;;  %11871 = vmatprep.subr.msk.bf16.mxu0 %vm15571_vm10, %v15959_v52  ;;  %v5980_v5 = vsel %vm374_vm1, %v12837_v48, %v12841_v63  ;;  %v15981_v31 = vpop.permute.xlu1 %12844  ;;  %v5981_v38 = vsel %vm374_vm1, %v12841_v63, %v12842_v47  ;;  %v17633_v32 = vunpack.i.l.bf16 %v17630_v11  ;;  %v15996_v24 = vpack.c.bf16 %v6105_v39, %v6084_v23  ;;  %v16048_v11 = vld [vmem:[%s17473_s5 + $0x8] sm:$0xff] }
 0x692   :  { %v6063_v16 = vsel %vm473_vm6, %v17631_v53, %v6041_v14  ;;  %v6126_v10 = vsel %vm6108_vm8, %v5876_v62, %v5980_v5  ;;  %11874 = vmatpush1.bf16.msk.msra.mxu0 %vm15571_vm10, %v15956_v50  ;;  %11878 = vmatpush1.bf16.msra.mxu1 %v15964_v61  ;;  %v12847_v20 = vunpack.i.h.bf16 %v15981_v31  ;;  %v12846_v54 = vunpack.i.l.bf16 %v15981_v31  ;;  %v16438_v31 = vld [vmem:[%s17473_s5 + $0x20] sm:$0xff] }
 0x693   :  { %v17632_v48 = vmov %v17631_v53  ;;  %v15998_v47 = vpack.c.bf16 %v6063_v16, %v6126_v10  ;;  %11886 = vmatprep.subr.bf16.mxu0 %v15961_v60  ;;  %6808 = vmatprep.mubr.f32.mxu1 %v17621_v40  ;;  %v6128_v8 = vsel %vm6108_vm8, %v5878_v51, %v5982_v9  ;;  %v6127_v34 = vsel %vm6108_vm8, %v5877_v12, %v5981_v38  ;;  %v17634_v51 = vld [vmem:[#allocation16_spill] sm:$0xff]  ;;  %v17635_v12 = vld [vmem:[#allocation15_spill] sm:$0xff]  ;;  %v17637_v53 = vld [vmem:[#allocation21_spill] sm:$0xff] }
 0x694   :  { %v6062_v27 = vsel %vm473_vm6, %v17633_v32, %v17632_v48  ;;  %v6064_v3 = vsel %vm473_vm6, %v6041_v14, %v12846_v54  ;;  %v6065_v63 = vsel %vm473_vm6, %v12846_v54, %v12847_v20  ;;  %v17636_v14 = vld [vmem:[#allocation17_spill] sm:$0xff]  ;;  %v6086_v16 = vsel %vm540_vm4, %v17637_v53, %v15421_v6 }
 0x695   :  { %v16002_v62 = vpack.c.bf16 %v6062_v27, %v6125_v13  ;;  %11256 = vmatmul.mubr.msk.f32.vlgmr.msra.gmra.mrb[62].mxu0 %vm6132_vm9, %v15686_v21  ;;  %v16012_v23 = vpack.c.bf16 %v6065_v63, %v6128_v8  ;;  %11881 = vmatprep.subr.msk.bf16.mxu1 %vm15571_vm10, %v15998_v47  ;;  %v16017_v39 = vpack.c.bf16 %v6064_v3, %v6127_v34  ;;  %v12935_v13 = vmov 0.0|0.0  }
 0x696   :  { %11888 = vmatpush1.bf16.msra.mxu0 %v15996_v24  ;;  %6879 = vmatprep.mubr.f32.mxu0 %v17621_v40  ;;  %vm12936_vm0 = vmmov 0   ;;  %vm10916_vm1 = vcmask 7168   ;;  %vm11058_vm3 = vcmask 11264  }
 0x697   :  { %11884 = vmatpush1.bf16.msk.msra.mxu1 %vm15571_vm10, %v16002_v62  ;;  %11891 = vmatprep.subr.msk.bf16.mxu0 %vm15571_vm10, %v16012_v23 }
 0x698   :  { %11896 = vmatprep.subr.bf16.mxu1 %v17634_v51 }
 0x69a   :  { %11259 = vmatmul.mubr.msk.f32.vlgmr.msra.gmra.mrb[62].mxu1 %vm6132_vm9, %v15686_v21  ;;  %11894 = vmatpush1.bf16.msk.msra.mxu0 %vm15571_vm10, %v16017_v39 }
 0x69b   :  { %11898 = vmatpush1.bf16.msra.mxu1 %v17635_v12  ;;  %11906 = vmatprep.subr.bf16.mxu0 %v15619_v26 }
 0x69c   :  { %11901 = vmatprep.subr.msk.bf16.mxu1 %vm15571_vm10, %v17636_v14  ;;  %6982 = vmatprep.mubr.f32.mxu1 %v17621_v40 }
 0x69d   :  { %11262 = vmatmul.mubr.msk.f32.vlgmr.msra.gmra.mrb[64].mxu0 %vm6132_vm9, %v15686_v21  ;;  %v6107_v21 = vsel %vm586_vm7, %v15421_v6, %v15913_v25  ;;  %v6129_v6 = vsel %vm6108_vm8, %v15913_v25, %v15952_v56  ;;  %v16188_v25 = vld [vmem:[%s17473_s5 + $0x10] sm:$0xff]  ;;  %v16313_v56 = vld [vmem:[%s17473_s5 + $0x18] sm:$0xff] }
 0x69e   :  { %11908 = vmatpush1.bf16.msra.mxu0 %v15617_v41  ;;  %7053 = vmatprep.mubr.f32.mxu0 %v17621_v40  ;;  %v16148_v5 = vpack.c.bf16 %v6107_v21, %v6086_v16  ;;  %v16164_v9 = vpack.c.bf16 %v12847_v20, %v6129_v6 }
 0x69f   :  { %11904 = vmatpush1.bf16.msk.msra.mxu1 %vm15571_vm10, %v15655_v17  ;;  %11911 = vmatprep.subr.msk.bf16.mxu0 %vm15571_vm10, %v15639_v45 }
 0x6a0   :  { %11916 = vmatprep.subr.bf16.mxu1 %v15716_v49 }
 0x6a2   :  { %11266 = vmatmul.mubr.msk.f32.vlgmr.msra.gmra.mrb[64].mxu1 %vm6132_vm9, %v16048_v11  ;;  %11914 = vmatpush1.bf16.msk.msra.mxu0 %vm15571_vm10, %v15642_v1 }
 0x6a3   :  { %11918 = vmatpush1.bf16.msra.mxu1 %v15706_v2  ;;  %11926 = vmatprep.subr.bf16.mxu0 %v15767_v42 }
 0x6a4   :  { %11921 = vmatprep.subr.msk.bf16.mxu1 %vm15571_vm10, %v15741_v37  ;;  %7124 = vmatprep.mubr.f32.mxu1 %v17621_v40 }
 0x6a5   :  { %11269 = vmatmul.mubr.msk.f32.vlgmr.msra.gmra.mrb[66].mxu0 %vm6132_vm9, %v16048_v11 }
 0x6a6   :  { %11928 = vmatpush1.bf16.msra.mxu0 %v15762_v28  ;;  %7195 = vmatprep.mubr.f32.mxu0 %v17621_v40 }
 0x6a7   :  { %11924 = vmatpush1.bf16.msk.msra.mxu1 %vm15571_vm10, %v15713_v22  ;;  %11931 = vmatprep.subr.msk.bf16.mxu0 %vm15571_vm10, %v15786_v36 }
 0x6a8   :  { %11936 = vmatprep.subr.bf16.mxu1 %v15795_v7 }
 0x6aa   :  { %11272 = vmatmul.mubr.msk.f32.vlgmr.msra.gmra.mrb[66].mxu1 %vm6132_vm9, %v16048_v11  ;;  %11934 = vmatpush1.bf16.msk.msra.mxu0 %vm15571_vm10, %v15772_v0 }
 0x6ab   :  { %11938 = vmatpush1.bf16.msra.mxu1 %v15789_v15  ;;  %11946 = vmatprep.subr.bf16.mxu0 %v15837_v19 }
 0x6ac   :  { %11941 = vmatprep.subr.msk.bf16.mxu1 %vm15571_vm10, %v15823_v33  ;;  %7266 = vmatprep.mubr.f32.mxu1 %v17621_v40 }
 0x6ad   :  { %11275 = vmatmul.mubr.msk.f32.vlgmr.msra.gmra.mrb[68].mxu0 %vm6132_vm9, %v16048_v11 }
 0x6ae   :  { %11948 = vmatpush1.bf16.msra.mxu0 %v15833_v44  ;;  %7337 = vmatprep.mubr.f32.mxu0 %v17621_v40 }
 0x6af   :  { %11944 = vmatpush1.bf16.msk.msra.mxu1 %vm15571_vm10, %v15801_v35  ;;  %11951 = vmatprep.subr.msk.bf16.mxu0 %vm15571_vm10, %v15862_v59 }
 0x6b0   :  { %11956 = vmatprep.subr.bf16.mxu1 %v15864_v55 }
 0x6b2   :  { %11278 = vmatmul.mubr.msk.f32.vlgmr.msra.gmra.mrb[68].mxu1 %vm6132_vm9, %v16048_v11  ;;  %11954 = vmatpush1.bf16.msk.msra.mxu0 %vm15571_vm10, %v15846_v43 }
 0x6b3   :  { %11958 = vmatpush1.bf16.msra.mxu1 %v15870_v58  ;;  %11966 = vmatprep.subr.bf16.mxu0 %v15908_v4 }
 0x6b4   :  { %11961 = vmatprep.subr.msk.bf16.mxu1 %vm15571_vm10, %v15906_v18  ;;  %7408 = vmatprep.mubr.f32.mxu1 %v17621_v40 }
 0x6b5   :  { %11281 = vmatmul.mubr.msk.f32.vlgmr.msra.gmra.mrb[70].mxu0 %vm6132_vm9, %v16048_v11 }
 0x6b6   :  { %11968 = vmatpush1.bf16.msra.mxu0 %v15898_v46  ;;  %7479 = vmatprep.mubr.f32.mxu0 %v17621_v40 }
 0x6b7   :  { %11964 = vmatpush1.bf16.msk.msra.mxu1 %vm15571_vm10, %v15890_v57  ;;  %11971 = vmatprep.subr.msk.bf16.mxu0 %vm15571_vm10, %v15959_v52 }
 0x6b8   :  { %11976 = vmatprep.subr.bf16.mxu1 %v15935_v29 }
 0x6ba   :  { %11284 = vmatmul.mubr.msk.f32.vlgmr.msra.gmra.mrb[70].mxu1 %vm6132_vm9, %v16048_v11  ;;  %11974 = vmatpush1.bf16.msk.msra.mxu0 %vm15571_vm10, %v15956_v50 }
 0x6bb   :  { %11978 = vmatpush1.bf16.msra.mxu1 %v15964_v61  ;;  %11986 = vmatprep.subr.bf16.mxu0 %v15961_v60 }
 0x6bc   :  { %11981 = vmatprep.subr.msk.bf16.mxu1 %vm15571_vm10, %v15998_v47  ;;  %7550 = vmatprep.mubr.f32.mxu1 %v17621_v40 }
 0x6bd   :  { %11287 = vmatmul.mubr.msk.f32.vlgmr.msra.gmra.mrb[72].mxu0 %vm6132_vm9, %v16048_v11 }
 0x6be   :  { %11988 = vmatpush1.bf16.msra.mxu0 %v15996_v24  ;;  %7621 = vmatprep.mubr.f32.mxu0 %v17621_v40 }
 0x6bf   :  { %11984 = vmatpush1.bf16.msk.msra.mxu1 %vm15571_vm10, %v16002_v62  ;;  %11991 = vmatprep.subr.msk.bf16.mxu0 %vm15571_vm10, %v16012_v23 }
 0x6c0   :  { %11995 = vmatprep.subr.bf16.mxu1 %v12935_v13 }
 0x6c2   :  { %11290 = vmatmul.mubr.msk.f32.vlgmr.msra.gmra.mrb[72].mxu1 %vm6132_vm9, %v16048_v11  ;;  %11994 = vmatpush1.bf16.msk.msra.mxu0 %vm15571_vm10, %v16017_v39 }
 0x6c3   :  { %11997 = vmatpush3.bf16.msra.mxu1 %v16148_v5  ;;  %12003 = vmatprep.subr.bf16.mxu0 %v17634_v51 }
 0x6c4   :  { %11998 = vmatprep.subr.bf16.mxu1 %v12935_v13  ;;  %11429 = vmatprep.mubr.msk.f32.mxu1 %vm12936_vm0, %v17621_v40 }
 0x6c5   :  { %11293 = vmatmul.mubr.msk.f32.vlgmr.msra.gmra.mrb[74].mxu0 %vm6132_vm9, %v16048_v11 }
 0x6c6   :  { %12005 = vmatpush1.bf16.msra.mxu0 %v17635_v12  ;;  %7890 = vmatprep.mubr.f32.mxu0 %v17621_v40 }
 0x6c7   :  { %12001 = vmatpush3.bf16.msk.msra.mxu1 %vm15571_vm10, %v16164_v9  ;;  %12008 = vmatprep.subr.msk.bf16.mxu0 %vm15571_vm10, %v17636_v14 }
 0x6c8   :  { %12013 = vmatprep.subr.bf16.mxu1 %v15619_v26 }
 0x6ca   :  { %11430 = vmatmul.mubr.msk.f32.vlgmr.msra.gmra.mrb[74].mxu1 %vm6132_vm9, %v16048_v11  ;;  %12011 = vmatpush1.bf16.msk.msra.mxu0 %vm15571_vm10, %v15655_v17 }
 0x6cb   :  { %12015 = vmatpush1.bf16.msra.mxu1 %v15617_v41  ;;  %12023 = vmatprep.subr.bf16.mxu0 %v15716_v49 }
 0x6cc   :  { %12018 = vmatprep.subr.msk.bf16.mxu1 %vm15571_vm10, %v15639_v45  ;;  %7961 = vmatprep.mubr.f32.mxu1 %v17621_v40 }
 0x6cd   :  { %11299 = vmatmul.mubr.msk.f32.vlgmr.msra.gmra.mrb[76].mxu0 %vm6132_vm9, %v16188_v25 }
 0x6ce   :  { %12025 = vmatpush1.bf16.msra.mxu0 %v15706_v2  ;;  %8032 = vmatprep.mubr.f32.mxu0 %v17621_v40 }
 0x6cf   :  { %12021 = vmatpush1.bf16.msk.msra.mxu1 %vm15571_vm10, %v15642_v1  ;;  %12028 = vmatprep.subr.msk.bf16.mxu0 %vm15571_vm10, %v15741_v37 }
 0x6d0   :  { %12033 = vmatprep.subr.bf16.mxu1 %v15767_v42 }
 0x6d2   :  { %11302 = vmatmul.mubr.msk.f32.vlgmr.msra.gmra.mrb[76].mxu1 %vm6132_vm9, %v16188_v25  ;;  %12031 = vmatpush1.bf16.msk.msra.mxu0 %vm15571_vm10, %v15713_v22 }
 0x6d3   :  { %12035 = vmatpush1.bf16.msra.mxu1 %v15762_v28  ;;  %12043 = vmatprep.subr.bf16.mxu0 %v15795_v7 }
 0x6d4   :  { %12038 = vmatprep.subr.msk.bf16.mxu1 %vm15571_vm10, %v15786_v36  ;;  %8103 = vmatprep.mubr.f32.mxu1 %v17621_v40 }
 0x6d5   :  { %11305 = vmatmul.mubr.msk.f32.vlgmr.msra.gmra.mrb[78].mxu0 %vm6132_vm9, %v16188_v25 }
 0x6d6   :  { %12045 = vmatpush1.bf16.msra.mxu0 %v15789_v15  ;;  %8174 = vmatprep.mubr.f32.mxu0 %v17621_v40 }
 0x6d7   :  { %12041 = vmatpush1.bf16.msk.msra.mxu1 %vm15571_vm10, %v15772_v0  ;;  %12048 = vmatprep.subr.msk.bf16.mxu0 %vm15571_vm10, %v15823_v33 }
 0x6d8   :  { %12053 = vmatprep.subr.bf16.mxu1 %v15837_v19 }
 0x6da   :  { %11308 = vmatmul.mubr.msk.f32.vlgmr.msra.gmra.mrb[78].mxu1 %vm6132_vm9, %v16188_v25  ;;  %12051 = vmatpush1.bf16.msk.msra.mxu0 %vm15571_vm10, %v15801_v35 }
 0x6db   :  { %12055 = vmatpush1.bf16.msra.mxu1 %v15833_v44  ;;  %12063 = vmatprep.subr.bf16.mxu0 %v15864_v55 }
 0x6dc   :  { %12058 = vmatprep.subr.msk.bf16.mxu1 %vm15571_vm10, %v15862_v59  ;;  %8245 = vmatprep.mubr.f32.mxu1 %v17621_v40 }
 0x6dd   :  { %11311 = vmatmul.mubr.msk.f32.vlgmr.msra.gmra.mrb[80].mxu0 %vm6132_vm9, %v16188_v25 }
 0x6de   :  { %12065 = vmatpush1.bf16.msra.mxu0 %v15870_v58  ;;  %8316 = vmatprep.mubr.f32.mxu0 %v17621_v40 }
 0x6df   :  { %12061 = vmatpush1.bf16.msk.msra.mxu1 %vm15571_vm10, %v15846_v43  ;;  %12068 = vmatprep.subr.msk.bf16.mxu0 %vm15571_vm10, %v15906_v18 }
 0x6e0   :  { %12073 = vmatprep.subr.bf16.mxu1 %v15908_v4 }
 0x6e2   :  { %11314 = vmatmul.mubr.msk.f32.vlgmr.msra.gmra.mrb[80].mxu1 %vm6132_vm9, %v16188_v25  ;;  %12071 = vmatpush1.bf16.msk.msra.mxu0 %vm15571_vm10, %v15890_v57 }
 0x6e3   :  { %12075 = vmatpush1.bf16.msra.mxu1 %v15898_v46  ;;  %12083 = vmatprep.subr.bf16.mxu0 %v15935_v29 }
 0x6e4   :  { %12078 = vmatprep.subr.msk.bf16.mxu1 %vm15571_vm10, %v15959_v52  ;;  %8387 = vmatprep.mubr.f32.mxu1 %v17621_v40 }
 0x6e5   :  { %11317 = vmatmul.mubr.msk.f32.vlgmr.msra.gmra.mrb[82].mxu0 %vm6132_vm9, %v16188_v25 }
 0x6e6   :  { %12085 = vmatpush1.bf16.msra.mxu0 %v15964_v61  ;;  %8458 = vmatprep.mubr.f32.mxu0 %v17621_v40 }
 0x6e7   :  { %12081 = vmatpush1.bf16.msk.msra.mxu1 %vm15571_vm10, %v15956_v50  ;;  %12088 = vmatprep.subr.msk.bf16.mxu0 %vm15571_vm10, %v15998_v47 }
 0x6e8   :  { %12093 = vmatprep.subr.bf16.mxu1 %v15961_v60 }
 0x6ea   :  { %11320 = vmatmul.mubr.msk.f32.vlgmr.msra.gmra.mrb[82].mxu1 %vm6132_vm9, %v16188_v25  ;;  %12091 = vmatpush1.bf16.msk.msra.mxu0 %vm15571_vm10, %v16002_v62 }
 0x6eb   :  { %12095 = vmatpush1.bf16.msra.mxu1 %v15996_v24  ;;  %12102 = vmatprep.subr.bf16.mxu0 %v12935_v13 }
 0x6ec   :  { %12098 = vmatprep.subr.msk.bf16.mxu1 %vm15571_vm10, %v16012_v23  ;;  %8529 = vmatprep.mubr.f32.mxu1 %v17621_v40 }
 0x6ed   :  { %11323 = vmatmul.mubr.msk.f32.vlgmr.msra.gmra.mrb[84].mxu0 %vm6132_vm9, %v16188_v25 }
 0x6ee   :  { %12104 = vmatpush3.bf16.msra.mxu0 %v16148_v5  ;;  %11440 = vmatprep.mubr.msk.f32.mxu0 %vm12936_vm0, %v17621_v40 }
 0x6ef   :  { %12101 = vmatpush1.bf16.msk.msra.mxu1 %vm15571_vm10, %v16017_v39  ;;  %12105 = vmatprep.subr.bf16.mxu0 %v12935_v13 }
 0x6f0   :  { %12110 = vmatprep.subr.bf16.mxu1 %v17634_v51 }
 0x6f2   :  { %11326 = vmatmul.mubr.msk.f32.vlgmr.msra.gmra.mrb[84].mxu1 %vm6132_vm9, %v16188_v25  ;;  %12108 = vmatpush3.bf16.msk.msra.mxu0 %vm15571_vm10, %v16164_v9 }
 0x6f3   :  { %12112 = vmatpush1.bf16.msra.mxu1 %v17635_v12  ;;  %12120 = vmatprep.subr.bf16.mxu0 %v15619_v26 }
 0x6f4   :  { %12115 = vmatprep.subr.msk.bf16.mxu1 %vm15571_vm10, %v17636_v14  ;;  %8798 = vmatprep.mubr.f32.mxu1 %v17621_v40 }
 0x6f5   :  { %11441 = vmatmul.mubr.msk.f32.vlgmr.msra.gmra.mrb[86].mxu0 %vm6132_vm9, %v16188_v25 }
 0x6f6   :  { %12122 = vmatpush1.bf16.msra.mxu0 %v15617_v41  ;;  %8869 = vmatprep.mubr.f32.mxu0 %v17621_v40 }
 0x6f7   :  { %12118 = vmatpush1.bf16.msk.msra.mxu1 %vm15571_vm10, %v15655_v17  ;;  %12125 = vmatprep.subr.msk.bf16.mxu0 %vm15571_vm10, %v15639_v45 }
 0x6f8   :  { %12130 = vmatprep.subr.bf16.mxu1 %v15716_v49 }
 0x6fa   :  { %11332 = vmatmul.mubr.msk.f32.vlgmr.msra.gmra.mrb[86].mxu1 %vm6132_vm9, %v16313_v56  ;;  %12128 = vmatpush1.bf16.msk.msra.mxu0 %vm15571_vm10, %v15642_v1 }
 0x6fb   :  { %12132 = vmatpush1.bf16.msra.mxu1 %v15706_v2  ;;  %12140 = vmatprep.subr.bf16.mxu0 %v15767_v42 }
 0x6fc   :  { %12135 = vmatprep.subr.msk.bf16.mxu1 %vm15571_vm10, %v15741_v37  ;;  %8940 = vmatprep.mubr.f32.mxu1 %v17621_v40 }
 0x6fd   :  { %11335 = vmatmul.mubr.msk.f32.vlgmr.msra.gmra.mrb[88].mxu0 %vm6132_vm9, %v16313_v56 }
 0x6fe   :  { %12142 = vmatpush1.bf16.msra.mxu0 %v15762_v28  ;;  %9011 = vmatprep.mubr.f32.mxu0 %v17621_v40 }
 0x6ff   :  { %12138 = vmatpush1.bf16.msk.msra.mxu1 %vm15571_vm10, %v15713_v22  ;;  %12145 = vmatprep.subr.msk.bf16.mxu0 %vm15571_vm10, %v15786_v36 }
 0x700   :  { %12150 = vmatprep.subr.bf16.mxu1 %v15795_v7 }
 0x702   :  { %11338 = vmatmul.mubr.msk.f32.vlgmr.msra.gmra.mrb[88].mxu1 %vm6132_vm9, %v16313_v56  ;;  %12148 = vmatpush1.bf16.msk.msra.mxu0 %vm15571_vm10, %v15772_v0 }
 0x703   :  { %12152 = vmatpush1.bf16.msra.mxu1 %v15789_v15  ;;  %12160 = vmatprep.subr.bf16.mxu0 %v15837_v19 }
 0x704   :  { %12155 = vmatprep.subr.msk.bf16.mxu1 %vm15571_vm10, %v15823_v33  ;;  %9082 = vmatprep.mubr.f32.mxu1 %v17621_v40 }
 0x705   :  { %11341 = vmatmul.mubr.msk.f32.vlgmr.msra.gmra.mrb[90].mxu0 %vm6132_vm9, %v16313_v56 }
 0x706   :  { %12162 = vmatpush1.bf16.msra.mxu0 %v15833_v44  ;;  %9153 = vmatprep.mubr.f32.mxu0 %v17621_v40 }
 0x707   :  { %12158 = vmatpush1.bf16.msk.msra.mxu1 %vm15571_vm10, %v15801_v35  ;;  %12165 = vmatprep.subr.msk.bf16.mxu0 %vm15571_vm10, %v15862_v59 }
 0x708   :  { %12170 = vmatprep.subr.bf16.mxu1 %v15864_v55 }
 0x70a   :  { %11344 = vmatmul.mubr.msk.f32.vlgmr.msra.gmra.mrb[90].mxu1 %vm6132_vm9, %v16313_v56  ;;  %12168 = vmatpush1.bf16.msk.msra.mxu0 %vm15571_vm10, %v15846_v43 }
 0x70b   :  { %12172 = vmatpush1.bf16.msra.mxu1 %v15870_v58  ;;  %12180 = vmatprep.subr.bf16.mxu0 %v15908_v4 }
 0x70c   :  { %12175 = vmatprep.subr.msk.bf16.mxu1 %vm15571_vm10, %v15906_v18  ;;  %9224 = vmatprep.mubr.f32.mxu1 %v17621_v40 }
 0x70d   :  { %11347 = vmatmul.mubr.msk.f32.vlgmr.msra.gmra.mrb[92].mxu0 %vm6132_vm9, %v16313_v56 }
 0x70e   :  { %12182 = vmatpush1.bf16.msra.mxu0 %v15898_v46  ;;  %9295 = vmatprep.mubr.f32.mxu0 %v17621_v40 }
 0x70f   :  { %12178 = vmatpush1.bf16.msk.msra.mxu1 %vm15571_vm10, %v15890_v57  ;;  %12185 = vmatprep.subr.msk.bf16.mxu0 %vm15571_vm10, %v15959_v52 }
 0x710   :  { %12190 = vmatprep.subr.bf16.mxu1 %v15935_v29 }
 0x712   :  { %11350 = vmatmul.mubr.msk.f32.vlgmr.msra.gmra.mrb[92].mxu1 %vm6132_vm9, %v16313_v56  ;;  %12188 = vmatpush1.bf16.msk.msra.mxu0 %vm15571_vm10, %v15956_v50 }
 0x713   :  { %12192 = vmatpush1.bf16.msra.mxu1 %v15964_v61  ;;  %12200 = vmatprep.subr.bf16.mxu0 %v15961_v60 }
 0x714   :  { %12195 = vmatprep.subr.msk.bf16.mxu1 %vm15571_vm10, %v15998_v47  ;;  %9366 = vmatprep.mubr.f32.mxu1 %v17621_v40 }
 0x715   :  { %11353 = vmatmul.mubr.msk.f32.vlgmr.msra.gmra.mrb[94].mxu0 %vm6132_vm9, %v16313_v56 }
 0x716   :  { %12202 = vmatpush1.bf16.msra.mxu0 %v15996_v24  ;;  %9437 = vmatprep.mubr.f32.mxu0 %v17621_v40 }
 0x717   :  { %12198 = vmatpush1.bf16.msk.msra.mxu1 %vm15571_vm10, %v16002_v62  ;;  %12205 = vmatprep.subr.msk.bf16.mxu0 %vm15571_vm10, %v16012_v23 }
 0x718   :  { %12209 = vmatprep.subr.bf16.mxu1 %v12935_v13 }
 0x71a   :  { %11356 = vmatmul.mubr.msk.f32.vlgmr.msra.gmra.mrb[94].mxu1 %vm6132_vm9, %v16313_v56  ;;  %12208 = vmatpush1.bf16.msk.msra.mxu0 %vm15571_vm10, %v16017_v39 }
 0x71b   :  { %12211 = vmatpush3.bf16.msra.mxu1 %v16148_v5  ;;  %12217 = vmatprep.subr.bf16.mxu0 %v17634_v51 }
 0x71c   :  { %12212 = vmatprep.subr.bf16.mxu1 %v12935_v13  ;;  %11451 = vmatprep.mubr.msk.f32.mxu1 %vm12936_vm0, %v17621_v40 }
 0x71d   :  { %11359 = vmatmul.mubr.msk.f32.vlgmr.msra.gmra.mrb[96].mxu0 %vm6132_vm9, %v16313_v56 }
 0x71e   :  { %12219 = vmatpush1.bf16.msra.mxu0 %v17635_v12  ;;  %9706 = vmatprep.mubr.f32.mxu0 %v17621_v40 }
 0x71f   :  { %12215 = vmatpush3.bf16.msk.msra.mxu1 %vm15571_vm10, %v16164_v9  ;;  %12222 = vmatprep.subr.msk.bf16.mxu0 %vm15571_vm10, %v17636_v14 }
 0x720   :  { %12227 = vmatprep.subr.bf16.mxu1 %v15619_v26 }
 0x722   :  { %11452 = vmatmul.mubr.msk.f32.vlgmr.msra.gmra.mrb[96].mxu1 %vm6132_vm9, %v16313_v56  ;;  %12225 = vmatpush1.bf16.msk.msra.mxu0 %vm15571_vm10, %v15655_v17 }
 0x723   :  { %12229 = vmatpush1.bf16.msra.mxu1 %v15617_v41  ;;  %12237 = vmatprep.subr.bf16.mxu0 %v15716_v49 }
 0x724   :  { %12232 = vmatprep.subr.msk.bf16.mxu1 %vm15571_vm10, %v15639_v45  ;;  %9777 = vmatprep.mubr.f32.mxu1 %v17621_v40 }
 0x725   :  { %11365 = vmatmul.mubr.msk.f32.vlgmr.msra.gmra.mrb[98].mxu0 %vm6132_vm9, %v16438_v31 }
 0x726   :  { %12239 = vmatpush1.bf16.msra.mxu0 %v15706_v2  ;;  %9848 = vmatprep.mubr.f32.mxu0 %v17621_v40 }
 0x727   :  { %12235 = vmatpush1.bf16.msk.msra.mxu1 %vm15571_vm10, %v15642_v1  ;;  %12242 = vmatprep.subr.msk.bf16.mxu0 %vm15571_vm10, %v15741_v37 }
 0x728   :  { %12247 = vmatprep.subr.bf16.mxu1 %v15767_v42 }
 0x72a   :  { %11368 = vmatmul.mubr.msk.f32.vlgmr.msra.gmra.mrb[98].mxu1 %vm6132_vm9, %v16438_v31  ;;  %12245 = vmatpush1.bf16.msk.msra.mxu0 %vm15571_vm10, %v15713_v22 }
 0x72b   :  { %12249 = vmatpush1.bf16.msra.mxu1 %v15762_v28  ;;  %12257 = vmatprep.subr.bf16.mxu0 %v15795_v7 }
 0x72c   :  { %12252 = vmatprep.subr.msk.bf16.mxu1 %vm15571_vm10, %v15786_v36  ;;  %9919 = vmatprep.mubr.f32.mxu1 %v17621_v40 }
 0x72d   :  { %11371 = vmatmul.mubr.msk.f32.vlgmr.msra.gmra.mrb[100].mxu0 %vm6132_vm9, %v16438_v31 }
 0x72e   :  { %12259 = vmatpush1.bf16.msra.mxu0 %v15789_v15  ;;  %9990 = vmatprep.mubr.f32.mxu0 %v17621_v40 }
 0x72f   :  { %12255 = vmatpush1.bf16.msk.msra.mxu1 %vm15571_vm10, %v15772_v0  ;;  %12262 = vmatprep.subr.msk.bf16.mxu0 %vm15571_vm10, %v15823_v33 }
 0x730   :  { %12267 = vmatprep.subr.bf16.mxu1 %v15837_v19 }
 0x732   :  { %11374 = vmatmul.mubr.msk.f32.vlgmr.msra.gmra.mrb[100].mxu1 %vm6132_vm9, %v16438_v31  ;;  %12265 = vmatpush1.bf16.msk.msra.mxu0 %vm15571_vm10, %v15801_v35 }
 0x733   :  { %12269 = vmatpush1.bf16.msra.mxu1 %v15833_v44  ;;  %12277 = vmatprep.subr.bf16.mxu0 %v15864_v55 }
 0x734   :  { %12272 = vmatprep.subr.msk.bf16.mxu1 %vm15571_vm10, %v15862_v59  ;;  %10061 = vmatprep.mubr.f32.mxu1 %v17621_v40 }
 0x735   :  { %11377 = vmatmul.mubr.msk.f32.vlgmr.msra.gmra.mrb[102].mxu0 %vm6132_vm9, %v16438_v31 }
 0x736   :  { %12279 = vmatpush1.bf16.msra.mxu0 %v15870_v58  ;;  %10132 = vmatprep.mubr.f32.mxu0 %v17621_v40 }
 0x737   :  { %12275 = vmatpush1.bf16.msk.msra.mxu1 %vm15571_vm10, %v15846_v43  ;;  %12282 = vmatprep.subr.msk.bf16.mxu0 %vm15571_vm10, %v15906_v18 }
 0x738   :  { %12287 = vmatprep.subr.bf16.mxu1 %v15908_v4 }
 0x73a   :  { %11380 = vmatmul.mubr.msk.f32.vlgmr.msra.gmra.mrb[102].mxu1 %vm6132_vm9, %v16438_v31  ;;  %12285 = vmatpush1.bf16.msk.msra.mxu0 %vm15571_vm10, %v15890_v57 }
 0x73b   :  { %12289 = vmatpush1.bf16.msra.mxu1 %v15898_v46  ;;  %12297 = vmatprep.subr.bf16.mxu0 %v15935_v29 }
 0x73c   :  { %12292 = vmatprep.subr.msk.bf16.mxu1 %vm15571_vm10, %v15959_v52  ;;  %10203 = vmatprep.mubr.f32.mxu1 %v17621_v40 }
 0x73d   :  { %11383 = vmatmul.mubr.msk.f32.vlgmr.msra.gmra.mrb[104].mxu0 %vm6132_vm9, %v16438_v31 }
 0x73e   :  { %12299 = vmatpush1.bf16.msra.mxu0 %v15964_v61  ;;  %10274 = vmatprep.mubr.f32.mxu0 %v17621_v40 }
 0x73f   :  { %12295 = vmatpush1.bf16.msk.msra.mxu1 %vm15571_vm10, %v15956_v50  ;;  %12302 = vmatprep.subr.msk.bf16.mxu0 %vm15571_vm10, %v15998_v47 }
 0x740   :  { %12307 = vmatprep.subr.bf16.mxu1 %v15961_v60 }
 0x742   :  { %11386 = vmatmul.mubr.msk.f32.vlgmr.msra.gmra.mrb[104].mxu1 %vm6132_vm9, %v16438_v31  ;;  %12305 = vmatpush1.bf16.msk.msra.mxu0 %vm15571_vm10, %v16002_v62 }
 0x743   :  { %12309 = vmatpush1.bf16.msra.mxu1 %v15996_v24  ;;  %12316 = vmatprep.subr.bf16.mxu0 %v12935_v13 }
 0x744   :  { %12312 = vmatprep.subr.msk.bf16.mxu1 %vm15571_vm10, %v16012_v23  ;;  %10345 = vmatprep.mubr.f32.mxu1 %v17621_v40 }
 0x745   :  { %11389 = vmatmul.mubr.msk.f32.vlgmr.msra.gmra.mrb[106].mxu0 %vm6132_vm9, %v16438_v31 }
 0x746   :  { %12318 = vmatpush3.bf16.msra.mxu0 %v16148_v5  ;;  %v16539_v26 = vpop.f32.mrb[54].mxu1  ;;  %11462 = vmatprep.mubr.msk.f32.mxu0 %vm12936_vm0, %v17621_v40  ;;  %v16546_v45 = vpop.f32.mrb[56].mxu0 }
 0x747   :  { %12315 = vmatpush1.bf16.msk.msra.mxu1 %vm15571_vm10, %v16017_v39  ;;  %12319 = vmatprep.subr.bf16.mxu0 %v12935_v13  ;;  %v16544_v41 = vpop.f32.mrb[55].mxu1  ;;  %v16548_v1 = vpop.f32.mrb[57].mxu0 }
 0x74a   :  { %11392 = vmatmul.mubr.msk.f32.vlgmr.msra.gmra.mrb[106].mxu1 %vm6132_vm9, %v16438_v31  ;;  %12322 = vmatpush3.bf16.msk.msra.mxu0 %vm15571_vm10, %v16164_v9 }
 0x74d   :  { %11463 = vmatmul.mubr.msk.f32.vlgmr.msra.gmra.mrb[108].mxu0 %vm6132_vm9, %v16438_v31 }
 0x750   :  { %v16557_v17 = vpop.f32.mrb[56].mxu1 }
 0x751   :  { %v16559_v2 = vpop.f32.mrb[57].mxu1 }
 0x755   :  { %v16561_v22 = vpop.f32.mrb[58].mxu0 }
 0x756   :  { %v16563_v49 = vpop.f32.mrb[59].mxu0 }
 0x759   :  { %v16565_v40 = vpop.f32.mrb[58].mxu1 }
 0x75a   :  { %v16567_v37 = vpop.f32.mrb[59].mxu1 }
 0x75f   :  { %v16569_v28 = vpop.f32.mrb[60].mxu0 }
 0x760   :  { %v16571_v42 = vpop.f32.mrb[61].mxu0 }
 0x764   :  { %v16573_v30 = vpop.f32.mrb[60].mxu1 }
 0x765   :  { %v16575_v0 = vpop.f32.mrb[61].mxu1 }
 0x768   :  { %v16577_v36 = vpop.f32.mrb[62].mxu0 }
 0x769   :  { %v16579_v15 = vpop.f32.mrb[63].mxu0 }
 0x76d   :  { %v16581_v7 = vpop.f32.mrb[62].mxu1 }
 0x76e   :  { %v16583_v35 = vpop.f32.mrb[63].mxu1 }
 0x770   :  { %v16585_v33 = vpop.f32.mrb[64].mxu0 }
 0x771   :  { %v16587_v44 = vpop.f32.mrb[65].mxu0 }
 0x775   :  { %v6984_v19 = vpop.f32.mrb[64].mxu1 }
 0x776   :  { %v6986_v43 = vpop.f32.mrb[65].mxu1  ;;  %7719 = vrot.lane.b32.xlu1 %v6984_v19, %s12931_s1 }
 0x777   :  { %7721 = vrot.lane.b32.xlu0 %v6986_v43, %s12931_s1 }
 0x778   :  { %v7055_v59 = vpop.f32.mrb[66].mxu0 }
 0x779   :  { %v7057_v55 = vpop.f32.mrb[67].mxu0 }
 0x77a   :  { %7723 = vrot.lane.b32.xlu1 %v7055_v59, %s12931_s1 }
 0x77b   :  { %7725 = vrot.lane.b32.xlu0 %v7057_v55, %s12931_s1 }
 0x77d   :  { %v7126_v58 = vpop.f32.mrb[66].mxu1 }
 0x77e   :  { %v7128_v57 = vpop.f32.mrb[67].mxu1 }
 0x77f   :  { %7727 = vrot.lane.b32.xlu0 %v7126_v58, %s12931_s1 }
 0x780   :  { %v7197_v46 = vpop.f32.mrb[68].mxu0 }
 0x781   :  { %7731 = vrot.lane.b32.xlu1 %v7197_v46, %s12931_s1  ;;  %v7199_v18 = vpop.f32.mrb[69].mxu0 }
 0x785   :  { %v7268_v4 = vpop.f32.mrb[68].mxu1  ;;  %7729 = vrot.lane.b32.xlu1 %v7128_v57, %s12931_s1 }
 0x786   :  { %v7270_v29 = vpop.f32.mrb[69].mxu1 }
 0x788   :  { %v7339_v50 = vpop.f32.mrb[70].mxu0 }
 0x789   :  { %7733 = vrot.lane.b32.xlu1 %v7199_v18, %s12931_s1  ;;  %v7341_v52 = vpop.f32.mrb[71].mxu0 }
 0x78d   :  { %v7410_v60 = vpop.f32.mrb[70].mxu1  ;;  %7735 = vrot.lane.b32.xlu1 %v7268_v4, %s12931_s1 }
 0x78e   :  { %v7412_v61 = vpop.f32.mrb[71].mxu1 }
 0x790   :  { %v7481_v38 = vpop.f32.mrb[72].mxu0 }
 0x791   :  { %7739 = vrot.lane.b32.xlu1 %v7339_v50, %s12931_s1  ;;  %v7483_v10 = vpop.f32.mrb[73].mxu0 }
 0x795   :  { %v7552_v20 = vpop.f32.mrb[72].mxu1  ;;  %7737 = vrot.lane.b32.xlu1 %v7270_v29, %s12931_s1 }
 0x796   :  { %v7554_v54 = vpop.f32.mrb[73].mxu1 }
 0x798   :  { %v16600_v48 = vpop.f32.mrb[74].mxu0 }
 0x799   :  { %7741 = vrot.lane.b32.xlu1 %v7341_v52, %s12931_s1  ;;  %v16603_v32 = vpop.f32.mrb[75].mxu0 }
 0x79d   :  { %v16605_v27 = vpop.f32.mrb[74].mxu1  ;;  %7743 = vrot.lane.b32.xlu1 %v7410_v60, %s12931_s1  ;;  %v16646_v60 = vpop.permute.xlu0 %6888 }
 0x79e   :  { %v11431_v24 = vpop.f32.mrb[75].mxu1 }
 0x7a0   :  { %v7892_v47 = vpop.f32.mrb[76].mxu0 }
 0x7a1   :  { %7747 = vrot.lane.b32.xlu1 %v7481_v38, %s12931_s1  ;;  %v7894_v62 = vpop.f32.mrb[77].mxu0 }
 0x7a2   :  { %8629 = vrot.lane.b32.xlu0 %v7894_v62, %s12932_s17 }
 0x7a5   :  { %v7963_v8 = vpop.f32.mrb[76].mxu1  ;;  %7745 = vrot.lane.b32.xlu1 %v7412_v61, %s12931_s1 }
 0x7a6   :  { %v7965_v3 = vpop.f32.mrb[77].mxu1 }
 0x7a8   :  { %v8034_v63 = vpop.f32.mrb[78].mxu0 }
 0x7a9   :  { %8635 = vrot.lane.b32.xlu0 %v8034_v63, %s12932_s17  ;;  %7749 = vrot.lane.b32.xlu1 %v7483_v10, %s12931_s1  ;;  %v8036_v34 = vpop.f32.mrb[79].mxu0 }
 0x7ad   :  { %v8105_v23 = vpop.f32.mrb[78].mxu1  ;;  %8637 = vrot.lane.b32.xlu0 %v8036_v34, %s12932_s17  ;;  %7751 = vrot.lane.b32.xlu1 %v7552_v20, %s12931_s1  ;;  %v6891_v20 = vadd.f32 %v16646_v60, %v16539_v26  ;;  %v6893_v34 = vadd.f32 %v16646_v60, %v16546_v45 }
 0x7ae   :  { %v8107_v39 = vpop.f32.mrb[79].mxu1 }
 0x7b0   :  { %v8176_v51 = vpop.f32.mrb[80].mxu0 }
 0x7b1   :  { %7753 = vrot.lane.b32.xlu1 %v7554_v54, %s12931_s1  ;;  %8639 = vrot.lane.b32.xlu0 %v8105_v23, %s12932_s17  ;;  %v8178_v12 = vpop.f32.mrb[81].mxu0 }
 0x7b5   :  { %v8247_v14 = vpop.f32.mrb[80].mxu1  ;;  %8627 = vrot.lane.b32.xlu1 %v7892_v47, %s12932_s17  ;;  %8643 = vrot.lane.b32.xlu0 %v8176_v51, %s12932_s17 }
 0x7b6   :  { %v8249_v11 = vpop.f32.mrb[81].mxu1 }
 0x7b8   :  { %v8318_v21 = vpop.f32.mrb[82].mxu0 }
 0x7b9   :  { %8631 = vrot.lane.b32.xlu1 %v7963_v8, %s12932_s17  ;;  %8641 = vrot.lane.b32.xlu0 %v8107_v39, %s12932_s17  ;;  %v8320_v53 = vpop.f32.mrb[83].mxu0 }
 0x7bd   :  { %v8389_v16 = vpop.f32.mrb[82].mxu1  ;;  %8633 = vrot.lane.b32.xlu1 %v7965_v3, %s12932_s17  ;;  %8645 = vrot.lane.b32.xlu0 %v8178_v12, %s12932_s17  ;;  %v6892_v3 = vadd.f32 %v16646_v60, %v16544_v41  ;;  %v6894_v41 = vadd.f32 %v16646_v60, %v16548_v1  ;;  %v6896_v1 = vadd.f32 %v16646_v60, %v16559_v2 }
 0x7be   :  { %v8391_v13 = vpop.f32.mrb[83].mxu1 }
 0x7c0   :  { %v8460_v5 = vpop.f32.mrb[84].mxu0 }
 0x7c1   :  { %8647 = vrot.lane.b32.xlu0 %v8247_v14, %s12932_s17  ;;  %v16624_v6 = vpop.f32.mrb[85].mxu0 }
 0x7c5   :  { %v16626_v9 = vpop.f32.mrb[84].mxu1  ;;  %8651 = vrot.lane.b32.xlu0 %v8318_v21, %s12932_s17 }
 0x7c6   :  { %v16629_v25 = vpop.f32.mrb[85].mxu1 }
 0x7c8   :  { %v16631_v56 = vpop.f32.mrb[86].mxu0 }
 0x7c9   :  { %8649 = vrot.lane.b32.xlu0 %v8249_v11, %s12932_s17  ;;  %v11442_v31 = vpop.f32.mrb[87].mxu0 }
 0x7cd   :  { %v8800_v19 = vpop.f32.mrb[86].mxu1  ;;  %8653 = vrot.lane.b32.xlu0 %v8320_v53, %s12932_s17 }
 0x7ce   :  { %v8802_v43 = vpop.f32.mrb[87].mxu1 }
 0x7cf   :  { %9537 = vrot.lane.b32.xlu1 %v8802_v43, %s12933_s18  ;;  %v6895_v43 = vadd.f32 %v16646_v60, %v16557_v17  ;;  %v6897_v17 = vadd.f32 %v16646_v60, %v16561_v22 }
 0x7d0   :  { %v8871_v59 = vpop.f32.mrb[88].mxu0 }
 0x7d1   :  { %v8873_v55 = vpop.f32.mrb[89].mxu0  ;;  %8655 = vrot.lane.b32.xlu0 %v8389_v16, %s12932_s17 }
 0x7d3   :  { %9541 = vrot.lane.b32.xlu1 %v8873_v55, %s12933_s18 }
 0x7d5   :  { %v8942_v58 = vpop.f32.mrb[88].mxu1  ;;  %8659 = vrot.lane.b32.xlu0 %v8460_v5, %s12932_s17 }
 0x7d6   :  { %v8944_v57 = vpop.f32.mrb[89].mxu1 }
 0x7d7   :  { %9543 = vrot.lane.b32.xlu1 %v8942_v58, %s12933_s18 }
 0x7d8   :  { %v9013_v46 = vpop.f32.mrb[90].mxu0 }
 0x7d9   :  { %8657 = vrot.lane.b32.xlu0 %v8391_v13, %s12932_s17  ;;  %v9015_v18 = vpop.f32.mrb[91].mxu0 }
 0x7db   :  { %9547 = vrot.lane.b32.xlu1 %v9013_v46, %s12933_s18 }
 0x7dd   :  { %v9084_v4 = vpop.f32.mrb[90].mxu1  ;;  %9535 = vrot.lane.b32.xlu0 %v8800_v19, %s12933_s18 }
 0x7de   :  { %v9086_v29 = vpop.f32.mrb[91].mxu1 }
 0x7df   :  { %9545 = vrot.lane.b32.xlu1 %v8944_v57, %s12933_s18 }
 0x7e0   :  { %v9155_v50 = vpop.f32.mrb[92].mxu0 }
 0x7e1   :  { %9539 = vrot.lane.b32.xlu0 %v8871_v59, %s12933_s18  ;;  %v9157_v52 = vpop.f32.mrb[93].mxu0 }
 0x7e3   :  { %9549 = vrot.lane.b32.xlu1 %v9015_v18, %s12933_s18 }
 0x7e5   :  { %v9226_v61 = vpop.f32.mrb[92].mxu1 }
 0x7e6   :  { %v9228_v38 = vpop.f32.mrb[93].mxu1 }
 0x7e7   :  { %9551 = vrot.lane.b32.xlu1 %v9084_v4, %s12933_s18 }
 0x7e8   :  { %v7720_v10 = vpop.permute.xlu1 %7719  ;;  %v9297_v24 = vpop.f32.mrb[94].mxu0 }
 0x7e9   :  { %v7722_v54 = vpop.permute.xlu0 %7721  ;;  %v9299_v62 = vpop.f32.mrb[95].mxu0 }
 0x7ea   :  { %v7761_v47 = vsel %vm2340_vm12, %v7720_v10, %v7722_v54  ;;  %v6898_v10 = vadd.f32 %v16646_v60, %v16563_v49  ;;  %v6899_v49 = vadd.f32 %v16646_v60, %v16565_v40  ;;  %v6901_v40 = vadd.f32 %v16646_v60, %v16569_v28 }
 0x7eb   :  { %v16652_v8 = vadd.f32 %v7761_v47, %v6891_v20  ;;  %9555 = vrot.lane.b32.xlu1 %v9155_v50, %s12933_s18 }
 0x7ec   :  { %v7724_v63 = vpop.permute.xlu1 %7723 }
 0x7ed   :  { %v7762_v23 = vsel %vm2340_vm12, %v7722_v54, %v7724_v63  ;;  %v7726_v39 = vpop.permute.xlu0 %7725  ;;  %v16660_v26 = vpop.f32.mrb[94].mxu1 }
 0x7ee   :  { %v16662_v51 = vadd.f32 %v7762_v23, %v6892_v3  ;;  %v7763_v12 = vsel %vm2340_vm12, %v7724_v63, %v7726_v39  ;;  %v16665_v14 = vpop.f32.mrb[95].mxu1  ;;  %v6900_v63 = vadd.f32 %v16646_v60, %v16567_v37 }
 0x7ef   :  { %v16667_v11 = vadd.f32 %v7763_v12, %v6893_v34  ;;  %9553 = vrot.lane.b32.xlu1 %v9086_v29, %s12933_s18 }
 0x7f0   :  { %v16672_v45 = vpop.f32.mrb[96].mxu0 }
 0x7f1   :  { %v7728_v21 = vpop.permute.xlu0 %7727  ;;  %v9441_v16 = vpop.f32.mrb[97].mxu0 }
 0x7f2   :  { %v7764_v53 = vsel %vm2340_vm12, %v7726_v39, %v7728_v21 }
 0x7f3   :  { %v16675_v13 = vadd.f32 %v7764_v53, %v6894_v41  ;;  %9557 = vrot.lane.b32.xlu1 %v9157_v52, %s12933_s18  ;;  %v7732_v5 = vpop.permute.xlu1 %7731 }
 0x7f5   :  { %v16678_v31 = vpop.f32.mrb[96].mxu1 }
 0x7f6   :  { %v11453_v19 = vpop.f32.mrb[97].mxu1 }
 0x7f7   :  { %9559 = vrot.lane.b32.xlu1 %v9226_v61, %s12933_s18  ;;  %v7730_v59 = vpop.permute.xlu1 %7729 }
 0x7f8   :  { %v7765_v55 = vsel %vm2340_vm12, %v7728_v21, %v7730_v59  ;;  %v7766_v58 = vsel %vm2340_vm12, %v7730_v59, %v7732_v5  ;;  %v9708_v57 = vpop.f32.mrb[98].mxu0 }
 0x7f9   :  { %v16687_v46 = vadd.f32 %v7765_v55, %v6895_v43  ;;  %v16689_v18 = vadd.f32 %v7766_v58, %v6896_v1  ;;  %v9710_v4 = vpop.f32.mrb[99].mxu0  ;;  %10443 = vrot.lane.b32.xlu0 %v9708_v57, %s12934_s19  ;;  %v6904_v58 = vadd.f32 %v16646_v60, %v16575_v0 }
 0x7fb   :  { %9563 = vrot.lane.b32.xlu1 %v9297_v24, %s12933_s18  ;;  %v7734_v29 = vpop.permute.xlu1 %7733 }
 0x7fc   :  { %v7767_v2 = vsel %vm2340_vm12, %v7732_v5, %v7734_v29 }
 0x7fd   :  { %v9779_v50 = vpop.f32.mrb[98].mxu1  ;;  %v16696_v52 = vadd.f32 %v7767_v2, %v6897_v17  ;;  %8661 = vrot.lane.b32.xlu0 %v16624_v6, %s12932_s17 }
 0x7fe   :  { %v9781_v61 = vpop.f32.mrb[99].mxu1 }
 0x7ff   :  { %9561 = vrot.lane.b32.xlu1 %v9228_v38, %s12933_s18  ;;  %v7736_v20 = vpop.permute.xlu1 %7735 }
 0x800   :  { %v7768_v54 = vsel %vm2340_vm12, %v7734_v29, %v7736_v20  ;;  %v9850_v24 = vpop.f32.mrb[100].mxu0 }
 0x801   :  { %v16704_v22 = vadd.f32 %v7768_v54, %v6898_v10  ;;  %8663 = vrot.lane.b32.xlu0 %v16626_v9, %s12932_s17  ;;  %v9852_v47 = vpop.f32.mrb[101].mxu0 }
 0x803   :  { %9565 = vrot.lane.b32.xlu1 %v9299_v62, %s12933_s18  ;;  %v7740_v3 = vpop.permute.xlu1 %7739 }
 0x805   :  { %v9921_v6 = vpop.f32.mrb[100].mxu1  ;;  %8665 = vrot.lane.b32.xlu0 %v16629_v25, %s12932_s17 }
 0x806   :  { %v16711_v38 = vpop.f32.mrb[101].mxu1 }
 0x807   :  { %10445 = vrot.lane.b32.xlu1 %v9710_v4, %s12934_s19  ;;  %v7738_v34 = vpop.permute.xlu1 %7737 }
 0x808   :  { %v7769_v9 = vsel %vm2340_vm12, %v7736_v20, %v7738_v34  ;;  %v7770_v62 = vsel %vm2340_vm12, %v7738_v34, %v7740_v3  ;;  %v9992_v23 = vpop.f32.mrb[102].mxu0 }
 0x809   :  { %v16720_v39 = vadd.f32 %v7769_v9, %v6899_v49  ;;  %v16722_v12 = vadd.f32 %v7770_v62, %v6900_v63  ;;  %9573 = vrot.lane.b32.xlu0 %v9441_v16, %s12933_s18  ;;  %v16725_v25 = vpop.f32.mrb[103].mxu0 }
 0x80b   :  { %7755 = vrot.lane.b32.xlu1 %v16600_v48, %s12931_s1  ;;  %v7742_v37 = vpop.permute.xlu1 %7741  ;;  %v6902_v48 = vadd.f32 %v16646_v60, %v16571_v42 }
 0x80c   :  { %v7771_v41 = vsel %vm2340_vm12, %v7740_v3, %v7742_v37 }
 0x80d   :  { %v16732_v21 = vpop.f32.mrb[102].mxu1  ;;  %v16734_v53 = vadd.f32 %v7771_v41, %v6901_v40  ;;  %10447 = vrot.lane.b32.xlu0 %v9779_v50, %s12934_s19 }
 0x80e   :  { %v16737_v5 = vpop.f32.mrb[103].mxu1 }
 0x80f   :  { %9567 = vrot.lane.b32.xlu1 %v16660_v26, %s12933_s18  ;;  %v7744_v16 = vpop.permute.xlu1 %7743  ;;  %v6903_v26 = vadd.f32 %v16646_v60, %v16573_v30  ;;  %v6905_v30 = vadd.f32 %v16646_v60, %v16577_v36 }
 0x810   :  { %v7772_v28 = vsel %vm2340_vm12, %v7742_v37, %v7744_v16  ;;  %v16744_v19 = vpop.f32.mrb[104].mxu0 }
 0x811   :  { %v16746_v43 = vadd.f32 %v7772_v28, %v6902_v48  ;;  %10451 = vrot.lane.b32.xlu0 %v9850_v24, %s12934_s19  ;;  %v16749_v1 = vpop.f32.mrb[105].mxu0 }
 0x813   :  { %7757 = vrot.lane.b32.xlu1 %v16603_v32, %s12931_s1  ;;  %v7748_v59 = vpop.permute.xlu1 %7747 }
 0x814   :  { %v8630_v57 = vpop.permute.xlu0 %8629 }
 0x815   :  { %v16753_v55 = vpop.f32.mrb[104].mxu1  ;;  %10449 = vrot.lane.b32.xlu0 %v9781_v61, %s12934_s19 }
 0x816   :  { %v16756_v42 = vpop.f32.mrb[105].mxu1 }
 0x817   :  { %9569 = vrot.lane.b32.xlu1 %v16665_v14, %s12933_s18  ;;  %v7746_v4 = vpop.permute.xlu1 %7745 }
 0x818   :  { %v7773_v32 = vsel %vm2340_vm12, %v7744_v16, %v7746_v4  ;;  %v7774_v17 = vsel %vm2340_vm12, %v7746_v4, %v7748_v59  ;;  %v16766_v29 = vpop.f32.mrb[106].mxu0 }
 0x819   :  { %v16768_v2 = vadd.f32 %v7773_v32, %v6903_v26  ;;  %v16770_v50 = vadd.f32 %v7774_v17, %v6904_v58  ;;  %10453 = vrot.lane.b32.xlu0 %v9852_v47, %s12934_s19  ;;  %v16773_v14 = vpop.f32.mrb[107].mxu0  ;;  %v6906_v47 = vadd.f32 %v16646_v60, %v16579_v15  ;;  %v6907_v15 = vadd.f32 %v16646_v60, %v16581_v7 }
 0x81b   :  { %7759 = vrot.lane.b32.xlu1 %v16605_v27, %s12931_s1  ;;  %v8636_v0 = vpop.permute.xlu0 %8635  ;;  %v7750_v61 = vpop.permute.xlu1 %7749 }
 0x81c   :  { %v7775_v10 = vsel %vm2340_vm12, %v7748_v59, %v7750_v61 }
 0x81d   :  { %v10347_v20 = vpop.f32.mrb[106].mxu1  ;;  %v16780_v54 = vadd.f32 %v7775_v10, %v6905_v30  ;;  %10455 = vrot.lane.b32.xlu0 %v9921_v6, %s12934_s19 }
 0x81e   :  { %v10349_v24 = vpop.f32.mrb[107].mxu1 }
 0x81f   :  { %9571 = vrot.lane.b32.xlu1 %v16672_v45, %s12933_s18  ;;  %v8638_v27 = vpop.permute.xlu0 %8637  ;;  %v7752_v3 = vpop.permute.xlu1 %7751 }
 0x820   :  { %v8673_v36 = vsel %vm3256_vm13, %v8636_v0, %v8638_v27  ;;  %v7776_v49 = vsel %vm2340_vm12, %v7750_v61, %v7752_v3  ;;  %v16789_v63 = vpop.f32.mrb[108].mxu0 }
 0x821   :  { %v16792_v34 = vadd.f32 %v8673_v36, %v16687_v46  ;;  %v16794_v9 = vadd.f32 %v7776_v49, %v6906_v47  ;;  %10459 = vrot.lane.b32.xlu0 %v9992_v23, %s12934_s19  ;;  %v11464_v6 = vpop.f32.mrb[109].mxu0 }
 0x823   :  { %8667 = vrot.lane.b32.xlu1 %v16631_v56, %s12932_s17  ;;  %v16801_v45 = vpop.permute.xlu1 %7753  ;;  %v8640_v62 = vpop.permute.xlu0 %8639 }
 0x824   :  { %v7777_v40 = vsel %vm2340_vm12, %v7752_v3, %v16801_v45  ;;  %v8674_v46 = vsel %vm3256_vm13, %v8638_v27, %v8640_v62 }
 0x825   :  { %v16806_v37 = vadd.f32 %v7777_v40, %v6907_v15  ;;  %v16809_v41 = vadd.f32 %v8674_v46, %v16689_v18  ;;  %10457 = vrot.lane.b32.xlu0 %v16711_v38, %s12934_s19 }
 0x827   :  { %10479 = vrot.lane.b32.xlu1 %v10347_v20, %s12934_s19  ;;  %v8628_v56 = vpop.permute.xlu1 %8627  ;;  %v8644_v7 = vpop.permute.xlu0 %8643 }
 0x828   :  { %v8669_v23 = vsel %vm3256_vm13, %v8628_v56, %v8630_v57 }
 0x829   :  { %v16816_v48 = vadd.f32 %v8669_v23, %v16652_v8  ;;  %10461 = vrot.lane.b32.xlu0 %v16725_v25, %s12934_s19 }
 0x82b   :  { %10481 = vrot.lane.b32.xlu1 %v10349_v24, %s12934_s19  ;;  %v8632_v16 = vpop.permute.xlu1 %8631  ;;  %v8642_v18 = vpop.permute.xlu0 %8641 }
 0x82c   :  { %v8670_v28 = vsel %vm3256_vm13, %v8630_v57, %v8632_v16  ;;  %v8675_v38 = vsel %vm3256_vm13, %v8640_v62, %v8642_v18  ;;  %v8676_v59 = vsel %vm3256_vm13, %v8642_v18, %v8644_v7 }
 0x82d   :  { %v16825_v26 = vadd.f32 %v8670_v28, %v16662_v51  ;;  %v16828_v58 = vadd.f32 %v8675_v38, %v16696_v52  ;;  %v16831_v8 = vadd.f32 %v8676_v59, %v16704_v22  ;;  %10463 = vrot.lane.b32.xlu0 %v16732_v21, %s12934_s19 }
 0x82f   :  { %v8634_v25 = vpop.permute.xlu1 %8633  ;;  %v8646_v4 = vpop.permute.xlu0 %8645 }
 0x830   :  { %v8671_v57 = vsel %vm3256_vm13, %v8632_v16, %v8634_v25  ;;  %v8672_v32 = vsel %vm3256_vm13, %v8634_v25, %v8636_v0  ;;  %v8677_v17 = vsel %vm3256_vm13, %v8644_v7, %v8646_v4 }
 0x831   :  { %v16839_v51 = vadd.f32 %v8671_v57, %v16667_v11  ;;  %v16842_v52 = vadd.f32 %v8672_v32, %v16675_v13  ;;  %v16845_v22 = vadd.f32 %v8677_v17, %v16720_v39  ;;  %10467 = vrot.lane.b32.xlu0 %v16744_v19, %s12934_s19  ;;  %v6908_v32 = vadd.f32 %v16646_v60, %v16583_v35 }
 0x833   :  { %v8648_v21 = vpop.permute.xlu0 %8647 }
 0x834   :  { %v8678_v30 = vsel %vm3256_vm13, %v8646_v4, %v8648_v21 }
 0x835   :  { %v16851_v61 = vadd.f32 %v8678_v30, %v16722_v12  ;;  %10465 = vrot.lane.b32.xlu0 %v16737_v5, %s12934_s19 }
 0x837   :  { %v8652_v11 = vpop.permute.xlu0 %8651 }
 0x839   :  { %10469 = vrot.lane.b32.xlu0 %v16749_v1, %s12934_s19 }
 0x83b   :  { %v8650_v13 = vpop.permute.xlu0 %8649 }
 0x83c   :  { %v8679_v39 = vsel %vm3256_vm13, %v8648_v21, %v8650_v13  ;;  %v8680_v0 = vsel %vm3256_vm13, %v8650_v13, %v8652_v11 }
 0x83d   :  { %v16860_v19 = vadd.f32 %v8679_v39, %v16734_v53  ;;  %v16863_v10 = vadd.f32 %v8680_v0, %v16746_v43  ;;  %10471 = vrot.lane.b32.xlu0 %v16753_v55, %s12934_s19  ;;  %v6909_v0 = vadd.f32 %v16646_v60, %v16585_v33 }
 0x83f   :  { %v8654_v12 = vpop.permute.xlu0 %8653 }
 0x840   :  { %v8681_v5 = vsel %vm3256_vm13, %v8652_v11, %v8654_v12 }
 0x841   :  { %v9538_v20 = vpop.permute.xlu1 %9537  ;;  %v16869_v1 = vadd.f32 %v8681_v5, %v16768_v2  ;;  %10475 = vrot.lane.b32.xlu0 %v16766_v29, %s12934_s19 }
 0x843   :  { %v8656_v24 = vpop.permute.xlu0 %8655 }
 0x844   :  { %v8682_v53 = vsel %vm3256_vm13, %v8654_v12, %v8656_v24 }
 0x845   :  { %v16874_v47 = vpop.permute.xlu1 %9541  ;;  %v16877_v43 = vadd.f32 %v8682_v53, %v16770_v50  ;;  %10473 = vrot.lane.b32.xlu0 %v16756_v42, %s12934_s19 }
 0x847   :  { %v8660_v55 = vpop.permute.xlu0 %8659 }
 0x849   :  { %v16881_v27 = vpop.permute.xlu1 %9543  ;;  %10477 = vrot.lane.b32.xlu0 %v16773_v14, %s12934_s19 }
 0x84b   :  { %v8658_v2 = vpop.permute.xlu0 %8657 }
 0x84c   :  { %v8683_v29 = vsel %vm3256_vm13, %v8656_v24, %v8658_v2  ;;  %v8684_v3 = vsel %vm3256_vm13, %v8658_v2, %v8660_v55 }
 0x84d   :  { %v16887_v36 = vpop.permute.xlu1 %9547  ;;  %v16890_v49 = vadd.f32 %v8683_v29, %v16780_v54  ;;  %v16893_v50 = vadd.f32 %v8684_v3, %v16794_v9  ;;  %9575 = vrot.lane.b32.xlu0 %v16678_v31, %s12933_s18  ;;  %v17640_v29 = vld [vmem:[#allocation31_spill] sm:$0xff] }
 0x84e   :  { %v17641_v3 = vsub.s32 1, %v17640_v29 }
 0x84f   :  { %v9536_v54 = vpop.permute.xlu0 %9535 }
 0x850   :  { %v9577_v33 = vsel %vm4172_vm14, %v9536_v54, %v9538_v20 }
 0x851   :  { %v16897_v42 = vpop.permute.xlu1 %9545  ;;  %10483 = vrot.lane.b32.xlu0 %v16789_v63, %s12934_s19 }
 0x853   :  { %v9540_v9 = vpop.permute.xlu0 %9539 }
 0x854   :  { %v9578_v2 = vsel %vm4172_vm14, %v9538_v20, %v9540_v9 }
 0x855   :  { %v16901_v14 = vpop.permute.xlu1 %9549 }
 0x859   :  { %v16903_v6 = vpop.permute.xlu1 %9551 }
 0x85d   :  { %v16905_v15 = vpop.permute.xlu1 %9555 }
 0x861   :  { %v16907_v62 = vpop.permute.xlu1 %9553 }
 0x865   :  { %v16909_v40 = vpop.permute.xlu1 %9557 }
 0x869   :  { %v16911_v46 = vpop.permute.xlu1 %9559 }
 0x86b   :  { %v10444_v31 = vpop.permute.xlu0 %10443 }
 0x86d   :  { %v16913_v56 = vpop.permute.xlu1 %9563 }
 0x86f   :  { %v8662_v7 = vpop.permute.xlu0 %8661 }
 0x870   :  { %v8685_v63 = vsel %vm3256_vm13, %v8660_v55, %v8662_v7 }
 0x871   :  { %v16916_v23 = vpop.permute.xlu1 %9561  ;;  %v16919_v16 = vadd.f32 %v8685_v63, %v16806_v37 }
 0x873   :  { %v8664_v18 = vpop.permute.xlu0 %8663 }
 0x874   :  { %v8686_v28 = vsel %vm3256_vm13, %v8662_v7, %v8664_v18 }
 0x875   :  { %v16922_v38 = vpop.permute.xlu1 %9565 }
 0x877   :  { %v8666_v59 = vpop.permute.xlu0 %8665 }
 0x878   :  { %v8687_v25 = vsel %vm3256_vm13, %v8664_v18, %v8666_v59  ;;  %v9579_v18 = vsel %vm4172_vm14, %v9540_v9, %v16874_v47 }
 0x879   :  { %v10446_v4 = vpop.permute.xlu1 %10445  ;;  %v9619_v20 = vadd.f32 %v9579_v18, %v16839_v51  ;;  %v6910_v51 = vadd.f32 %v16646_v60, %v16587_v44 }
 0x87b   :  { %v16925_v57 = vpop.permute.xlu0 %9573 }
 0x87c   :  { %17638 = vst [vmem:[#allocation4_spill] sm:$0xff] %v16925_v57 }
 0x87d   :  { %v7756_v17 = vpop.permute.xlu1 %7755 }
 0x87e   :  { %v7778_v21 = vsel %vm2340_vm12, %v16801_v45, %v7756_v17  ;;  %v10545_v45 = vld [vmem:[%s17474_s10] sm:$0x1f] }
 0x87f   :  { %v7818_v37 = vadd.f32 %v7778_v21, %v6908_v32  ;;  %v10448_v30 = vpop.permute.xlu0 %10447  ;;  %v10554_v7 = vrot.slane %v10545_v45, %v17641_v3  ;;  %v9618_v21 = vadd.f32 %v9578_v2, %v16825_v26  ;;  %v9617_v3 = vadd.f32 %v9577_v33, %v16816_v48 }
 0x880   :  { %v17644_v33 = vsub.s32 3, %v17640_v29 }
 0x881   :  { %v16931_v11 = vpop.permute.xlu1 %9567  ;;  %v16933_v13 = vadd.f32 %v8686_v28, %v7818_v37  ;;  %v17642_v28 = vld [vmem:[#allocation35_spill] sm:$0xff]  ;;  %v17643_v37 = vsub.s32 2, %v17640_v29 }
 0x882   :  { %v10550_v32 = vrot.slane %v10545_v45, %v17642_v28  ;;  %v16961_v54 = vrot.slane %v10554_v7, %v17642_v28  ;;  %v10562_v18 = vrot.slane %v10545_v45, %v17644_v33 }
 0x883   :  { %v10452_v39 = vpop.permute.xlu0 %10451 }
 0x884   :  { %v16966_v57 = vrot.slane %v10550_v32, %v17642_v28 }
 0x885   :  { %v7758_v12 = vpop.permute.xlu1 %7757 }
 0x886   :  { %v7779_v5 = vsel %vm2340_vm12, %v7756_v17, %v7758_v12 }
 0x887   :  { %v7819_v24 = vadd.f32 %v7779_v5, %v6909_v0  ;;  %v10450_v53 = vpop.permute.xlu0 %10449  ;;  %v10558_v0 = vrot.slane %v10545_v45, %v17643_v37  ;;  %v10485_v5 = vsel %vm5088_vm15, %v10444_v31, %v10446_v4 }
 0x888   :  { %v16970_v2 = vadd.f32 %v10485_v5, %v9617_v3 }
 0x889   :  { %v16938_v35 = vpop.permute.xlu1 %9569  ;;  %v16940_v55 = vadd.f32 %v8687_v25, %v7819_v24  ;;  %v10486_v25 = vsel %vm5088_vm15, %v10446_v4, %v10448_v30  ;;  %v10487_v24 = vsel %vm5088_vm15, %v10448_v30, %v10450_v53  ;;  %v16973_v31 = vrot.slane %v10558_v0, %v17642_v28 }
 0x88a   :  { %v16963_v9 = vadd.f32 %v10486_v25, %v9618_v21  ;;  %v16975_v4 = vadd.f32 %v10487_v24, %v9619_v20  ;;  %v9580_v30 = vsel %vm4172_vm14, %v16874_v47, %v16881_v27  ;;  %v9581_v25 = vsel %vm4172_vm14, %v16881_v27, %v16897_v42 }
 0x88b   :  { %17639 = vst [vmem:[#allocation24_spill] sm:$0xff] %v16940_v55  ;;  %v10454_v63 = vpop.permute.xlu0 %10453  ;;  %v9620_v47 = vadd.f32 %v9580_v30, %v16842_v52  ;;  %v10592_v37 = vmul.f32 %v16966_v57, %v16970_v2  ;;  %v9582_v27 = vsel %vm4172_vm14, %v16897_v42, %v16887_v36  ;;  %v17007_v52 = vrot.slane %v10562_v18, %v17642_v28 }
 0x88c   :  { %v10593_v7 = vmul.f32 %v16961_v54, %v16963_v9  ;;  %v10594_v0 = vmul.f32 %v16973_v31, %v16975_v4  ;;  %v9622_v42 = vadd.f32 %v9582_v27, %v16809_v41 }
 0x88d   :  { %v7760_v17 = vpop.permute.xlu1 %7759 }
 0x88e   :  { %v7780_v48 = vsel %vm2340_vm12, %v7758_v12, %v7760_v17  ;;  %v10488_v12 = vsel %vm5088_vm15, %v10450_v53, %v10452_v39  ;;  %v17645_v17 = vsub.s32 4, %v17640_v29  ;;  %v10489_v53 = vsel %vm5088_vm15, %v10452_v39, %v10454_v63 }
 0x88f   :  { %v10456_v55 = vpop.permute.xlu0 %10455  ;;  %v7820_v60 = vadd.f32 %v7780_v48, %v6910_v51  ;;  %v10612_v24 = vadd.f32 %v10593_v7, %v10592_v37  ;;  %v17009_v3 = vadd.f32 %v10488_v12, %v9620_v47  ;;  %v9585_v12 = vsel %vm4172_vm14, %v16903_v6, %v16907_v62 }
 0x890   :  { %v10566_v44 = vrot.slane %v10545_v45, %v17645_v17  ;;  %v9621_v45 = vadd.f32 %v9581_v25, %v16792_v34  ;;  %v10490_v48 = vsel %vm5088_vm15, %v10454_v63, %v10456_v55  ;;  %v9625_v37 = vadd.f32 %v9585_v12, %v16845_v22 }
 0x891   :  { %v16968_v26 = vpop.permute.xlu1 %9571  ;;  %v10613_v39 = vadd.f32 %v10612_v24, %v10594_v0  ;;  %v10595_v33 = vmul.f32 %v17007_v52, %v17009_v3  ;;  %v17025_v18 = vadd.f32 %v10490_v48, %v9622_v42 }
 0x892   :  { %v17017_v51 = vrot.slane %v10566_v44, %v17642_v28  ;;  %v17019_v34 = vadd.f32 %v10489_v53, %v9621_v45  ;;  %v9584_v28 = vsel %vm4172_vm14, %v16901_v14, %v16903_v6 }
 0x893   :  { %v10460_v32 = vpop.permute.xlu0 %10459  ;;  %v10614_v25 = vadd.f32 %v10613_v39, %v10595_v33  ;;  %v9624_v44 = vadd.f32 %v9584_v28, %v16831_v8  ;;  %v9587_v8 = vsel %vm4172_vm14, %v16905_v15, %v16909_v40 }
 0x894   :  { %v10596_v41 = vmul.f32 %v17017_v51, %v17019_v34 }
 0x895   :  { %v8668_v21 = vpop.permute.xlu1 %8667 }
 0x896   :  { %v8688_v5 = vsel %vm3256_vm13, %v8666_v59, %v8668_v21  ;;  %v9583_v59 = vsel %vm4172_vm14, %v16887_v36, %v16901_v14  ;;  %v9586_v14 = vsel %vm4172_vm14, %v16907_v62, %v16905_v15  ;;  %v9627_v62 = vadd.f32 %v9587_v8, %v16860_v19 }
 0x897   :  { %v17003_v29 = vadd.f32 %v8688_v5, %v7820_v60  ;;  %v10458_v20 = vpop.permute.xlu0 %10457  ;;  %v9623_v7 = vadd.f32 %v9583_v59, %v16828_v58  ;;  %v10615_v60 = vadd.f32 %v10614_v25, %v10596_v41  ;;  %v9626_v53 = vadd.f32 %v9586_v14, %v16851_v61 }
 0x898   :  { %v10491_v30 = vsel %vm5088_vm15, %v10456_v55, %v10458_v20  ;;  %v10597_v55 = vmul.f32 %v16966_v57, %v17025_v18  ;;  %v10492_v17 = vsel %vm5088_vm15, %v10458_v20, %v10460_v32  ;;  %v9588_v61 = vsel %vm4172_vm14, %v16909_v40, %v16911_v46 }
 0x899   :  { %v17029_v63 = vadd.f32 %v10491_v30, %v9623_v7  ;;  %v17048_v5 = vadd.f32 %v10492_v17, %v9624_v44  ;;  %v9589_v30 = vsel %vm4172_vm14, %v16911_v46, %v16916_v23  ;;  %v9628_v33 = vadd.f32 %v9588_v61, %v16863_v10 }
 0x89a   :  { %v10616_v0 = vadd.f32 %v10615_v60, %v10597_v55  ;;  %v9590_v40 = vsel %vm4172_vm14, %v16916_v23, %v16913_v56  ;;  %v9629_v28 = vadd.f32 %v9589_v30, %v16869_v1  ;;  %v9591_v1 = vsel %vm4172_vm14, %v16913_v56, %v16922_v38 }
 0x89b   :  { %v10462_v36 = vpop.permute.xlu0 %10461  ;;  %v10598_v21 = vmul.f32 %v16961_v54, %v17029_v63  ;;  %v10599_v22 = vmul.f32 %v16973_v31, %v17048_v5  ;;  %v9630_v10 = vadd.f32 %v9590_v40, %v16877_v43  ;;  %v9592_v14 = vsel %vm4172_vm14, %v16922_v38, %v16931_v11 }
 0x89c   :  { %v10493_v47 = vsel %vm5088_vm15, %v10460_v32, %v10462_v36  ;;  %v9593_v56 = vsel %vm4172_vm14, %v16931_v11, %v16938_v35  ;;  %v9594_v38 = vsel %vm4172_vm14, %v16938_v35, %v16968_v26  ;;  %v17646_v35 = vld [vmem:[#allocation4_spill] sm:$0xff] }
 0x89d   :  { %v10617_v45 = vadd.f32 %v10616_v0, %v10598_v21  ;;  %v17055_v24 = vadd.f32 %v10493_v47, %v9625_v37  ;;  %v10480_v47 = vpop.permute.xlu1 %10479  ;;  %v9631_v0 = vadd.f32 %v9591_v1, %v16890_v49  ;;  %v9595_v61 = vsel %vm4172_vm14, %v16968_v26, %v17646_v35 }
 0x89f   :  { %v10464_v58 = vpop.permute.xlu0 %10463  ;;  %v10618_v48 = vadd.f32 %v10617_v45, %v10599_v22  ;;  %v10600_v15 = vmul.f32 %v17007_v52, %v17055_v24  ;;  %v9633_v22 = vadd.f32 %v9593_v56, %v16919_v16 }
 0x8a0   :  { %v10494_v27 = vsel %vm5088_vm15, %v10462_v36, %v10464_v58 }
 0x8a1   :  { %v17060_v32 = vadd.f32 %v10494_v27, %v9626_v53  ;;  %v10619_v36 = vadd.f32 %v10618_v48, %v10600_v15 }
 0x8a3   :  { %v10468_v6 = vpop.permute.xlu0 %10467  ;;  %v10601_v19 = vmul.f32 %v17017_v51, %v17060_v32 }
 0x8a5   :  { %v10620_v55 = vadd.f32 %v10619_v36, %v10601_v19  ;;  %v17647_v36 = vld [vmem:[#allocation24_spill] sm:$0xff] }
 0x8a7   :  { %v10466_v20 = vpop.permute.xlu0 %10465 }
 0x8a8   :  { %v10495_v59 = vsel %vm5088_vm15, %v10464_v58, %v10466_v20  ;;  %v10496_v7 = vsel %vm5088_vm15, %v10466_v20, %v10468_v6  ;;  %v9634_v20 = vadd.f32 %v9594_v38, %v16933_v13 }
 0x8a9   :  { %v17065_v42 = vadd.f32 %v10495_v59, %v9627_v62  ;;  %v17084_v58 = vadd.f32 %v10496_v7, %v9628_v33  ;;  %v10482_v59 = vpop.permute.xlu1 %10481 }
 0x8aa   :  { %v10503_v33 = vsel %vm5088_vm15, %v10480_v47, %v10482_v59 }
 0x8ab   :  { %v10470_v39 = vpop.permute.xlu0 %10469  ;;  %v10602_v25 = vmul.f32 %v16966_v57, %v17065_v42  ;;  %v10603_v60 = vmul.f32 %v16961_v54, %v17084_v58 }
 0x8ac   :  { %v10497_v41 = vsel %vm5088_vm15, %v10468_v6, %v10470_v39  ;;  %v9632_v6 = vadd.f32 %v9592_v14, %v16893_v50 }
 0x8ad   :  { %v10621_v17 = vadd.f32 %v10620_v55, %v10602_v25  ;;  %v17088_v44 = vadd.f32 %v10497_v41, %v9629_v28  ;;  %v9635_v25 = vadd.f32 %v9595_v61, %v17647_v36 }
 0x8af   :  { %v10472_v46 = vpop.permute.xlu0 %10471  ;;  %v10622_v37 = vadd.f32 %v10621_v17, %v10603_v60  ;;  %v10604_v43 = vmul.f32 %v16973_v31, %v17088_v44  ;;  %v17139_v55 = vadd.f32 %v10503_v33, %v9635_v25 }
 0x8b0   :  { %v10498_v12 = vsel %vm5088_vm15, %v10470_v39, %v10472_v46 }
 0x8b1   :  { %v17092_v21 = vadd.f32 %v10498_v12, %v9630_v10  ;;  %v10623_v62 = vadd.f32 %v10622_v37, %v10604_v43  ;;  %v10610_v1 = vmul.f32 %v17007_v52, %v17139_v55 }
 0x8b3   :  { %v10476_v23 = vpop.permute.xlu0 %10475  ;;  %v10605_v8 = vmul.f32 %v17007_v52, %v17092_v21 }
 0x8b5   :  { %v10624_v48 = vadd.f32 %v10623_v62, %v10605_v8 }
 0x8b7   :  { %v10474_v27 = vpop.permute.xlu0 %10473 }
 0x8b8   :  { %v10499_v53 = vsel %vm5088_vm15, %v10472_v46, %v10474_v27  ;;  %v10500_v45 = vsel %vm5088_vm15, %v10474_v27, %v10476_v23 }
 0x8b9   :  { %v17114_v49 = vadd.f32 %v10499_v53, %v9631_v0  ;;  %v17116_v50 = vadd.f32 %v10500_v45, %v9632_v6  ;;  %v10745_v0 = vld [vmem:[%s17475_s8] sm:$0xff] }
 0x8bb   :  { %v10606_v11 = vmul.f32 %v17017_v51, %v17114_v49  ;;  %v10478_v15 = vpop.permute.xlu0 %10477  ;;  %v10607_v30 = vmul.f32 %v16966_v57, %v17116_v50 }
 0x8bc   :  { %v10501_v19 = vsel %vm5088_vm15, %v10476_v23, %v10478_v15  ;;  %v10502_v39 = vsel %vm5088_vm15, %v10478_v15, %v10480_v47 }
 0x8bd   :  { %v10625_v16 = vadd.f32 %v10624_v48, %v10606_v11  ;;  %v17129_v7 = vadd.f32 %v10501_v19, %v9633_v22  ;;  %v17131_v13 = vadd.f32 %v10502_v39, %v9634_v20 }
 0x8bf   :  { %v10626_v40 = vadd.f32 %v10625_v16, %v10607_v30  ;;  %v10608_v26 = vmul.f32 %v16961_v54, %v17129_v7  ;;  %v9576_v41 = vpop.permute.xlu0 %9575  ;;  %v10609_v46 = vmul.f32 %v16973_v31, %v17131_v13 }
 0x8c0   :  { %v9596_v28 = vsel %vm4172_vm14, %v17646_v35, %v9576_v41 }
 0x8c1   :  { %v10627_v12 = vadd.f32 %v10626_v40, %v10608_v26  ;;  %v9636_v17 = vadd.f32 %v9596_v28, %v17003_v29 }
 0x8c3   :  { %v10628_v10 = vadd.f32 %v10627_v12, %v10609_v46  ;;  %v10484_v60 = vpop.permute.xlu0 %10483 }
 0x8c4   :  { %v10504_v23 = vsel %vm5088_vm15, %v10482_v59, %v10484_v60 }
 0x8c5   :  { %v17147_v14 = vadd.f32 %v10504_v23, %v9636_v17  ;;  %v10629_v37 = vadd.f32 %v10628_v10, %v10610_v1 }
 0x8c7   :  { %v10611_v47 = vmul.f32 %v17017_v51, %v17147_v14 }
 0x8c9   :  { %v10630_v43 = vadd.f32 %v10629_v37, %v10611_v47 }
 0x8cb   :  { %10631 = vadd.xlane.f32.xlu1 %v10630_v43 }
 0x8dc   :  { %10748 = vperm.xlu1 %12547, %v10745_v0  }
 0x958   :  { %v10632_v29 = vpop.xlane.xlu1 %10631 }
 0x959   :  { %v17154_v6 = vmul.f32 0.0011111111, %v10632_v29 }
 0x95b   :  { %v17158_v8 = vsub.f32 %v16970_v2, %v17154_v6  ;;  %v17162_v27 = vsub.f32 %v16963_v9, %v17154_v6  ;;  %v17166_v56 = vsub.f32 %v16975_v4, %v17154_v6  ;;  %v17174_v45 = vsub.f32 %v17009_v3, %v17154_v6 }
 0x95c   :  { %v17178_v2 = vsub.f32 %v17019_v34, %v17154_v6  ;;  %v17184_v22 = vsub.f32 %v17025_v18, %v17154_v6  ;;  %v17190_v3 = vsub.f32 %v17029_v63, %v17154_v6  ;;  %v17196_v11 = vsub.f32 %v17048_v5, %v17154_v6 }
 0x95d   :  { %v10654_v38 = vmul.f32 %v17158_v8, %v16966_v57  ;;  %v10655_v53 = vmul.f32 %v17162_v27, %v16961_v54  ;;  %v10656_v9 = vmul.f32 %v17166_v56, %v16973_v31  ;;  %v10657_v20 = vmul.f32 %v17174_v45, %v17007_v52 }
 0x95e   :  { %v10658_v34 = vmul.f32 %v17178_v2, %v17017_v51  ;;  %v10659_v18 = vmul.f32 %v17184_v22, %v16966_v57  ;;  %v17202_v61 = vsub.f32 %v17055_v24, %v17154_v6  ;;  %v10660_v63 = vmul.f32 %v17190_v3, %v16961_v54 }
 0x95f   :  { %v10674_v62 = vmul.f32 %v10654_v38, %v10654_v38  ;;  %v10675_v4 = vmul.f32 %v10655_v53, %v10655_v53  ;;  %v10676_v59 = vmul.f32 %v10656_v9, %v10656_v9  ;;  %v10677_v15 = vmul.f32 %v10657_v20, %v10657_v20 }
 0x960   :  { %v10678_v19 = vmul.f32 %v10658_v34, %v10658_v34  ;;  %v17208_v30 = vsub.f32 %v17060_v32, %v17154_v6  ;;  %v10661_v5 = vmul.f32 %v17196_v11, %v16973_v31  ;;  %v10679_v16 = vmul.f32 %v10659_v18, %v10659_v18 }
 0x961   :  { %v10694_v48 = vadd.f32 %v10675_v4, %v10674_v62  ;;  %v17214_v36 = vsub.f32 %v17065_v42, %v17154_v6  ;;  %v10662_v24 = vmul.f32 %v17202_v61, %v17007_v52  ;;  %v10680_v25 = vmul.f32 %v10660_v63, %v10660_v63 }
 0x962   :  { %v17220_v26 = vsub.f32 %v17084_v58, %v17154_v6  ;;  %v10663_v32 = vmul.f32 %v17208_v30, %v17017_v51  ;;  %v10681_v41 = vmul.f32 %v10661_v5, %v10661_v5  ;;  %v17226_v46 = vsub.f32 %v17088_v44, %v17154_v6 }
 0x963   :  { %v10695_v35 = vadd.f32 %v10694_v48, %v10676_v59  ;;  %v10664_v42 = vmul.f32 %v17214_v36, %v16966_v57  ;;  %v10682_v12 = vmul.f32 %v10662_v24, %v10662_v24  ;;  %v17232_v17 = vsub.f32 %v17092_v21, %v17154_v6 }
 0x964   :  { %v10665_v58 = vmul.f32 %v17220_v26, %v16961_v54  ;;  %v10683_v60 = vmul.f32 %v10663_v32, %v10663_v32  ;;  %v10648_v1 = vsub.f32 %v17114_v49, %v17154_v6  ;;  %v10666_v44 = vmul.f32 %v17226_v46, %v16973_v31 }
 0x965   :  { %v10696_v39 = vadd.f32 %v10695_v35, %v10677_v15  ;;  %v10684_v47 = vmul.f32 %v10664_v42, %v10664_v42  ;;  %v10649_v43 = vsub.f32 %v17116_v50, %v17154_v6  ;;  %v10667_v21 = vmul.f32 %v17232_v17, %v17007_v52 }
 0x966   :  { %v10685_v0 = vmul.f32 %v10665_v58, %v10665_v58  ;;  %v10650_v38 = vsub.f32 %v17129_v7, %v17154_v6  ;;  %v10668_v53 = vmul.f32 %v10648_v1, %v17017_v51  ;;  %v10686_v9 = vmul.f32 %v10666_v44, %v10666_v44 }
 0x967   :  { %v10697_v33 = vadd.f32 %v10696_v39, %v10678_v19  ;;  %v10651_v62 = vsub.f32 %v17131_v13, %v17154_v6  ;;  %v10669_v4 = vmul.f32 %v10649_v43, %v16966_v57  ;;  %v10687_v20 = vmul.f32 %v10667_v21, %v10667_v21 }
 0x968   :  { %v10652_v50 = vsub.f32 %v17139_v55, %v17154_v6  ;;  %v10670_v59 = vmul.f32 %v10650_v38, %v16961_v54  ;;  %v10688_v48 = vmul.f32 %v10668_v53, %v10668_v53  ;;  %v10653_v7 = vsub.f32 %v17147_v14, %v17154_v6 }
 0x969   :  { %v10698_v40 = vadd.f32 %v10697_v33, %v10679_v16  ;;  %v10671_v15 = vmul.f32 %v10651_v62, %v16973_v31  ;;  %v10689_v35 = vmul.f32 %v10669_v4, %v10669_v4  ;;  %v10718_v31 = vld [vmem:[%s17476_s7] sm:$0xff] }
 0x96a   :  { %v10672_v13 = vmul.f32 %v10652_v50, %v17007_v52  ;;  %v10690_v19 = vmul.f32 %v10670_v59, %v10670_v59  ;;  %v10673_v39 = vmul.f32 %v10653_v7, %v17017_v51 }
 0x96b   :  { %v10699_v28 = vadd.f32 %v10698_v40, %v10680_v25  ;;  %v10691_v5 = vmul.f32 %v10671_v15, %v10671_v15 }
 0x96c   :  { %v10692_v55 = vmul.f32 %v10672_v13, %v10672_v13  ;;  %v10693_v54 = vmul.f32 %v10673_v39, %v10673_v39 }
 0x96d   :  { %v10700_v10 = vadd.f32 %v10699_v28, %v10681_v41 }
 0x96f   :  { %v10701_v23 = vadd.f32 %v10700_v10, %v10682_v12 }
 0x971   :  { %v10702_v37 = vadd.f32 %v10701_v23, %v10683_v60 }
 0x973   :  { %v10703_v29 = vadd.f32 %v10702_v37, %v10684_v47  ;;  %v10749_v37 = vpop.permute.xlu1 %10748 }
 0x975   :  { %v10704_v49 = vadd.f32 %v10703_v29, %v10685_v0 }
 0x977   :  { %v10705_v34 = vadd.f32 %v10704_v49, %v10686_v9 }
 0x979   :  { %v10706_v18 = vadd.f32 %v10705_v34, %v10687_v20 }
 0x97b   :  { %v10707_v63 = vadd.f32 %v10706_v18, %v10688_v48 }
 0x97d   :  { %v10708_v57 = vadd.f32 %v10707_v63, %v10689_v35 }
 0x97f   :  { %v10709_v16 = vadd.f32 %v10708_v57, %v10690_v19 }
 0x981   :  { %v10710_v33 = vadd.f32 %v10709_v16, %v10691_v5 }
 0x983   :  { %v10711_v24 = vadd.f32 %v10710_v33, %v10692_v55 }
 0x985   :  { %v10712_v25 = vadd.f32 %v10711_v24, %v10693_v54 }
 0x987   :  { %10713 = vadd.xlane.f32.xlu0 %v10712_v25 }
 0xa14   :  { %v10714_v40 = vpop.xlane.xlu0 %10713 }
 0xa15   :  { %v10715_v14 = vmul.f32 0.0011111111, %v10714_v40 }
 0xa17   :  { %v10716_v6 = vadd.f32 1e-05, %v10715_v14 }
 0xa19   :  { %12872 = vrsqrt.f32 %v10716_v6 }
 0xa23   :  { %v12873_v52 = vpop.eup %12872 }
 0xa24   :  { %v10719_v32 = vmul.f32 %v12873_v52, %v10718_v31 }
 0xa26   :  { %10722 = vperm.xlu0 %12546, %v10719_v32  }
 0xaa5   :  { %v10723_v51 = vpop.permute.xlu0 %10722 }
 0xaa6   :  { %v10725_v41 = vmul.f32 %v10723_v51, %v17158_v8  ;;  %v10726_v28 = vmul.f32 %v10723_v51, %v17162_v27  ;;  %v10727_v42 = vmul.f32 %v10723_v51, %v17166_v56  ;;  %v10728_v12 = vmul.f32 %v10723_v51, %v17174_v45 }
 0xaa7   :  { %v10729_v10 = vmul.f32 %v10723_v51, %v17178_v2  ;;  %v10730_v58 = vmul.f32 %v10723_v51, %v17184_v22  ;;  %v10731_v60 = vmul.f32 %v10723_v51, %v17190_v3  ;;  %v10732_v23 = vmul.f32 %v10723_v51, %v17196_v11 }
 0xaa8   :  { %v10733_v44 = vmul.f32 %v10723_v51, %v17202_v61  ;;  %v10734_v47 = vmul.f32 %v10723_v51, %v17208_v30  ;;  %v10735_v8 = vmul.f32 %v10723_v51, %v17214_v36  ;;  %v10736_v27 = vmul.f32 %v10723_v51, %v17220_v26 }
 0xaa9   :  { %v10737_v56 = vmul.f32 %v10723_v51, %v17226_v46  ;;  %v10738_v45 = vmul.f32 %v10723_v51, %v17232_v17  ;;  %v10739_v2 = vmul.f32 %v10723_v51, %v10648_v1  ;;  %v10740_v21 = vmul.f32 %v10723_v51, %v10649_v43 }
 0xaaa   :  { %v10741_v22 = vmul.f32 %v10723_v51, %v10650_v38  ;;  %v10742_v0 = vmul.f32 %v10723_v51, %v10651_v62  ;;  %v10751_v3 = vadd.f32 %v10749_v37, %v10725_v41  ;;  %v10752_v29 = vadd.f32 %v10749_v37, %v10726_v28 }
 0xaab   :  { %v10753_v11 = vadd.f32 %v10749_v37, %v10727_v42  ;;  %v10754_v53 = vadd.f32 %v10749_v37, %v10728_v12  ;;  %v10756_v61 = vadd.f32 %v10749_v37, %v10730_v58  ;;  %v10757_v9 = vadd.f32 %v10749_v37, %v10731_v60 }
 0xaac   :  { %v10758_v30 = vadd.f32 %v10749_v37, %v10732_v23  ;;  %v10743_v49 = vmul.f32 %v10723_v51, %v10652_v50  ;;  %v10755_v36 = vadd.f32 %v10749_v37, %v10729_v10  ;;  %v10759_v4 = vadd.f32 %v10749_v37, %v10733_v44 }
 0xaad   :  { %v10760_v26 = vadd.f32 %v10749_v37, %v10734_v47  ;;  %v10744_v20 = vmul.f32 %v10723_v51, %v10653_v7  ;;  %v10761_v46 = vadd.f32 %v10749_v37, %v10735_v8  ;;  %v10762_v34 = vadd.f32 %v10749_v37, %v10736_v27 }
 0xaae   :  { %v10763_v59 = vadd.f32 %v10749_v37, %v10737_v56  ;;  %v10764_v17 = vadd.f32 %v10749_v37, %v10738_v45  ;;  %v17275_v1 = vadd.f32 %v10749_v37, %v10739_v2  ;;  %v17277_v43 = vadd.f32 %v10749_v37, %v10740_v21 }
 0xaaf   :  { %v10771_v38 = vmax.f32 %v10751_v3, %v10756_v61  ;;  %v10772_v62 = vmax.f32 %v10752_v29, %v10757_v9  ;;  %v10773_v48 = vmax.f32 %v10753_v11, %v10758_v30  ;;  %v10774_v18 = vmax.f32 %v10754_v53, %v10759_v4 }
 0xab0   :  { %v17279_v15 = vadd.f32 %v10749_v37, %v10741_v22  ;;  %v17281_v35 = vadd.f32 %v10749_v37, %v10742_v0  ;;  %v17283_v50 = vadd.f32 %v10749_v37, %v10743_v49  ;;  %v10775_v63 = vmax.f32 %v10755_v36, %v10760_v26 }
 0xab1   :  { %v10776_v7 = vmax.f32 %v10771_v38, %v10761_v46  ;;  %v10777_v13 = vmax.f32 %v10772_v62, %v10762_v34  ;;  %v10778_v19 = vmax.f32 %v10773_v48, %v10763_v59  ;;  %v10779_v57 = vmax.f32 %v10774_v18, %v10764_v17 }
 0xab2   :  { %v17285_v39 = vadd.f32 %v10749_v37, %v10744_v20  ;;  %v10780_v5 = vmax.f32 %v10775_v63, %v17275_v1 }
 0xab3   :  { %v10781_v16 = vmax.f32 %v10776_v7, %v17277_v43  ;;  %v10782_v55 = vmax.f32 %v10777_v13, %v17279_v15  ;;  %v10783_v33 = vmax.f32 %v10778_v19, %v17281_v35  ;;  %v10784_v54 = vmax.f32 %v10779_v57, %v17283_v50 }
 0xab4   :  { %v10785_v24 = vmax.f32 %v10780_v5, %v17285_v39 }
 0xab5   :  { %v10786_v25 = vsub.f32 %v10751_v3, %v10781_v16  ;;  %v10787_v40 = vsub.f32 %v10752_v29, %v10782_v55  ;;  %v10788_v14 = vsub.f32 %v10753_v11, %v10783_v33  ;;  %v10789_v6 = vsub.f32 %v10754_v53, %v10784_v54 }
 0xab6   :  { %v10790_v31 = vsub.f32 %v10755_v36, %v10785_v24  ;;  %v10801_v52 = vsub.f32 %v10756_v61, %v10781_v16  ;;  %v10802_v28 = vsub.f32 %v10757_v9, %v10782_v55  ;;  %v10803_v12 = vsub.f32 %v10758_v30, %v10783_v33 }
 0xab7   :  { %v10791_v32 = vmul.f32 1.442695, %v10786_v25  ;;  %v10793_v51 = vmul.f32 1.442695, %v10787_v40  ;;  %v10795_v41 = vmul.f32 1.442695, %v10788_v14  ;;  %v10804_v58 = vsub.f32 %v10759_v4, %v10784_v54 }
 0xab8   :  { %v10797_v42 = vmul.f32 1.442695, %v10789_v6  ;;  %v10799_v10 = vmul.f32 1.442695, %v10790_v31  ;;  %v10805_v60 = vsub.f32 %v10760_v26, %v10785_v24  ;;  %v10806_v23 = vmul.f32 1.442695, %v10801_v52 }
 0xab9   :  { %12874 = vpow2.f32 %v10791_v32  ;;  %v10808_v44 = vmul.f32 1.442695, %v10802_v28  ;;  %v10816_v47 = vsub.f32 %v10761_v46, %v10781_v16  ;;  %v10810_v8 = vmul.f32 1.442695, %v10803_v12 }
 0xaba   :  { %12876 = vpow2.f32 %v10793_v51  ;;  %v10817_v27 = vsub.f32 %v10762_v34, %v10782_v55  ;;  %v10812_v56 = vmul.f32 1.442695, %v10804_v58  ;;  %v10818_v37 = vsub.f32 %v10763_v59, %v10783_v33  ;;  %v17334_v58 = vld [vmem:[%s17477_s11] sm:$0xff] }
 0xabb   :  { %12878 = vpow2.f32 %v10795_v41  ;;  %v10814_v45 = vmul.f32 1.442695, %v10805_v60  ;;  %v10819_v2 = vsub.f32 %v10764_v17, %v10784_v54  ;;  %v10820_v21 = vsub.f32 %v17275_v1, %v10785_v24 }
 0xabc   :  { %12880 = vpow2.f32 %v10797_v42  ;;  %v10821_v22 = vmul.f32 1.442695, %v10816_v47  ;;  %v10823_v0 = vmul.f32 1.442695, %v10817_v27  ;;  %v10831_v3 = vsub.f32 %v17277_v43, %v10781_v16  ;;  %v17346_v47 = vld [vmem:[%s17477_s11 + $0x8] sm:$0xff]  ;;  %v17353_v27 = vld [vmem:[%s17477_s11 + $0x38] sm:$0xff] }
 0xabd   :  { %12882 = vpow2.f32 %v10799_v10  ;;  %v10825_v29 = vmul.f32 1.442695, %v10818_v37  ;;  %v10832_v11 = vsub.f32 %v17279_v15, %v10782_v55  ;;  %v10827_v53 = vmul.f32 1.442695, %v10819_v2  ;;  %v17329_v10 = vld [vmem:[%s17477_s11 + $0x28] sm:$0xff] }
 0xabe   :  { %12884 = vpow2.f32 %v10806_v23  ;;  %v10833_v61 = vsub.f32 %v17281_v35, %v10783_v33  ;;  %v10829_v30 = vmul.f32 1.442695, %v10820_v21  ;;  %v10834_v49 = vsub.f32 %v17283_v50, %v10784_v54  ;;  %v17341_v23 = vld [vmem:[%s17477_s11 + $0x30] sm:$0xff] }
 0xabf   :  { %12886 = vpow2.f32 %v10808_v44  ;;  %v10835_v4 = vsub.f32 %v17285_v39, %v10785_v24  ;;  %v10836_v26 = vmul.f32 1.442695, %v10831_v3  ;;  %v10838_v46 = vmul.f32 1.442695, %v10832_v11  ;;  %v17366_v3 = vld [vmem:[%s17477_s11 + $0x10] sm:$0xff] }
 0xac0   :  { %12888 = vpow2.f32 %v10810_v8  ;;  %v10840_v59 = vmul.f32 1.442695, %v10833_v61  ;;  %v10842_v1 = vmul.f32 1.442695, %v10834_v49  ;;  %v17375_v61 = vld [vmem:[%s17477_s11 + $0x40] sm:$0xff]  ;;  %v17382_v49 = vld [vmem:[%s17477_s11 + $0x18] sm:$0xff] }
 0xac1   :  { %12890 = vpow2.f32 %v10812_v56  ;;  %v10844_v38 = vmul.f32 1.442695, %v10835_v4 }
 0xac2   :  { %12892 = vpow2.f32 %v10814_v45 }
 0xac3   :  { %v17297_v9 = vpop.eup %12874  ;;  %12894 = vpow2.f32 %v10821_v22 }
 0xac4   :  { %v17300_v36 = vpop.eup %12876  ;;  %12896 = vpow2.f32 %v10823_v0 }
 0xac5   :  { %v17303_v20 = vpop.eup %12878  ;;  %12898 = vpow2.f32 %v10825_v29 }
 0xac6   :  { %v17305_v34 = vpop.eup %12880  ;;  %12900 = vpow2.f32 %v10827_v53 }
 0xac7   :  { %v17307_v17 = vpop.eup %12882  ;;  %12902 = vpow2.f32 %v10829_v30 }
 0xac8   :  { %v12885_v43 = vpop.eup %12884  ;;  %12904 = vpow2.f32 %v10836_v26 }
 0xac9   :  { %v12887_v62 = vpop.eup %12886  ;;  %12906 = vpow2.f32 %v10838_v46  ;;  %v10846_v15 = vadd.f32 %v12885_v43, %v17297_v9  ;;  %v17390_v46 = vld [vmem:[%s17477_s11 + $0x48] sm:$0xff] }
 0xaca   :  { %v12889_v48 = vpop.eup %12888  ;;  %12908 = vpow2.f32 %v10840_v59  ;;  %v10847_v50 = vadd.f32 %v12887_v62, %v17300_v36 }
 0xacb   :  { %v12891_v18 = vpop.eup %12890  ;;  %12910 = vpow2.f32 %v10842_v1  ;;  %v10848_v7 = vadd.f32 %v12889_v48, %v17303_v20 }
 0xacc   :  { %v12893_v35 = vpop.eup %12892  ;;  %12912 = vpow2.f32 %v10844_v38  ;;  %v10849_v19 = vadd.f32 %v12891_v18, %v17305_v34 }
 0xacd   :  { %v12895_v63 = vpop.eup %12894  ;;  %v10850_v39 = vadd.f32 %v12893_v35, %v17307_v17 }
 0xace   :  { %v12897_v13 = vpop.eup %12896  ;;  %v10851_v5 = vadd.f32 %v12895_v63, %v10846_v15 }
 0xacf   :  { %v12899_v57 = vpop.eup %12898  ;;  %v10852_v55 = vadd.f32 %v12897_v13, %v10847_v50 }
 0xad0   :  { %v12901_v16 = vpop.eup %12900  ;;  %v10853_v54 = vadd.f32 %v12899_v57, %v10848_v7 }
 0xad1   :  { %v12903_v33 = vpop.eup %12902  ;;  %v10854_v25 = vadd.f32 %v12901_v16, %v10849_v19 }
 0xad2   :  { %v12905_v24 = vpop.eup %12904  ;;  %v10855_v14 = vadd.f32 %v12903_v33, %v10850_v39 }
 0xad3   :  { %v17314_v40 = vpop.eup %12906  ;;  %v10856_v6 = vadd.f32 %v12905_v24, %v10851_v5 }
 0xad4   :  { %v17316_v31 = vpop.eup %12908  ;;  %v10857_v52 = vadd.f32 %v17314_v40, %v10852_v55 }
 0xad5   :  { %v17319_v32 = vpop.eup %12910  ;;  %v10858_v51 = vadd.f32 %v17316_v31, %v10853_v54  ;;  %12914 = vrcp.f32 %v10856_v6 }
 0xad6   :  { %v17322_v41 = vpop.eup %12912  ;;  %v10859_v28 = vadd.f32 %v17319_v32, %v10854_v25  ;;  %12916 = vrcp.f32 %v10857_v52 }
 0xad7   :  { %v10860_v42 = vadd.f32 %v17322_v41, %v10855_v14  ;;  %12918 = vrcp.f32 %v10858_v51 }
 0xad8   :  { %12920 = vrcp.f32 %v10859_v28 }
 0xad9   :  { %12922 = vrcp.f32 %v10860_v42 }
 0xadf   :  { %v12915_v12 = vpop.eup %12914 }
 0xae0   :  { %v17336_v60 = vpop.eup %12916  ;;  %v10918_v44 = vmul.f32 %v12915_v12, %v12885_v43  ;;  %v10958_v37 = vmul.f32 %v12915_v12, %v12895_v63  ;;  %v10877_v45 = vmul.f32 %v12915_v12, %v17297_v9  ;;  %v17357_v2 = vmul.f32 %v12915_v12, %v12905_v24  ;;  %v17397_v43 = vld [vmem:[%s17477_s11 + $0x20] sm:$0xff] }
 0xae1   :  { %v17348_v8 = vpop.eup %12918  ;;  %v10919_v56 = vmul.f32 %v17336_v60, %v12887_v62  ;;  %v10959_v11 = vmul.f32 %v17336_v60, %v12897_v13  ;;  %v10878_v26 = vmul.f32 %v17336_v60, %v17300_v36 }
 0xae2   :  { %v17359_v21 = vpop.eup %12920  ;;  %v10920_v22 = vmul.f32 %v17348_v8, %v12889_v48  ;;  %v10940_v0 = vmul.f32 %v17329_v10, %v10918_v44  ;;  %v10923_v29 = vmul.f32 %v10918_v44, %v17334_v58  ;;  %v10960_v38 = vmul.f32 %v17348_v8, %v12899_v57 }
 0xae3   :  { %v17370_v53 = vpop.eup %12922  ;;  %v10921_v9 = vmul.f32 %v17359_v21, %v12891_v18  ;;  %v10941_v30 = vmul.f32 %v17341_v23, %v10919_v56  ;;  %v10924_v4 = vmul.f32 %v10919_v56, %v17346_v47  ;;  %v10961_v62 = vmul.f32 %v17359_v21, %v12901_v16 }
 0xae4   :  { %v10922_v59 = vmul.f32 %v17370_v53, %v12893_v35  ;;  %v10942_v1 = vmul.f32 %v17353_v27, %v10920_v22  ;;  %v10925_v36 = vmul.f32 %v10920_v22, %v17366_v3  ;;  %v10962_v15 = vmul.f32 %v17370_v53, %v12903_v33 }
 0xae5   :  { %v10945_v48 = vadd.f32 %v10941_v30, %v10940_v0  ;;  %v10928_v18 = vadd.f32 %v10924_v4, %v10923_v29  ;;  %v10943_v50 = vmul.f32 %v17375_v61, %v10921_v9  ;;  %v10926_v35 = vmul.f32 %v10921_v9, %v17382_v49 }
 0xae6   :  { %v10963_v63 = vmul.f32 %v10958_v37, %v17334_v58  ;;  %v10964_v7 = vmul.f32 %v10959_v11, %v17346_v47  ;;  %v10944_v13 = vmul.f32 %v17390_v46, %v10922_v59  ;;  %v10927_v57 = vmul.f32 %v10922_v59, %v17397_v43 }
 0xae7   :  { %v10946_v19 = vadd.f32 %v10945_v48, %v10942_v1  ;;  %v10929_v39 = vadd.f32 %v10928_v18, %v10925_v36  ;;  %v10965_v5 = vmul.f32 %v10960_v38, %v17366_v3  ;;  %v10980_v55 = vmul.f32 %v17329_v10, %v10958_v37 }
 0xae8   :  { %v10968_v16 = vadd.f32 %v10964_v7, %v10963_v63  ;;  %v10981_v33 = vmul.f32 %v17341_v23, %v10959_v11  ;;  %v10966_v25 = vmul.f32 %v10961_v62, %v17382_v49  ;;  %v10982_v14 = vmul.f32 %v17353_v27, %v10960_v38 }
 0xae9   :  { %v10947_v54 = vadd.f32 %v10946_v19, %v10943_v50  ;;  %v10930_v24 = vadd.f32 %v10929_v39, %v10926_v35  ;;  %v10983_v52 = vmul.f32 %v17375_v61, %v10961_v62  ;;  %v10879_v28 = vmul.f32 %v17348_v8, %v17303_v20 }
 0xaea   :  { %v10969_v6 = vadd.f32 %v10968_v16, %v10965_v5  ;;  %v10985_v51 = vadd.f32 %v10981_v33, %v10980_v55  ;;  %v10880_v44 = vmul.f32 %v17359_v21, %v17305_v34  ;;  %v10881_v56 = vmul.f32 %v17370_v53, %v17307_v17 }
 0xaeb   :  { %v10948_v42 = vadd.f32 %v10947_v54, %v10944_v13  ;;  %v10931_v12 = vadd.f32 %v10930_v24, %v10927_v57  ;;  %v10899_v0 = vmul.f32 %v17329_v10, %v10877_v45  ;;  %v10900_v29 = vmul.f32 %v17341_v23, %v10878_v26 }
 0xaec   :  { %v10970_v37 = vadd.f32 %v10969_v6, %v10966_v25  ;;  %v10986_v22 = vadd.f32 %v10985_v51, %v10982_v14  ;;  %v10967_v11 = vmul.f32 %v10962_v15, %v17397_v43  ;;  %v10984_v20 = vmul.f32 %v17390_v46, %v10962_v15 }
 0xaed   :  { %10949 = vadd.xlane.f32.xlu0 %v10948_v42  ;;  %10932 = vadd.xlane.f32.xlu1 %v10931_v12  ;;  %v10999_v9 = vmul.f32 %v17336_v60, %v17314_v40  ;;  %v10901_v34 = vmul.f32 %v17353_v27, %v10879_v28  ;;  %v10904_v4 = vadd.f32 %v10900_v29, %v10899_v0 }
 0xaee   :  { %v10987_v30 = vadd.f32 %v10986_v22, %v10983_v52  ;;  %v10882_v17 = vmul.f32 %v10877_v45, %v17334_v58  ;;  %v10971_v59 = vadd.f32 %v10970_v37, %v10967_v11  ;;  %v10902_v1 = vmul.f32 %v17375_v61, %v10880_v44 }
 0xaef   :  { %v10903_v38 = vmul.f32 %v17390_v46, %v10881_v56  ;;  %v10883_v62 = vmul.f32 %v10878_v26, %v17346_v47  ;;  %v10905_v36 = vadd.f32 %v10904_v4, %v10901_v34  ;;  %v11000_v18 = vmul.f32 %v17348_v8, %v17316_v31 }
 0xaf0   :  { %v10988_v48 = vadd.f32 %v10987_v30, %v10984_v20  ;;  %v11001_v40 = vmul.f32 %v17359_v21, %v17319_v32  ;;  %v10884_v60 = vmul.f32 %v10879_v28, %v17366_v3  ;;  %v11020_v45 = vmul.f32 %v17329_v10, %v17357_v2 }
 0xaf1   :  { %10972 = vadd.xlane.f32.xlu0 %v10971_v59  ;;  %v10887_v15 = vadd.f32 %v10883_v62, %v10882_v17  ;;  %v11021_v50 = vmul.f32 %v17341_v23, %v10999_v9  ;;  %v10906_v35 = vadd.f32 %v10905_v36, %v10902_v1  ;;  %v10885_v26 = vmul.f32 %v10880_v44, %v17382_v49 }
 0xaf2   :  { %10989 = vadd.xlane.f32.xlu1 %v10988_v48  ;;  %v11002_v63 = vmul.f32 %v17370_v53, %v17322_v41  ;;  %v11003_v31 = vmul.f32 %v17357_v2, %v17334_v58  ;;  %v11022_v8 = vmul.f32 %v17353_v27, %v11000_v18  ;;  %v11004_v7 = vmul.f32 %v10999_v9, %v17346_v47 }
 0xaf3   :  { %v10888_v32 = vadd.f32 %v10887_v15, %v10884_v60  ;;  %v11025_v21 = vadd.f32 %v11021_v50, %v11020_v45  ;;  %v10907_v13 = vadd.f32 %v10906_v35, %v10903_v38  ;;  %v10886_v10 = vmul.f32 %v10881_v56, %v17397_v43 }
 0xaf4   :  { %v11023_v23 = vmul.f32 %v17375_v61, %v11001_v40  ;;  %v11005_v39 = vmul.f32 %v11000_v18, %v17366_v3  ;;  %v11008_v5 = vadd.f32 %v11004_v7, %v11003_v31  ;;  %v11024_v41 = vmul.f32 %v17390_v46, %v11002_v63 }
 0xaf5   :  { %v10889_v19 = vadd.f32 %v10888_v32, %v10885_v26  ;;  %v11026_v57 = vadd.f32 %v11025_v21, %v11022_v8  ;;  %v11006_v27 = vmul.f32 %v11001_v40, %v17382_v49  ;;  %v11007_v16 = vmul.f32 %v11002_v63, %v17397_v43 }
 0xaf6   :  { %10908 = vadd.xlane.f32.xlu1 %v10907_v13  ;;  %v11009_v53 = vadd.f32 %v11008_v5, %v11005_v39 }
 0xaf7   :  { %v10890_v58 = vadd.f32 %v10889_v19, %v10886_v10  ;;  %v11027_v2 = vadd.f32 %v11026_v57, %v11023_v23 }
 0xaf8   :  { %v11010_v55 = vadd.f32 %v11009_v53, %v11006_v27 }
 0xaf9   :  { %10891 = vadd.xlane.f32.xlu0 %v10890_v58  ;;  %v11028_v47 = vadd.f32 %v11027_v2, %v11024_v41 }
 0xafa   :  { %v11011_v61 = vadd.f32 %v11010_v55, %v11007_v16 }
 0xafb   :  { %11029 = vadd.xlane.f32.xlu1 %v11028_v47 }
 0xafd   :  { %11012 = vadd.xlane.f32.xlu0 %v11011_v61  ;;  %v11400_v61 = vld [vmem:[%s17478_s12] ss:$0 sm:$0xff] }
 0xb7a   :  { %v10950_v33 = vpop.xlane.xlu0 %10949  ;;  %v10933_v54 = vpop.xlane.xlu1 %10932 }
 0xb7b   :  { %v10951_v3 = vrot.slane %v10950_v33, 4  ;;  %v10934_v24 = vrot.slane %v10933_v54, 4 }
 0xb7d   :  { %v10952_v25 = vadd.f32 %v10951_v3, %v10950_v33  ;;  %v10935_v14 = vadd.f32 %v10934_v24, %v10933_v54 }
 0xb7e   :  { %v10973_v46 = vpop.xlane.xlu0 %10972 }
 0xb7f   :  { %v10974_v6 = vrot.slane %v10973_v46, 4  ;;  %v10990_v52 = vpop.xlane.xlu1 %10989  ;;  %v10953_v51 = vrot.slane %v10952_v25, 2  ;;  %v10936_v28 = vrot.slane %v10935_v14, 2 }
 0xb80   :  { %v10991_v49 = vrot.slane %v10990_v52, 4 }
 0xb81   :  { %v10975_v42 = vadd.f32 %v10974_v6, %v10973_v46  ;;  %v10954_v43 = vadd.f32 %v10953_v51, %v10952_v25  ;;  %v10937_v0 = vadd.f32 %v10936_v28, %v10935_v14 }
 0xb82   :  { %v10992_v12 = vadd.f32 %v10991_v49, %v10990_v52 }
 0xb83   :  { %v10909_v44 = vpop.xlane.xlu1 %10908  ;;  %v10976_v56 = vrot.slane %v10975_v42, 2  ;;  %v10955_v9 = vrot.slane %v10954_v43, 1  ;;  %v10938_v59 = vrot.slane %v10937_v0, 1 }
 0xb84   :  { %v10993_v37 = vrot.slane %v10992_v12, 2  ;;  %v10910_v22 = vrot.slane %v10909_v44, 4 }
 0xb85   :  { %v10977_v30 = vadd.f32 %v10976_v56, %v10975_v42  ;;  %v10956_v60 = vadd.f32 %v10955_v9, %v10954_v43  ;;  %v10939_v35 = vadd.f32 %v10938_v59, %v10937_v0 }
 0xb86   :  { %v10911_v29 = vadd.f32 %v10910_v22, %v10909_v44  ;;  %v10892_v11 = vpop.xlane.xlu0 %10891  ;;  %v10994_v34 = vadd.f32 %v10993_v37, %v10992_v12 }
 0xb87   :  { %v10893_v20 = vrot.slane %v10892_v11, 4  ;;  %v10978_v15 = vrot.slane %v10977_v30, 1  ;;  %v10957_v23 = vsel %vm10916_vm1, %v10939_v35, %v10956_v60 }
 0xb88   :  { %v10912_v4 = vrot.slane %v10911_v29, 2  ;;  %v11030_v17 = vpop.xlane.xlu1 %11029  ;;  %v10995_v45 = vrot.slane %v10994_v34, 1  ;;  %v11039_v2 = vrot.slane %v10957_v23, 7 }
 0xb89   :  { %v10894_v1 = vadd.f32 %v10893_v20, %v10892_v11  ;;  %v11031_v38 = vrot.slane %v11030_v17, 4  ;;  %v10979_v13 = vadd.f32 %v10978_v15, %v10977_v30 }
 0xb8a   :  { %v10913_v62 = vadd.f32 %v10912_v4, %v10911_v29  ;;  %v11013_v48 = vpop.xlane.xlu0 %11012  ;;  %v10996_v10 = vadd.f32 %v10995_v45, %v10994_v34 }
 0xb8b   :  { %v10895_v36 = vrot.slane %v10894_v1, 2  ;;  %v11032_v18 = vadd.f32 %v11031_v38, %v11030_v17  ;;  %v11014_v40 = vrot.slane %v11013_v48, 4 }
 0xb8c   :  { %v10914_v50 = vrot.slane %v10913_v62, 1  ;;  %v10997_v27 = vsel %vm10916_vm1, %v10979_v13, %v10996_v10 }
 0xb8d   :  { %v10896_v26 = vadd.f32 %v10895_v36, %v10894_v1  ;;  %v11033_v63 = vrot.slane %v11032_v18, 2  ;;  %v11015_v31 = vadd.f32 %v11014_v40, %v11013_v48  ;;  %v11042_v16 = vrot.slane %v10997_v27, 6 }
 0xb8e   :  { %v10915_v32 = vadd.f32 %v10914_v50, %v10913_v62 }
 0xb8f   :  { %v10897_v8 = vrot.slane %v10896_v26, 1  ;;  %v11034_v21 = vadd.f32 %v11033_v63, %v11032_v18  ;;  %v11016_v7 = vrot.slane %v11015_v31, 2 }
 0xb91   :  { %v10898_v19 = vadd.f32 %v10897_v8, %v10896_v26  ;;  %v11035_v57 = vrot.slane %v11034_v21, 1  ;;  %v11017_v39 = vadd.f32 %v11016_v7, %v11015_v31 }
 0xb93   :  { %v10917_v5 = vsel %vm10916_vm1, %v10898_v19, %v10915_v32  ;;  %v11036_v41 = vadd.f32 %v11035_v57, %v11034_v21  ;;  %v11018_v58 = vrot.slane %v11017_v39, 1 }
 0xb94   :  { %v11047_v47 = vsel %vm563_vm5, %v10917_v5, %v11039_v2 }
 0xb95   :  { %v11019_v53 = vadd.f32 %v11018_v58, %v11017_v39  ;;  %v11048_v54 = vsel %vm6108_vm8, %v11047_v47, %v11042_v16 }
 0xb97   :  { %v11037_v55 = vsel %vm10916_vm1, %v11019_v53, %v11036_v41 }
 0xb98   :  { %v11045_v33 = vrot.slane %v11037_v55, 5 }
 0xb9a   :  { %v11049_v3 = vsel %vm517_vm2, %v11048_v54, %v11045_v33 }
 0xb9b   :  { %v11057_v24 = vadd.f32 %v11400_v61, %v11049_v3 }
 0xb9d   :  { %11059 = vst.msk [vmem:[%s17479_s13] sm:$0xf] %vm11058_vm3, %v11057_v24 }

</bundles_post_ra>
